<compile_context>
chip_gen: v7x
topology: tpu7x:2x2x1
jax: 0.10.0
libtpu: 0.0.40
codegen_flags: <defaults>
</compile_context>

<pallas_src>
import functools

import jax
import jax.numpy as jnp
from jax import lax
from jax.experimental import pallas as pl
from jax.experimental.pallas import tpu as pltpu

EPS = 1e-5
VMEM_LIMIT = 64 * 1024 * 1024


# --------------------------------- helpers -------------------------------------
def _round_up(n, m):
    return ((n + m - 1) // m) * m


def _layer_norm(x, gamma, beta):
    mu = jnp.mean(x, axis=-1, keepdims=True)
    var = jnp.mean(jnp.square(x - mu), axis=-1, keepdims=True)
    return (x - mu) * lax.rsqrt(var + EPS) * gamma + beta


def _rep_spec(arr):
    """Replicated (constant-index) block; single-buffered to halve weight VMEM."""
    nd = arr.ndim
    idx = lambda *_: (0,) * nd
    try:
        return pl.BlockSpec(arr.shape, idx, pipeline_mode=pl.Buffered(1))
    except (TypeError, AttributeError):   # older BlockSpec signature
        return pl.BlockSpec(arr.shape, idx)


def _cparams(semantics):
    return pltpu.CompilerParams(dimension_semantics=semantics,
                                vmem_limit_bytes=VMEM_LIMIT)


def _pad_rows(x2d, block_rows):
    n = x2d.shape[0]
    pad = _round_up(n, block_rows) - n
    if pad:
        x2d = jnp.pad(x2d, ((0, pad), (0, 0)))
    return x2d, n


def _rowwise_call(kernel_fn, x2d, extras, block_rows=256):
    """Row-tiled pallas_call; remainder handled by zero-padded rows (sliced off after)."""
    N, D = x2d.shape
    bn = min(block_rows, _round_up(N, 8))
    xp, n = _pad_rows(x2d, bn)
    Np = xp.shape[0]
    row_spec = pl.BlockSpec((bn, D), lambda i: (i, 0))
    out = pl.pallas_call(
        kernel_fn,
        out_shape=jax.ShapeDtypeStruct((Np, D), jnp.float32),
        grid=(Np // bn,),
        in_specs=[row_spec] + [_rep_spec(a) for a in extras],
        out_specs=row_spec,
        compiler_params=_cparams(("parallel",)),
    )(xp, *extras)
    return out[:n]


# --------------------- macaron feed-forward module kernels ----------------------
def ffn_kernel(x_ref, g_ref, b_ref, w1_ref, b1_ref, w2_ref, b2_ref, o_ref, *, scale):
    x = x_ref[...]
    xn = _layer_norm(x, g_ref[...], b_ref[...])
    h = jnp.dot(xn.astype(jnp.bfloat16), w1_ref[...],
                preferred_element_type=jnp.float32) + b1_ref[...]
    h = h * jax.nn.sigmoid(h)                                   # SiLU (f32)
    y = jnp.dot(h.astype(jnp.bfloat16), w2_ref[...],
                preferred_element_type=jnp.float32) + b2_ref[...]
    o_ref[...] = scale * x + y                                  # scale*residual + FF(x)


def ffn_ln_kernel(x_ref, g_ref, b_ref, w1_ref, b1_ref, w2_ref, b2_ref,
                  gf_ref, bf_ref, o_ref, *, scale):
    # FF #2 fused with the final LayerNorm (saves one full HBM pass).
    x = x_ref[...]
    xn = _layer_norm(x, g_ref[...], b_ref[...])
    h = jnp.dot(xn.astype(jnp.bfloat16), w1_ref[...],
                preferred_element_type=jnp.float32) + b1_ref[...]
    h = h * jax.nn.sigmoid(h)
    y = jnp.dot(h.astype(jnp.bfloat16), w2_ref[...],
                preferred_element_type=jnp.float32) + b2_ref[...]
    o_ref[...] = _layer_norm(scale * x + y, gf_ref[...], bf_ref[...])


def ffn_call(x2d, p, scale):
    extras = (p["ln_g"], p["ln_b"], p["w1"], p["b1"], p["w2"], p["b2"])
    return _rowwise_call(functools.partial(ffn_kernel, scale=scale), x2d, extras)


def ffn_ln_call(x2d, p, pln, scale):
    extras = (p["ln_g"], p["ln_b"], p["w1"], p["b1"], p["w2"], p["b2"],
              pln["g"], pln["b"])
    return _rowwise_call(functools.partial(ffn_ln_kernel, scale=scale), x2d, extras)


# ----------------- relative-position multi-head self-attention -----------------
def attn_kernel(x_ref, g_ref, b_ref, wq_ref, bq_ref, wk_ref, bk_ref, wv_ref, bv_ref,
                wo_ref, bo_ref, relT_ref, o_ref, xn_sc, acc_sc, *, clip):
    h = pl.program_id(1)
    T, D = x_ref.shape                      # per-batch (T, D) block, one head per grid step
    dh = wq_ref.shape[-1]
    scaling = 1.0 / (dh ** 0.5)

    @pl.when(h == 0)
    def _():
        xn_sc[...] = _layer_norm(x_ref[...], g_ref[...], b_ref[...]).astype(jnp.bfloat16)
        acc_sc[...] = jnp.zeros_like(acc_sc)

    xb = xn_sc[...]                         # (T, D) bf16, shared across the H steps
    q = (jnp.dot(xb, wq_ref[...], preferred_element_type=jnp.float32) + bq_ref[...]) * scaling
    k = jnp.dot(xb, wk_ref[...], preferred_element_type=jnp.float32) + bk_ref[...]
    v = jnp.dot(xb, wv_ref[...], preferred_element_type=jnp.float32) + bv_ref[...]

    qb = q.astype(jnp.bfloat16)
    content = lax.dot_general(qb, k.astype(jnp.bfloat16), (((1,), (1,)), ((), ())),
                              preferred_element_type=jnp.float32)                 # (T, T)

    # Positional term: q @ rel_emb.T against the lane-padded (dh, 128*) table on the MXU,
    # then the Shaw shift built from per-diagonal selects on an in-kernel iota.
    pos_raw = jnp.dot(qb, relT_ref[...], preferred_element_type=jnp.float32)      # (T, Rp)
    row = lax.broadcasted_iota(jnp.int32, (T, T), 0)
    col = lax.broadcasted_iota(jnp.int32, (T, T), 1)
    dj = col - row                                                                # j - i
    pos = jnp.where(dj >= clip, pos_raw[:, 2 * clip:2 * clip + 1],
                    jnp.where(dj <= -clip, pos_raw[:, 0:1], 0.0))                 # clipped tris
    lim = min(clip - 1, T - 1)
    for d in range(-lim, lim + 1):                                                # interior band
        r = d + clip
        pos = jnp.where(dj == d, pos_raw[:, r:r + 1], pos)

    s = content + pos
    s = s - jnp.max(s, axis=-1, keepdims=True)
    e = jnp.exp(s)
    p = e * (1.0 / jnp.sum(e, axis=-1, keepdims=True))                            # exact softmax
    ctx = jnp.dot(p.astype(jnp.bfloat16), v.astype(jnp.bfloat16),
                  preferred_element_type=jnp.float32)                             # (T, dh)
    acc_sc[...] += jnp.dot(ctx.astype(jnp.bfloat16), wo_ref[...],
                           preferred_element_type=jnp.float32)                    # per-head out proj

    @pl.when(h == pl.num_programs(1) - 1)
    def _():
        o_ref[...] = x_ref[...] + acc_sc[...] + bo_ref[...]                       # residual, dense store


def attn_call(z, p, num_heads, clip):
    B, T, D = z.shape
    H = num_heads
    x_spec = pl.BlockSpec((None, T, D), lambda b, h: (b, 0, 0))
    head_spec = lambda arr: pl.BlockSpec((None,) + arr.shape[1:], lambda b, h: (h, 0, 0))
    in_specs = ([x_spec, _rep_spec(p["ln_g"]), _rep_spec(p["ln_b"]),
                 head_spec(p["wq"]), head_spec(p["bq"]),
                 head_spec(p["wk"]), head_spec(p["bk"]),
                 head_spec(p["wv"]), head_spec(p["bv"]),
                 head_spec(p["wo"]), _rep_spec(p["bo"]), _rep_spec(p["rel_T"])])
    return pl.pallas_call(
        functools.partial(attn_kernel, clip=clip),
        out_shape=jax.ShapeDtypeStruct((B, T, D), jnp.float32),
        grid=(B, H),
        in_specs=in_specs,
        out_specs=pl.BlockSpec((None, T, D), lambda b, h: (b, 0, 0)),
        scratch_shapes=[pltpu.VMEM((T, D), jnp.bfloat16),     # cached LayerNorm(x)
                        pltpu.VMEM((T, D), jnp.float32)],     # output-projection accumulator
        compiler_params=_cparams(("parallel", "arbitrary")),
    )(z, p["ln_g"], p["ln_b"], p["wq"], p["bq"], p["wk"], p["bk"],
      p["wv"], p["bv"], p["wo"], p["bo"], p["rel_T"])


# ---------------------------- convolution module -------------------------------
def conv_kernel(x_ref, g_ref, b_ref, w1a_ref, b1a_ref, w1b_ref, b1b_ref, dw_ref,
                bn_g_ref, bn_b_ref, bn_m_ref, bn_v_ref, w2_ref, b2_ref, o_ref,
                gpad_sc, *, ksize):
    # Fused: LN + pointwise conv1 (value/gate) + GLU + depthwise conv over time + BatchNorm
    # (inference) + swish + pointwise conv2 + residual -- one batch per grid step.  The GLU
    # output is staged in a zero-padded VMEM scratch, so no HBM round-trip / XLA pad pass.
    T, D = x_ref.shape
    pad = (ksize - 1) // 2
    x = x_ref[...]
    xn = _layer_norm(x, g_ref[...], b_ref[...]).astype(jnp.bfloat16)
    a = jnp.dot(xn, w1a_ref[...], preferred_element_type=jnp.float32) + b1a_ref[...]
    c = jnp.dot(xn, w1b_ref[...], preferred_element_type=jnp.float32) + b1b_ref[...]
    glu = a * jax.nn.sigmoid(c)

    if pad:
        gpad_sc[0:pad, :] = jnp.zeros((pad, D), jnp.float32)
        gpad_sc[T + pad:T + 2 * pad, :] = jnp.zeros((pad, D), jnp.float32)
    gpad_sc[pad:pad + T, :] = glu

    # Depthwise taps grouped by (k mod 8): only 8 sublane-unaligned ref loads; the remaining
    # per-tap slices are 8-aligned value slices.
    dw = dw_ref[...]
    acc = jnp.zeros((T, D), jnp.float32)
    for b0 in range(min(8, ksize)):
        amax = (ksize - 1 - b0) // 8
        slab = gpad_sc[b0:b0 + 8 * amax + T, :]
        for a0 in range(amax + 1):
            k = 8 * a0 + b0
            acc = acc + slab[8 * a0:8 * a0 + T, :] * dw[k:k + 1, :]

    bn = (acc - bn_m_ref[...]) * lax.rsqrt(bn_v_ref[...] + EPS) * bn_g_ref[...] + bn_b_ref[...]
    sw = bn * jax.nn.sigmoid(bn)
    out = jnp.dot(sw.astype(jnp.bfloat16), w2_ref[...],
                  preferred_element_type=jnp.float32) + b2_ref[...]
    o_ref[...] = x + out


def conv_call(z, p, ksize):
    B, T, D = z.shape
    pad = (ksize - 1) // 2
    blk = pl.BlockSpec((None, T, D), lambda b: (b, 0, 0))
    extras = (p["ln_g"], p["ln_b"], p["w1a"], p["b1a"], p["w1b"], p["b1b"], p["dw"],
              p["bn_g"], p["bn_b"], p["bn_m"], p["bn_v"], p["w2"], p["b2"])
    return pl.pallas_call(
        functools.partial(conv_kernel, ksize=ksize),
        out_shape=jax.ShapeDtypeStruct((B, T, D), jnp.float32),
        grid=(B,),
        in_specs=[blk] + [_rep_spec(a) for a in extras],
        out_specs=blk,
        scratch_shapes=[pltpu.VMEM((T + 2 * pad, D), jnp.float32)],
        compiler_params=_cparams(("parallel",)),
    )(z, *extras)


# ------------------------- parameter prep (bf16 weights) ------------------------
def _prep_params(params, num_heads):
    bf16 = lambda w: w.astype(jnp.bfloat16)
    f1, f2, a, c, fl = (params["ff1"], params["ff2"], params["attn"],
                        params["conv"], params["final_ln"])
    D = a["wq"].shape[0]
    H = num_heads
    dh = D // H

    def ff(p):
        return dict(ln_g=p["ln_g"], ln_b=p["ln_b"],
                    w1=bf16(p["w1"]), b1=p["b1"], w2=bf16(p["w2"]), b2=p["b2"])

    def heads_cols(w):    # (D, D) -> (H, D, dh): per-head output-column block
        return bf16(jnp.transpose(w.reshape(D, H, dh), (1, 0, 2)))

    def heads_bias(b):    # (1, D) -> (H, 1, dh)
        return jnp.transpose(b.reshape(1, H, dh), (1, 0, 2))

    def heads_rows(w):    # (D, D) -> (H, dh, D): per-head input-row block (output projection)
        return bf16(w.reshape(H, dh, D))

    R = a["rel_emb"].shape[0]
    Rp = _round_up(R, 128)
    rel_T = jnp.pad(a["rel_emb"].T, ((0, 0), (0, Rp - R)))      # (dh, Rp) lane-dense

    return dict(
        ff1=ff(f1), ff2=ff(f2),
        attn=dict(ln_g=a["ln_g"], ln_b=a["ln_b"],
                  wq=heads_cols(a["wq"]), bq=heads_bias(a["bq"]),
                  wk=heads_cols(a["wk"]), bk=heads_bias(a["bk"]),
                  wv=heads_cols(a["wv"]), bv=heads_bias(a["bv"]),
                  wo=heads_rows(a["wo"]), bo=a["bo"],
                  rel_T=bf16(rel_T)),
        conv=dict(ln_g=c["ln_g"], ln_b=c["ln_b"],
                  w1a=bf16(c["w1"][:, :D]), b1a=c["b1"][:, :D],
                  w1b=bf16(c["w1"][:, D:]), b1b=c["b1"][:, D:],
                  dw=c["dw"],
                  bn_g=c["bn_g"].reshape(1, D), bn_b=c["bn_b"].reshape(1, D),
                  bn_m=c["bn_m"].reshape(1, D), bn_v=c["bn_v"].reshape(1, D),
                  w2=bf16(c["w2"]), b2=c["b2"]),
        final_ln=dict(g=fl["g"], b=fl["b"]),
    )


# ------------------------------- full layer ------------------------------------
@functools.partial(jax.jit, static_argnames=("num_heads", "ksize", "clip"))
def conformer_encoder_layer(x, params, *, num_heads, ksize, clip):
    T, B, D = x.shape
    dp = _prep_params(params, num_heads)
    z = jnp.transpose(x, (1, 0, 2))                                        # (B, T, D)
    N = B * T

    z = ffn_call(z.reshape(N, D), dp["ff1"], scale=0.5).reshape(B, T, D)   # macaron FF #1
    z = attn_call(z, dp["attn"], num_heads, clip)                          # MHSA + residual
    z = conv_call(z, dp["conv"], ksize)                                    # conv module + residual
    z = ffn_ln_call(z.reshape(N, D), dp["ff2"], dp["final_ln"], scale=0.5) # FF #2 + final LN fused
    return jnp.transpose(z.reshape(B, T, D), (1, 0, 2))                    # back to (T, B, D)


# ------------------------------ parameter init ----------------------------------
def init_params(key, D, H, K, clip):
    dh = D // H
    Dff = 4 * D
    it = iter(list(jax.random.split(key, 64)))

    def w(shape, scale=0.05):
        return (scale * jax.random.normal(next(it), shape)).astype(jnp.float32)

    def ff():
        return dict(ln_g=jnp.ones((1, D), jnp.float32) + w((1, D), 0.02),
                    ln_b=w((1, D), 0.02),
                    w1=w((D, Dff)), b1=w((1, Dff), 0.02),
                    w2=w((Dff, D)), b2=w((1, D), 0.02))

    return dict(
        ff1=ff(), ff2=ff(),
        attn=dict(ln_g=jnp.ones((1, D), jnp.float32) + w((1, D), 0.02),
                  ln_b=w((1, D), 0.02),
                  wq=w((D, D)), bq=w((1, D), 0.02),
                  wk=w((D, D)), bk=w((1, D), 0.02),
                  wv=w((D, D)), bv=w((1, D), 0.02),
                  wo=w((D, D)), bo=w((1, D), 0.02),
                  rel_emb=w((2 * clip + 1, dh))),
        conv=dict(ln_g=jnp.ones((1, D), jnp.float32) + w((1, D), 0.02),
                  ln_b=w((1, D), 0.02),
                  w1=w((D, 2 * D)), b1=w((1, 2 * D), 0.02),
                  dw=w((K, D), 0.1),
                  bn_g=jnp.ones((1, 1, D), jnp.float32) + w((1, 1, D), 0.02),
                  bn_b=w((1, 1, D), 0.02),
                  bn_m=w((1, 1, D), 0.02),
                  bn_v=jnp.ones((1, 1, D), jnp.float32) + jnp.abs(w((1, 1, D), 0.05)),
                  w2=w((D, D)), b2=w((1, D), 0.02)),
        final_ln=dict(g=jnp.ones((1, D), jnp.float32) + w((1, D), 0.02),
                      b=w((1, D), 0.02)),
    )


# ------------------------------ pure-JAX reference --------------------------------
def reference(x, params, *, num_heads, ksize, clip):
    T, B, D = x.shape
    H = num_heads
    dh = D // H
    pad = (ksize - 1) // 2

    def ln(v, g, b):
        mu = v.mean(-1, keepdims=True)
        var = ((v - mu) ** 2).mean(-1, keepdims=True)
        return (v - mu) * lax.rsqrt(var + EPS) * g + b

    def ff(v, p):
        h = ln(v, p["ln_g"], p["ln_b"]) @ p["w1"] + p["b1"]
        h = h * jax.nn.sigmoid(h)
        return h @ p["w2"] + p["b2"]

    def attn(v, p):
        xn = ln(v.reshape(T * B, D), p["ln_g"], p["ln_b"])
        q = (xn @ p["wq"] + p["bq"]) / jnp.sqrt(jnp.float32(dh))
        k = xn @ p["wk"] + p["bk"]
        val = xn @ p["wv"] + p["bv"]
        qh, kh, vh = (t.reshape(T, B, H, dh) for t in (q, k, val))
        pos = jnp.arange(T)
        rel_idx = jnp.clip(pos[None, :] - pos[:, None], -clip, clip) + clip
        rel = p["rel_emb"][rel_idx]
        scores = (jnp.einsum('ibhd,jbhd->bhij', qh, kh)
                  + jnp.einsum('ibhd,ijd->bhij', qh, rel))
        pa = jax.nn.softmax(scores, axis=-1)
        ctx = jnp.einsum('bhij,jbhd->ibhd', pa, vh).reshape(T * B, D)
        return (ctx @ p["wo"] + p["bo"]).reshape(T, B, D)

    def conv(v, p):
        xn = ln(v.reshape(T * B, D), p["ln_g"], p["ln_b"])
        h = xn @ p["w1"] + p["b1"]
        g = (h[:, :D] * jax.nn.sigmoid(h[:, D:])).reshape(T, B, D)
        gp = jnp.pad(g, ((pad, pad), (0, 0), (0, 0)))
        acc = sum(gp[k:k + T] * p["dw"][k][None, None, :] for k in range(ksize))
        bn = (acc - p["bn_m"]) * lax.rsqrt(p["bn_v"] + EPS) * p["bn_g"] + p["bn_b"]
        sw = bn * jax.nn.sigmoid(bn)
        return (sw.reshape(T * B, D) @ p["w2"] + p["b2"]).reshape(T, B, D)

    y = 0.5 * x + ff(x.reshape(T * B, D), params["ff1"]).reshape(T, B, D)
    y = y + attn(y, params["attn"])
    y = y + conv(y, params["conv"])
    y = 0.5 * y + ff(y.reshape(T * B, D), params["ff2"]).reshape(T, B, D)
    y = ln(y, params["final_ln"]["g"], params["final_ln"]["b"])
    return y


if __name__ == "__main__":
    T, B, D, H = 8, 2, 32, 4
    K, CLIP = 31, 16
    key = jax.random.PRNGKey(0)
    k_params, k_x = jax.random.split(key)
    params = init_params(k_params, D, H, K, CLIP)
    x = 0.5 * jax.random.normal(k_x, (T, B, D), jnp.float32)

    y = conformer_encoder_layer(x, params, num_heads=H, ksize=K, clip=CLIP)
    y = jax.block_until_ready(y)

    with jax.default_matmul_precision("highest"):
        y_ref = reference(x, params, num_heads=H, ksize=K, clip=CLIP)

    assert y.shape == (T, B, D)
    assert bool(jnp.all(jnp.isfinite(y)))
    err = float(jnp.max(jnp.abs(y - y_ref)))
    # Kernel uses bf16 MXU operands (f32 accumulation); reference is all-f32, so allow a
    # bf16-level tolerance on the LayerNorm-normalized (O(1)) outputs.
    assert err < 1e-1, f"mismatch vs reference: max abs err {err}"
    print("KERNEL_OK")
</pallas_src>

<mosaic_0001>
module attributes {stable_mosaic.version = 11 : i64} {
  func.func @ffn_kernel(%arg0: i32, %arg1: memref<16x32xf32, #tpu.memory_space<vmem>>, %arg2: memref<1x32xf32, #tpu.memory_space<vmem>>, %arg3: memref<1x32xf32, #tpu.memory_space<vmem>>, %arg4: memref<32x128xbf16, #tpu.memory_space<vmem>>, %arg5: memref<1x128xf32, #tpu.memory_space<vmem>>, %arg6: memref<128x32xbf16, #tpu.memory_space<vmem>>, %arg7: memref<1x32xf32, #tpu.memory_space<vmem>>, %arg8: memref<16x32xf32, #tpu.memory_space<vmem>>) attributes {dimension_semantics = [#tpu.dimension_semantics<parallel>], iteration_bounds = array<i64: 1>, scalar_prefetch = 0 : i64, scratch_operands = 0 : i64, tpu.core_type = #tpu.core_type<tc>, window_params = [{transform_indices = @transform_0, window_bounds = array<i64: 16, 32>}, {pipeline_mode = #tpu.pipeline_mode<synchronous>, transform_indices = @transform_1, window_bounds = array<i64: 1, 32>}, {pipeline_mode = #tpu.pipeline_mode<synchronous>, transform_indices = @transform_2, window_bounds = array<i64: 1, 32>}, {pipeline_mode = #tpu.pipeline_mode<synchronous>, transform_indices = @transform_3, window_bounds = array<i64: 32, 128>}, {pipeline_mode = #tpu.pipeline_mode<synchronous>, transform_indices = @transform_4, window_bounds = array<i64: 1, 128>}, {pipeline_mode = #tpu.pipeline_mode<synchronous>, transform_indices = @transform_5, window_bounds = array<i64: 128, 32>}, {pipeline_mode = #tpu.pipeline_mode<synchronous>, transform_indices = @transform_6, window_bounds = array<i64: 1, 32>}, {transform_indices = @transform_7, window_bounds = array<i64: 16, 32>}]} {
    %c0 = arith.constant 0 : index
    %c0_0 = arith.constant 0 : index
    %0 = vector.load %arg1[%c0, %c0_0] : memref<16x32xf32, #tpu.memory_space<vmem>>, vector<16x32xf32>
    %c0_1 = arith.constant 0 : index
    %c0_2 = arith.constant 0 : index
    %1 = vector.load %arg2[%c0_1, %c0_2] : memref<1x32xf32, #tpu.memory_space<vmem>>, vector<1x32xf32>
    %c0_3 = arith.constant 0 : index
    %c0_4 = arith.constant 0 : index
    %2 = vector.load %arg3[%c0_3, %c0_4] : memref<1x32xf32, #tpu.memory_space<vmem>>, vector<1x32xf32>
    %cst = arith.constant dense<0.000000e+00> : vector<16xf32>
    %3 = vector.multi_reduction <add>, %0, %cst [1] : vector<16x32xf32> to vector<16xf32>
    %4 = vector.shape_cast %3 : vector<16xf32> to vector<16x1xf32>
    %cst_5 = arith.constant 3.200000e+01 : f32
    %5 = vector.broadcast %cst_5 : f32 to vector<16x1xf32>
    %6 = arith.divf %4, %5 : vector<16x1xf32>
    %7 = vector.broadcast %6 : vector<16x1xf32> to vector<16x32xf32>
    %8 = arith.subf %0, %7 : vector<16x32xf32>
    %9 = arith.mulf %8, %8 : vector<16x32xf32>
    %cst_6 = arith.constant dense<0.000000e+00> : vector<16xf32>
    %10 = vector.multi_reduction <add>, %9, %cst_6 [1] : vector<16x32xf32> to vector<16xf32>
    %11 = vector.shape_cast %10 : vector<16xf32> to vector<16x1xf32>
    %cst_7 = arith.constant 3.200000e+01 : f32
    %12 = vector.broadcast %cst_7 : f32 to vector<16x1xf32>
    %13 = arith.divf %11, %12 : vector<16x1xf32>
    %14 = vector.broadcast %6 : vector<16x1xf32> to vector<16x32xf32>
    %15 = arith.subf %0, %14 : vector<16x32xf32>
    %cst_8 = arith.constant 9.99999974E-6 : f32
    %16 = vector.broadcast %cst_8 : f32 to vector<16x1xf32>
    %17 = arith.addf %13, %16 : vector<16x1xf32>
    %18 = math.rsqrt %17 : vector<16x1xf32>
    %19 = vector.broadcast %18 : vector<16x1xf32> to vector<16x32xf32>
    %20 = arith.mulf %15, %19 : vector<16x32xf32>
    %21 = vector.broadcast %1 : vector<1x32xf32> to vector<16x32xf32>
    %22 = arith.mulf %20, %21 : vector<16x32xf32>
    %23 = vector.broadcast %2 : vector<1x32xf32> to vector<16x32xf32>
    %24 = arith.addf %22, %23 : vector<16x32xf32>
    %25 = arith.truncf %24 : vector<16x32xf32> to vector<16x32xbf16>
    %c0_9 = arith.constant 0 : index
    %c0_10 = arith.constant 0 : index
    %26 = vector.load %arg4[%c0_9, %c0_10] : memref<32x128xbf16, #tpu.memory_space<vmem>>, vector<32x128xbf16>
    %cst_11 = arith.constant dense<0.000000e+00> : vector<16x128xf32>
    %27 = tpu.matmul %25, %26, %cst_11 {dimension_numbers = #tpu.dot_dimension_numbers<[1], [0], [0], [1], [0, 0, 1, 1], [], []>} : vector<16x32xbf16>, vector<32x128xbf16>, vector<16x128xf32> -> vector<16x128xf32>
    %c0_12 = arith.constant 0 : index
    %c0_13 = arith.constant 0 : index
    %28 = vector.load %arg5[%c0_12, %c0_13] : memref<1x128xf32, #tpu.memory_space<vmem>>, vector<1x128xf32>
    %29 = vector.broadcast %28 : vector<1x128xf32> to vector<16x128xf32>
    %30 = arith.addf %27, %29 : vector<16x128xf32>
    %31 = arith.negf %30 : vector<16x128xf32>
    %32 = math.exp %31 : vector<16x128xf32>
    %cst_14 = arith.constant 1.000000e+00 : f32
    %33 = vector.broadcast %cst_14 : f32 to vector<16x128xf32>
    %34 = arith.addf %33, %32 : vector<16x128xf32>
    %35 = arith.divf %33, %34 : vector<16x128xf32>
    %36 = arith.mulf %30, %35 : vector<16x128xf32>
    %37 = arith.truncf %36 : vector<16x128xf32> to vector<16x128xbf16>
    %c0_15 = arith.constant 0 : index
    %c0_16 = arith.constant 0 : index
    %38 = vector.load %arg6[%c0_15, %c0_16] : memref<128x32xbf16, #tpu.memory_space<vmem>>, vector<128x32xbf16>
    %cst_17 = arith.constant dense<0.000000e+00> : vector<16x32xf32>
    %39 = tpu.matmul %37, %38, %cst_17 {dimension_numbers = #tpu.dot_dimension_numbers<[1], [0], [0], [1], [0, 0, 1, 1], [], []>} : vector<16x128xbf16>, vector<128x32xbf16>, vector<16x32xf32> -> vector<16x32xf32>
    %c0_18 = arith.constant 0 : index
    %c0_19 = arith.constant 0 : index
    %40 = vector.load %arg7[%c0_18, %c0_19] : memref<1x32xf32, #tpu.memory_space<vmem>>, vector<1x32xf32>
    %41 = vector.broadcast %40 : vector<1x32xf32> to vector<16x32xf32>
    %42 = arith.addf %39, %41 : vector<16x32xf32>
    %cst_20 = arith.constant 5.000000e-01 : f32
    %43 = vector.broadcast %cst_20 : f32 to vector<16x32xf32>
    %44 = arith.mulf %43, %0 : vector<16x32xf32>
    %45 = arith.addf %44, %42 : vector<16x32xf32>
    %c0_21 = arith.constant 0 : index
    %c0_22 = arith.constant 0 : index
    %46 = vector.load %arg8[%c0_21, %c0_22] : memref<16x32xf32, #tpu.memory_space<vmem>>, vector<16x32xf32>
    tpu.vector_store %arg8[%c0_21, %c0_22], %45 {strides = array<i32>} : memref<16x32xf32, #tpu.memory_space<vmem>>, vector<16x32xf32>,
    return
  }
  func.func @transform_0(%arg0: i32) -> (i32, i32) {
    %c0_i32 = arith.constant 0 : i32
    %c0_i32_0 = arith.constant 0 : i32
    return %arg0, %c0_i32 : i32, i32
  }
  func.func @transform_1(%arg0: i32) -> (i32, i32) {
    %c0_i32 = arith.constant 0 : i32
    %c0_i32_0 = arith.constant 0 : i32
    %c0_i32_1 = arith.constant 0 : i32
    return %c0_i32, %c0_i32_0 : i32, i32
  }
  func.func @transform_2(%arg0: i32) -> (i32, i32) {
    %c0_i32 = arith.constant 0 : i32
    %c0_i32_0 = arith.constant 0 : i32
    %c0_i32_1 = arith.constant 0 : i32
    return %c0_i32, %c0_i32_0 : i32, i32
  }
  func.func @transform_3(%arg0: i32) -> (i32, i32) {
    %c0_i32 = arith.constant 0 : i32
    %c0_i32_0 = arith.constant 0 : i32
    %c0_i32_1 = arith.constant 0 : i32
    return %c0_i32, %c0_i32_0 : i32, i32
  }
  func.func @transform_4(%arg0: i32) -> (i32, i32) {
    %c0_i32 = arith.constant 0 : i32
    %c0_i32_0 = arith.constant 0 : i32
    %c0_i32_1 = arith.constant 0 : i32
    return %c0_i32, %c0_i32_0 : i32, i32
  }
  func.func @transform_5(%arg0: i32) -> (i32, i32) {
    %c0_i32 = arith.constant 0 : i32
    %c0_i32_0 = arith.constant 0 : i32
    %c0_i32_1 = arith.constant 0 : i32
    return %c0_i32, %c0_i32_0 : i32, i32
  }
  func.func @transform_6(%arg0: i32) -> (i32, i32) {
    %c0_i32 = arith.constant 0 : i32
    %c0_i32_0 = arith.constant 0 : i32
    %c0_i32_1 = arith.constant 0 : i32
    return %c0_i32, %c0_i32_0 : i32, i32
  }
  func.func @transform_7(%arg0: i32) -> (i32, i32) {
    %c0_i32 = arith.constant 0 : i32
    %c0_i32_0 = arith.constant 0 : i32
    return %arg0, %c0_i32 : i32, i32
  }
}

module attributes {stable_mosaic.version = 11 : i64} {
  func.func @attn_kernel(%arg0: i32, %arg1: i32, %arg2: memref<1x8x32xf32, #tpu.memory_space<vmem>>, %arg3: memref<1x32xf32, #tpu.memory_space<vmem>>, %arg4: memref<1x32xf32, #tpu.memory_space<vmem>>, %arg5: memref<1x32x8xbf16, #tpu.memory_space<vmem>>, %arg6: memref<1x1x8xf32, #tpu.memory_space<vmem>>, %arg7: memref<1x32x8xbf16, #tpu.memory_space<vmem>>, %arg8: memref<1x1x8xf32, #tpu.memory_space<vmem>>, %arg9: memref<1x32x8xbf16, #tpu.memory_space<vmem>>, %arg10: memref<1x1x8xf32, #tpu.memory_space<vmem>>, %arg11: memref<1x8x32xbf16, #tpu.memory_space<vmem>>, %arg12: memref<1x32xf32, #tpu.memory_space<vmem>>, %arg13: memref<8x128xbf16, #tpu.memory_space<vmem>>, %arg14: memref<1x8x32xf32, #tpu.memory_space<vmem>>, %arg15: memref<8x32xbf16, #tpu.memory_space<vmem>>, %arg16: memref<8x32xf32, #tpu.memory_space<vmem>>) attributes {dimension_semantics = [#tpu.dimension_semantics<parallel>, #tpu.dimension_semantics<arbitrary>], iteration_bounds = array<i64: 2, 4>, scalar_prefetch = 0 : i64, scratch_operands = 2 : i64, tpu.core_type = #tpu.core_type<tc>, window_params = [{transform_indices = @transform_0, window_bounds = array<i64: 1, 8, 32>}, {pipeline_mode = #tpu.pipeline_mode<synchronous>, transform_indices = @transform_1, window_bounds = array<i64: 1, 32>}, {pipeline_mode = #tpu.pipeline_mode<synchronous>, transform_indices = @transform_2, window_bounds = array<i64: 1, 32>}, {transform_indices = @transform_3, window_bounds = array<i64: 1, 32, 8>}, {transform_indices = @transform_4, window_bounds = array<i64: 1, 1, 8>}, {transform_indices = @transform_5, window_bounds = array<i64: 1, 32, 8>}, {transform_indices = @transform_6, window_bounds = array<i64: 1, 1, 8>}, {transform_indices = @transform_7, window_bounds = array<i64: 1, 32, 8>}, {transform_indices = @transform_8, window_bounds = array<i64: 1, 1, 8>}, {transform_indices = @transform_9, window_bounds = array<i64: 1, 8, 32>}, {pipeline_mode = #tpu.pipeline_mode<synchronous>, transform_indices = @transform_10, window_bounds = array<i64: 1, 32>}, {pipeline_mode = #tpu.pipeline_mode<synchronous>, transform_indices = @transform_11, window_bounds = array<i64: 8, 128>}, {transform_indices = @transform_12, window_bounds = array<i64: 1, 8, 32>}]} {
    %c0_i32 = arith.constant 0 : i32
    %0 = arith.cmpi eq, %arg1, %c0_i32 : i32
    %1 = arith.extui %0 : i1 to i32
    %c0_i32_0 = arith.constant 0 : i32
    %2 = arith.cmpi ne, %1, %c0_i32_0 : i32
    scf.if %2 {
      %c0_43 = arith.constant 0 : index
      %c0_44 = arith.constant 0 : index
      %c0_45 = arith.constant 0 : index
      %163 = vector.load %arg2[%c0_43, %c0_44, %c0_45] : memref<1x8x32xf32, #tpu.memory_space<vmem>>, vector<1x8x32xf32>
      %164 = vector.shape_cast %163 : vector<1x8x32xf32> to vector<8x32xf32>
      %c0_46 = arith.constant 0 : index
      %c0_47 = arith.constant 0 : index
      %165 = vector.load %arg3[%c0_46, %c0_47] : memref<1x32xf32, #tpu.memory_space<vmem>>, vector<1x32xf32>
      %c0_48 = arith.constant 0 : index
      %c0_49 = arith.constant 0 : index
      %166 = vector.load %arg4[%c0_48, %c0_49] : memref<1x32xf32, #tpu.memory_space<vmem>>, vector<1x32xf32>
      %cst_50 = arith.constant dense<0.000000e+00> : vector<8xf32>
      %167 = vector.multi_reduction <add>, %164, %cst_50 [1] : vector<8x32xf32> to vector<8xf32>
      %168 = vector.shape_cast %167 : vector<8xf32> to vector<8x1xf32>
      %cst_51 = arith.constant 3.200000e+01 : f32
      %169 = vector.broadcast %cst_51 : f32 to vector<8x1xf32>
      %170 = arith.divf %168, %169 : vector<8x1xf32>
      %171 = vector.broadcast %170 : vector<8x1xf32> to vector<8x32xf32>
      %172 = arith.subf %164, %171 : vector<8x32xf32>
      %173 = arith.mulf %172, %172 : vector<8x32xf32>
      %cst_52 = arith.constant dense<0.000000e+00> : vector<8xf32>
      %174 = vector.multi_reduction <add>, %173, %cst_52 [1] : vector<8x32xf32> to vector<8xf32>
      %175 = vector.shape_cast %174 : vector<8xf32> to vector<8x1xf32>
      %cst_53 = arith.constant 3.200000e+01 : f32
      %176 = vector.broadcast %cst_53 : f32 to vector<8x1xf32>
      %177 = arith.divf %175, %176 : vector<8x1xf32>
      %178 = vector.broadcast %170 : vector<8x1xf32> to vector<8x32xf32>
      %179 = arith.subf %164, %178 : vector<8x32xf32>
      %cst_54 = arith.constant 9.99999974E-6 : f32
      %180 = vector.broadcast %cst_54 : f32 to vector<8x1xf32>
      %181 = arith.addf %177, %180 : vector<8x1xf32>
      %182 = math.rsqrt %181 : vector<8x1xf32>
      %183 = vector.broadcast %182 : vector<8x1xf32> to vector<8x32xf32>
      %184 = arith.mulf %179, %183 : vector<8x32xf32>
      %185 = vector.broadcast %165 : vector<1x32xf32> to vector<8x32xf32>
      %186 = arith.mulf %184, %185 : vector<8x32xf32>
      %187 = vector.broadcast %166 : vector<1x32xf32> to vector<8x32xf32>
      %188 = arith.addf %186, %187 : vector<8x32xf32>
      %189 = arith.truncf %188 : vector<8x32xf32> to vector<8x32xbf16>
      %c0_55 = arith.constant 0 : index
      %c0_56 = arith.constant 0 : index
      %190 = vector.load %arg15[%c0_55, %c0_56] : memref<8x32xbf16, #tpu.memory_space<vmem>>, vector<8x32xbf16>
      tpu.vector_store %arg15[%c0_55, %c0_56], %189 {strides = array<i32>} : memref<8x32xbf16, #tpu.memory_space<vmem>>, vector<8x32xbf16>,
      %cst_57 = arith.constant 0.000000e+00 : f32
      %191 = vector.broadcast %cst_57 : f32 to vector<8x32xf32>
      %c0_58 = arith.constant 0 : index
      %c0_59 = arith.constant 0 : index
      %192 = vector.load %arg16[%c0_58, %c0_59] : memref<8x32xf32, #tpu.memory_space<vmem>>, vector<8x32xf32>
      tpu.vector_store %arg16[%c0_58, %c0_59], %191 {strides = array<i32>} : memref<8x32xf32, #tpu.memory_space<vmem>>, vector<8x32xf32>,
    } else {
    }
    %c0 = arith.constant 0 : index
    %c0_1 = arith.constant 0 : index
    %3 = vector.load %arg15[%c0, %c0_1] : memref<8x32xbf16, #tpu.memory_space<vmem>>, vector<8x32xbf16>
    %c0_2 = arith.constant 0 : index
    %c0_3 = arith.constant 0 : index
    %c0_4 = arith.constant 0 : index
    %4 = vector.load %arg5[%c0_2, %c0_3, %c0_4] : memref<1x32x8xbf16, #tpu.memory_space<vmem>>, vector<1x32x8xbf16>
    %5 = vector.shape_cast %4 : vector<1x32x8xbf16> to vector<32x8xbf16>
    %cst = arith.constant dense<0.000000e+00> : vector<8x8xf32>
    %6 = tpu.matmul %3, %5, %cst {dimension_numbers = #tpu.dot_dimension_numbers<[1], [0], [0], [1], [0, 0, 1, 1], [], []>} : vector<8x32xbf16>, vector<32x8xbf16>, vector<8x8xf32> -> vector<8x8xf32>
    %c0_5 = arith.constant 0 : index
    %c0_6 = arith.constant 0 : index
    %c0_7 = arith.constant 0 : index
    %7 = vector.load %arg6[%c0_5, %c0_6, %c0_7] : memref<1x1x8xf32, #tpu.memory_space<vmem>>, vector<1x1x8xf32>
    %8 = vector.shape_cast %7 : vector<1x1x8xf32> to vector<1x8xf32>
    %9 = vector.broadcast %8 : vector<1x8xf32> to vector<8x8xf32>
    %10 = arith.addf %6, %9 : vector<8x8xf32>
    %cst_8 = arith.constant 0.353553385 : f32
    %11 = vector.broadcast %cst_8 : f32 to vector<8x8xf32>
    %12 = arith.mulf %10, %11 : vector<8x8xf32>
    %c0_9 = arith.constant 0 : index
    %c0_10 = arith.constant 0 : index
    %c0_11 = arith.constant 0 : index
    %13 = vector.load %arg7[%c0_9, %c0_10, %c0_11] : memref<1x32x8xbf16, #tpu.memory_space<vmem>>, vector<1x32x8xbf16>
    %14 = vector.shape_cast %13 : vector<1x32x8xbf16> to vector<32x8xbf16>
    %cst_12 = arith.constant dense<0.000000e+00> : vector<8x8xf32>
    %15 = tpu.matmul %3, %14, %cst_12 {dimension_numbers = #tpu.dot_dimension_numbers<[1], [0], [0], [1], [0, 0, 1, 1], [], []>} : vector<8x32xbf16>, vector<32x8xbf16>, vector<8x8xf32> -> vector<8x8xf32>
    %c0_13 = arith.constant 0 : index
    %c0_14 = arith.constant 0 : index
    %c0_15 = arith.constant 0 : index
    %16 = vector.load %arg8[%c0_13, %c0_14, %c0_15] : memref<1x1x8xf32, #tpu.memory_space<vmem>>, vector<1x1x8xf32>
    %17 = vector.shape_cast %16 : vector<1x1x8xf32> to vector<1x8xf32>
    %18 = vector.broadcast %17 : vector<1x8xf32> to vector<8x8xf32>
    %19 = arith.addf %15, %18 : vector<8x8xf32>
    %c0_16 = arith.constant 0 : index
    %c0_17 = arith.constant 0 : index
    %c0_18 = arith.constant 0 : index
    %20 = vector.load %arg9[%c0_16, %c0_17, %c0_18] : memref<1x32x8xbf16, #tpu.memory_space<vmem>>, vector<1x32x8xbf16>
    %21 = vector.shape_cast %20 : vector<1x32x8xbf16> to vector<32x8xbf16>
    %cst_19 = arith.constant dense<0.000000e+00> : vector<8x8xf32>
    %22 = tpu.matmul %3, %21, %cst_19 {dimension_numbers = #tpu.dot_dimension_numbers<[1], [0], [0], [1], [0, 0, 1, 1], [], []>} : vector<8x32xbf16>, vector<32x8xbf16>, vector<8x8xf32> -> vector<8x8xf32>
    %c0_20 = arith.constant 0 : index
    %c0_21 = arith.constant 0 : index
    %c0_22 = arith.constant 0 : index
    %23 = vector.load %arg10[%c0_20, %c0_21, %c0_22] : memref<1x1x8xf32, #tpu.memory_space<vmem>>, vector<1x1x8xf32>
    %24 = vector.shape_cast %23 : vector<1x1x8xf32> to vector<1x8xf32>
    %25 = vector.broadcast %24 : vector<1x8xf32> to vector<8x8xf32>
    %26 = arith.addf %22, %25 : vector<8x8xf32>
    %27 = arith.truncf %12 : vector<8x8xf32> to vector<8x8xbf16>
    %28 = arith.truncf %19 : vector<8x8xf32> to vector<8x8xbf16>
    %cst_23 = arith.constant dense<0.000000e+00> : vector<8x8xf32>
    %29 = tpu.matmul %27, %28, %cst_23 {dimension_numbers = #tpu.dot_dimension_numbers<[1], [1], [0], [0], [0, 0, 1, 0], [], []>} : vector<8x8xbf16>, vector<8x8xbf16>, vector<8x8xf32> -> vector<8x8xf32>
    %c0_24 = arith.constant 0 : index
    %c0_25 = arith.constant 0 : index
    %30 = vector.load %arg13[%c0_24, %c0_25] : memref<8x128xbf16, #tpu.memory_space<vmem>>, vector<8x128xbf16>
    %cst_26 = arith.constant dense<0.000000e+00> : vector<8x128xf32>
    %31 = tpu.matmul %27, %30, %cst_26 {dimension_numbers = #tpu.dot_dimension_numbers<[1], [0], [0], [1], [0, 0, 1, 1], [], []>} : vector<8x8xbf16>, vector<8x128xbf16>, vector<8x128xf32> -> vector<8x128xf32>
    %32 = tpu.iota {dimensions = array<i32: 0>} : vector<8x8xi32>
    %33 = tpu.iota {dimensions = array<i32: 1>} : vector<8x8xi32>
    %34 = arith.subi %33, %32 : vector<8x8xi32>
    %c16_i32 = arith.constant 16 : i32
    %35 = vector.broadcast %c16_i32 : i32 to vector<8x8xi32>
    %36 = arith.cmpi sge, %34, %35 : vector<8x8xi32>
    %37 = vector.extract_strided_slice %31 {offsets = [0, 32], sizes = [8, 1], strides = [1, 1]} : vector<8x128xf32> to vector<8x1xf32>
    %c-16_i32 = arith.constant -16 : i32
    %38 = vector.broadcast %c-16_i32 : i32 to vector<8x8xi32>
    %39 = arith.cmpi sle, %34, %38 : vector<8x8xi32>
    %40 = vector.extract_strided_slice %31 {offsets = [0, 0], sizes = [8, 1], strides = [1, 1]} : vector<8x128xf32> to vector<8x1xf32>
    %cst_27 = arith.constant 0.000000e+00 : f32
    %41 = vector.shape_cast %40 : vector<8x1xf32> to vector<8x1xf32>
    %42 = vector.broadcast %41 : vector<8x1xf32> to vector<8x8xf32>
    %43 = vector.broadcast %cst_27 : f32 to vector<8x8xf32>
    %44 = arith.select %39, %42, %43 : vector<8x8xi1>, vector<8x8xf32>
    %45 = vector.shape_cast %37 : vector<8x1xf32> to vector<8x1xf32>
    %46 = vector.broadcast %45 : vector<8x1xf32> to vector<8x8xf32>
    %47 = arith.select %36, %46, %44 : vector<8x8xi1>, vector<8x8xf32>
    %c-7_i32 = arith.constant -7 : i32
    %48 = vector.broadcast %c-7_i32 : i32 to vector<8x8xi32>
    %49 = arith.cmpi eq, %34, %48 : vector<8x8xi32>
    %50 = vector.extract_strided_slice %31 {offsets = [0, 9], sizes = [8, 1], strides = [1, 1]} : vector<8x128xf32> to vector<8x1xf32>
    %51 = vector.shape_cast %50 : vector<8x1xf32> to vector<8x1xf32>
    %52 = vector.broadcast %51 : vector<8x1xf32> to vector<8x8xf32>
    %53 = arith.select %49, %52, %47 : vector<8x8xi1>, vector<8x8xf32>
    %c-6_i32 = arith.constant -6 : i32
    %54 = vector.broadcast %c-6_i32 : i32 to vector<8x8xi32>
    %55 = arith.cmpi eq, %34, %54 : vector<8x8xi32>
    %56 = vector.extract_strided_slice %31 {offsets = [0, 10], sizes = [8, 1], strides = [1, 1]} : vector<8x128xf32> to vector<8x1xf32>
    %57 = vector.shape_cast %56 : vector<8x1xf32> to vector<8x1xf32>
    %58 = vector.broadcast %57 : vector<8x1xf32> to vector<8x8xf32>
    %59 = arith.select %55, %58, %53 : vector<8x8xi1>, vector<8x8xf32>
    %c-5_i32 = arith.constant -5 : i32
    %60 = vector.broadcast %c-5_i32 : i32 to vector<8x8xi32>
    %61 = arith.cmpi eq, %34, %60 : vector<8x8xi32>
    %62 = vector.extract_strided_slice %31 {offsets = [0, 11], sizes = [8, 1], strides = [1, 1]} : vector<8x128xf32> to vector<8x1xf32>
    %63 = vector.shape_cast %62 : vector<8x1xf32> to vector<8x1xf32>
    %64 = vector.broadcast %63 : vector<8x1xf32> to vector<8x8xf32>
    %65 = arith.select %61, %64, %59 : vector<8x8xi1>, vector<8x8xf32>
    %c-4_i32 = arith.constant -4 : i32
    %66 = vector.broadcast %c-4_i32 : i32 to vector<8x8xi32>
    %67 = arith.cmpi eq, %34, %66 : vector<8x8xi32>
    %68 = vector.extract_strided_slice %31 {offsets = [0, 12], sizes = [8, 1], strides = [1, 1]} : vector<8x128xf32> to vector<8x1xf32>
    %69 = vector.shape_cast %68 : vector<8x1xf32> to vector<8x1xf32>
    %70 = vector.broadcast %69 : vector<8x1xf32> to vector<8x8xf32>
    %71 = arith.select %67, %70, %65 : vector<8x8xi1>, vector<8x8xf32>
    %c-3_i32 = arith.constant -3 : i32
    %72 = vector.broadcast %c-3_i32 : i32 to vector<8x8xi32>
    %73 = arith.cmpi eq, %34, %72 : vector<8x8xi32>
    %74 = vector.extract_strided_slice %31 {offsets = [0, 13], sizes = [8, 1], strides = [1, 1]} : vector<8x128xf32> to vector<8x1xf32>
    %75 = vector.shape_cast %74 : vector<8x1xf32> to vector<8x1xf32>
    %76 = vector.broadcast %75 : vector<8x1xf32> to vector<8x8xf32>
    %77 = arith.select %73, %76, %71 : vector<8x8xi1>, vector<8x8xf32>
    %c-2_i32 = arith.constant -2 : i32
    %78 = vector.broadcast %c-2_i32 : i32 to vector<8x8xi32>
    %79 = arith.cmpi eq, %34, %78 : vector<8x8xi32>
    %80 = vector.extract_strided_slice %31 {offsets = [0, 14], sizes = [8, 1], strides = [1, 1]} : vector<8x128xf32> to vector<8x1xf32>
    %81 = vector.shape_cast %80 : vector<8x1xf32> to vector<8x1xf32>
    %82 = vector.broadcast %81 : vector<8x1xf32> to vector<8x8xf32>
    %83 = arith.select %79, %82, %77 : vector<8x8xi1>, vector<8x8xf32>
    %c-1_i32 = arith.constant -1 : i32
    %84 = vector.broadcast %c-1_i32 : i32 to vector<8x8xi32>
    %85 = arith.cmpi eq, %34, %84 : vector<8x8xi32>
    %86 = vector.extract_strided_slice %31 {offsets = [0, 15], sizes = [8, 1], strides = [1, 1]} : vector<8x128xf32> to vector<8x1xf32>
    %87 = vector.shape_cast %86 : vector<8x1xf32> to vector<8x1xf32>
    %88 = vector.broadcast %87 : vector<8x1xf32> to vector<8x8xf32>
    %89 = arith.select %85, %88, %83 : vector<8x8xi1>, vector<8x8xf32>
    %c0_i32_28 = arith.constant 0 : i32
    %90 = vector.broadcast %c0_i32_28 : i32 to vector<8x8xi32>
    %91 = arith.cmpi eq, %34, %90 : vector<8x8xi32>
    %92 = vector.extract_strided_slice %31 {offsets = [0, 16], sizes = [8, 1], strides = [1, 1]} : vector<8x128xf32> to vector<8x1xf32>
    %93 = vector.shape_cast %92 : vector<8x1xf32> to vector<8x1xf32>
    %94 = vector.broadcast %93 : vector<8x1xf32> to vector<8x8xf32>
    %95 = arith.select %91, %94, %89 : vector<8x8xi1>, vector<8x8xf32>
    %c1_i32 = arith.constant 1 : i32
    %96 = vector.broadcast %c1_i32 : i32 to vector<8x8xi32>
    %97 = arith.cmpi eq, %34, %96 : vector<8x8xi32>
    %98 = vector.extract_strided_slice %31 {offsets = [0, 17], sizes = [8, 1], strides = [1, 1]} : vector<8x128xf32> to vector<8x1xf32>
    %99 = vector.shape_cast %98 : vector<8x1xf32> to vector<8x1xf32>
    %100 = vector.broadcast %99 : vector<8x1xf32> to vector<8x8xf32>
    %101 = arith.select %97, %100, %95 : vector<8x8xi1>, vector<8x8xf32>
    %c2_i32 = arith.constant 2 : i32
    %102 = vector.broadcast %c2_i32 : i32 to vector<8x8xi32>
    %103 = arith.cmpi eq, %34, %102 : vector<8x8xi32>
    %104 = vector.extract_strided_slice %31 {offsets = [0, 18], sizes = [8, 1], strides = [1, 1]} : vector<8x128xf32> to vector<8x1xf32>
    %105 = vector.shape_cast %104 : vector<8x1xf32> to vector<8x1xf32>
    %106 = vector.broadcast %105 : vector<8x1xf32> to vector<8x8xf32>
    %107 = arith.select %103, %106, %101 : vector<8x8xi1>, vector<8x8xf32>
    %c3_i32 = arith.constant 3 : i32
    %108 = vector.broadcast %c3_i32 : i32 to vector<8x8xi32>
    %109 = arith.cmpi eq, %34, %108 : vector<8x8xi32>
    %110 = vector.extract_strided_slice %31 {offsets = [0, 19], sizes = [8, 1], strides = [1, 1]} : vector<8x128xf32> to vector<8x1xf32>
    %111 = vector.shape_cast %110 : vector<8x1xf32> to vector<8x1xf32>
    %112 = vector.broadcast %111 : vector<8x1xf32> to vector<8x8xf32>
    %113 = arith.select %109, %112, %107 : vector<8x8xi1>, vector<8x8xf32>
    %c4_i32 = arith.constant 4 : i32
    %114 = vector.broadcast %c4_i32 : i32 to vector<8x8xi32>
    %115 = arith.cmpi eq, %34, %114 : vector<8x8xi32>
    %116 = vector.extract_strided_slice %31 {offsets = [0, 20], sizes = [8, 1], strides = [1, 1]} : vector<8x128xf32> to vector<8x1xf32>
    %117 = vector.shape_cast %116 : vector<8x1xf32> to vector<8x1xf32>
    %118 = vector.broadcast %117 : vector<8x1xf32> to vector<8x8xf32>
    %119 = arith.select %115, %118, %113 : vector<8x8xi1>, vector<8x8xf32>
    %c5_i32 = arith.constant 5 : i32
    %120 = vector.broadcast %c5_i32 : i32 to vector<8x8xi32>
    %121 = arith.cmpi eq, %34, %120 : vector<8x8xi32>
    %122 = vector.extract_strided_slice %31 {offsets = [0, 21], sizes = [8, 1], strides = [1, 1]} : vector<8x128xf32> to vector<8x1xf32>
    %123 = vector.shape_cast %122 : vector<8x1xf32> to vector<8x1xf32>
    %124 = vector.broadcast %123 : vector<8x1xf32> to vector<8x8xf32>
    %125 = arith.select %121, %124, %119 : vector<8x8xi1>, vector<8x8xf32>
    %c6_i32 = arith.constant 6 : i32
    %126 = vector.broadcast %c6_i32 : i32 to vector<8x8xi32>
    %127 = arith.cmpi eq, %34, %126 : vector<8x8xi32>
    %128 = vector.extract_strided_slice %31 {offsets = [0, 22], sizes = [8, 1], strides = [1, 1]} : vector<8x128xf32> to vector<8x1xf32>
    %129 = vector.shape_cast %128 : vector<8x1xf32> to vector<8x1xf32>
    %130 = vector.broadcast %129 : vector<8x1xf32> to vector<8x8xf32>
    %131 = arith.select %127, %130, %125 : vector<8x8xi1>, vector<8x8xf32>
    %c7_i32 = arith.constant 7 : i32
    %132 = vector.broadcast %c7_i32 : i32 to vector<8x8xi32>
    %133 = arith.cmpi eq, %34, %132 : vector<8x8xi32>
    %134 = vector.extract_strided_slice %31 {offsets = [0, 23], sizes = [8, 1], strides = [1, 1]} : vector<8x128xf32> to vector<8x1xf32>
    %135 = vector.shape_cast %134 : vector<8x1xf32> to vector<8x1xf32>
    %136 = vector.broadcast %135 : vector<8x1xf32> to vector<8x8xf32>
    %137 = arith.select %133, %136, %131 : vector<8x8xi1>, vector<8x8xf32>
    %138 = arith.addf %29, %137 : vector<8x8xf32>
    %cst_29 = arith.constant dense<0xFF800000> : vector<8xf32>
    %139 = vector.multi_reduction <maximumf>, %138, %cst_29 [1] : vector<8x8xf32> to vector<8xf32>
    %140 = vector.shape_cast %139 : vector<8xf32> to vector<8x1xf32>
    %141 = vector.broadcast %140 : vector<8x1xf32> to vector<8x8xf32>
    %142 = arith.subf %138, %141 : vector<8x8xf32>
    %143 = math.exp %142 : vector<8x8xf32>
    %cst_30 = arith.constant dense<0.000000e+00> : vector<8xf32>
    %144 = vector.multi_reduction <add>, %143, %cst_30 [1] : vector<8x8xf32> to vector<8xf32>
    %145 = vector.shape_cast %144 : vector<8xf32> to vector<8x1xf32>
    %cst_31 = arith.constant 1.000000e+00 : f32
    %146 = vector.broadcast %cst_31 : f32 to vector<8x1xf32>
    %147 = arith.divf %146, %145 : vector<8x1xf32>
    %148 = vector.broadcast %147 : vector<8x1xf32> to vector<8x8xf32>
    %149 = arith.mulf %143, %148 : vector<8x8xf32>
    %150 = arith.truncf %149 : vector<8x8xf32> to vector<8x8xbf16>
    %151 = arith.truncf %26 : vector<8x8xf32> to vector<8x8xbf16>
    %cst_32 = arith.constant dense<0.000000e+00> : vector<8x8xf32>
    %152 = tpu.matmul %150, %151, %cst_32 {dimension_numbers = #tpu.dot_dimension_numbers<[1], [0], [0], [1], [0, 0, 1, 1], [], []>} : vector<8x8xbf16>, vector<8x8xbf16>, vector<8x8xf32> -> vector<8x8xf32>
    %c0_33 = arith.constant 0 : index
    %c0_34 = arith.constant 0 : index
    %153 = vector.load %arg16[%c0_33, %c0_34] : memref<8x32xf32, #tpu.memory_space<vmem>>, vector<8x32xf32>
    %154 = arith.truncf %152 : vector<8x8xf32> to vector<8x8xbf16>
    %c0_35 = arith.constant 0 : index
    %c0_36 = arith.constant 0 : index
    %c0_37 = arith.constant 0 : index
    %155 = vector.load %arg11[%c0_35, %c0_36, %c0_37] : memref<1x8x32xbf16, #tpu.memory_space<vmem>>, vector<1x8x32xbf16>
    %156 = vector.shape_cast %155 : vector<1x8x32xbf16> to vector<8x32xbf16>
    %cst_38 = arith.constant dense<0.000000e+00> : vector<8x32xf32>
    %157 = tpu.matmul %154, %156, %cst_38 {dimension_numbers = #tpu.dot_dimension_numbers<[1], [0], [0], [1], [0, 0, 1, 1], [], []>} : vector<8x8xbf16>, vector<8x32xbf16>, vector<8x32xf32> -> vector<8x32xf32>
    %158 = arith.addf %153, %157 : vector<8x32xf32>
    %c0_39 = arith.constant 0 : index
    %c0_40 = arith.constant 0 : index
    %159 = vector.load %arg16[%c0_39, %c0_40] : memref<8x32xf32, #tpu.memory_space<vmem>>, vector<8x32xf32>
    tpu.vector_store %arg16[%c0_39, %c0_40], %158 {strides = array<i32>} : memref<8x32xf32, #tpu.memory_space<vmem>>, vector<8x32xf32>,
    %c3_i32_41 = arith.constant 3 : i32
    %160 = arith.cmpi eq, %arg1, %c3_i32_41 : i32
    %161 = arith.extui %160 : i1 to i32
    %c0_i32_42 = arith.constant 0 : i32
    %162 = arith.cmpi ne, %161, %c0_i32_42 : i32
    scf.if %162 {
      %c0_43 = arith.constant 0 : index
      %c0_44 = arith.constant 0 : index
      %c0_45 = arith.constant 0 : index
      %163 = vector.load %arg2[%c0_43, %c0_44, %c0_45] : memref<1x8x32xf32, #tpu.memory_space<vmem>>, vector<1x8x32xf32>
      %164 = vector.shape_cast %163 : vector<1x8x32xf32> to vector<8x32xf32>
      %c0_46 = arith.constant 0 : index
      %c0_47 = arith.constant 0 : index
      %165 = vector.load %arg16[%c0_46, %c0_47] : memref<8x32xf32, #tpu.memory_space<vmem>>, vector<8x32xf32>
      %166 = arith.addf %164, %165 : vector<8x32xf32>
      %c0_48 = arith.constant 0 : index
      %c0_49 = arith.constant 0 : index
      %167 = vector.load %arg12[%c0_48, %c0_49] : memref<1x32xf32, #tpu.memory_space<vmem>>, vector<1x32xf32>
      %168 = vector.broadcast %167 : vector<1x32xf32> to vector<8x32xf32>
      %169 = arith.addf %166, %168 : vector<8x32xf32>
      %c0_50 = arith.constant 0 : index
      %c0_51 = arith.constant 0 : index
      %c0_52 = arith.constant 0 : index
      %170 = vector.load %arg14[%c0_50, %c0_51, %c0_52] : memref<1x8x32xf32, #tpu.memory_space<vmem>>, vector<1x8x32xf32>
      %171 = vector.shape_cast %170 : vector<1x8x32xf32> to vector<8x32xf32>
      %172 = vector.shape_cast %169 : vector<8x32xf32> to vector<1x8x32xf32>
      tpu.vector_store %arg14[%c0_50, %c0_51, %c0_52], %172 {strides = array<i32>} : memref<1x8x32xf32, #tpu.memory_space<vmem>>, vector<1x8x32xf32>,
    } else {
    }
    return
  }
  func.func @transform_0(%arg0: i32, %arg1: i32) -> (i32, i32, i32) {
    %c0_i32 = arith.constant 0 : i32
    %c0_i32_0 = arith.constant 0 : i32
    %c0_i32_1 = arith.constant 0 : i32
    return %arg0, %c0_i32, %c0_i32_0 : i32, i32, i32
  }
  func.func @transform_1(%arg0: i32, %arg1: i32) -> (i32, i32) {
    %c0_i32 = arith.constant 0 : i32
    %c0_i32_0 = arith.constant 0 : i32
    %c0_i32_1 = arith.constant 0 : i32
    return %c0_i32, %c0_i32_0 : i32, i32
  }
  func.func @transform_2(%arg0: i32, %arg1: i32) -> (i32, i32) {
    %c0_i32 = arith.constant 0 : i32
    %c0_i32_0 = arith.constant 0 : i32
    %c0_i32_1 = arith.constant 0 : i32
    return %c0_i32, %c0_i32_0 : i32, i32
  }
  func.func @transform_3(%arg0: i32, %arg1: i32) -> (i32, i32, i32) {
    %c0_i32 = arith.constant 0 : i32
    %c0_i32_0 = arith.constant 0 : i32
    %c0_i32_1 = arith.constant 0 : i32
    return %arg1, %c0_i32, %c0_i32_0 : i32, i32, i32
  }
  func.func @transform_4(%arg0: i32, %arg1: i32) -> (i32, i32, i32) {
    %c0_i32 = arith.constant 0 : i32
    %c0_i32_0 = arith.constant 0 : i32
    %c0_i32_1 = arith.constant 0 : i32
    return %arg1, %c0_i32, %c0_i32_0 : i32, i32, i32
  }
  func.func @transform_5(%arg0: i32, %arg1: i32) -> (i32, i32, i32) {
    %c0_i32 = arith.constant 0 : i32
    %c0_i32_0 = arith.constant 0 : i32
    %c0_i32_1 = arith.constant 0 : i32
    return %arg1, %c0_i32, %c0_i32_0 : i32, i32, i32
  }
  func.func @transform_6(%arg0: i32, %arg1: i32) -> (i32, i32, i32) {
    %c0_i32 = arith.constant 0 : i32
    %c0_i32_0 = arith.constant 0 : i32
    %c0_i32_1 = arith.constant 0 : i32
    return %arg1, %c0_i32, %c0_i32_0 : i32, i32, i32
  }
  func.func @transform_7(%arg0: i32, %arg1: i32) -> (i32, i32, i32) {
    %c0_i32 = arith.constant 0 : i32
    %c0_i32_0 = arith.constant 0 : i32
    %c0_i32_1 = arith.constant 0 : i32
    return %arg1, %c0_i32, %c0_i32_0 : i32, i32, i32
  }
  func.func @transform_8(%arg0: i32, %arg1: i32) -> (i32, i32, i32) {
    %c0_i32 = arith.constant 0 : i32
    %c0_i32_0 = arith.constant 0 : i32
    %c0_i32_1 = arith.constant 0 : i32
    return %arg1, %c0_i32, %c0_i32_0 : i32, i32, i32
  }
  func.func @transform_9(%arg0: i32, %arg1: i32) -> (i32, i32, i32) {
    %c0_i32 = arith.constant 0 : i32
    %c0_i32_0 = arith.constant 0 : i32
    %c0_i32_1 = arith.constant 0 : i32
    return %arg1, %c0_i32, %c0_i32_0 : i32, i32, i32
  }
  func.func @transform_10(%arg0: i32, %arg1: i32) -> (i32, i32) {
    %c0_i32 = arith.constant 0 : i32
    %c0_i32_0 = arith.constant 0 : i32
    %c0_i32_1 = arith.constant 0 : i32
    return %c0_i32, %c0_i32_0 : i32, i32
  }
  func.func @transform_11(%arg0: i32, %arg1: i32) -> (i32, i32) {
    %c0_i32 = arith.constant 0 : i32
    %c0_i32_0 = arith.constant 0 : i32
    %c0_i32_1 = arith.constant 0 : i32
    return %c0_i32, %c0_i32_0 : i32, i32
  }
  func.func @transform_12(%arg0: i32, %arg1: i32) -> (i32, i32, i32) {
    %c0_i32 = arith.constant 0 : i32
    %c0_i32_0 = arith.constant 0 : i32
    %c0_i32_1 = arith.constant 0 : i32
    return %arg0, %c0_i32, %c0_i32_0 : i32, i32, i32
  }
}

module attributes {stable_mosaic.version = 11 : i64} {
  func.func @conv_kernel(%arg0: i32, %arg1: memref<1x8x32xf32, #tpu.memory_space<vmem>>, %arg2: memref<1x32xf32, #tpu.memory_space<vmem>>, %arg3: memref<1x32xf32, #tpu.memory_space<vmem>>, %arg4: memref<32x32xbf16, #tpu.memory_space<vmem>>, %arg5: memref<1x32xf32, #tpu.memory_space<vmem>>, %arg6: memref<32x32xbf16, #tpu.memory_space<vmem>>, %arg7: memref<1x32xf32, #tpu.memory_space<vmem>>, %arg8: memref<31x32xf32, #tpu.memory_space<vmem>>, %arg9: memref<1x32xf32, #tpu.memory_space<vmem>>, %arg10: memref<1x32xf32, #tpu.memory_space<vmem>>, %arg11: memref<1x32xf32, #tpu.memory_space<vmem>>, %arg12: memref<1x32xf32, #tpu.memory_space<vmem>>, %arg13: memref<32x32xbf16, #tpu.memory_space<vmem>>, %arg14: memref<1x32xf32, #tpu.memory_space<vmem>>, %arg15: memref<1x8x32xf32, #tpu.memory_space<vmem>>, %arg16: memref<38x32xf32, #tpu.memory_space<vmem>>) attributes {dimension_semantics = [#tpu.dimension_semantics<parallel>], iteration_bounds = array<i64: 2>, scalar_prefetch = 0 : i64, scratch_operands = 1 : i64, tpu.core_type = #tpu.core_type<tc>, window_params = [{transform_indices = @transform_0, window_bounds = array<i64: 1, 8, 32>}, {pipeline_mode = #tpu.pipeline_mode<synchronous>, transform_indices = @transform_1, window_bounds = array<i64: 1, 32>}, {pipeline_mode = #tpu.pipeline_mode<synchronous>, transform_indices = @transform_2, window_bounds = array<i64: 1, 32>}, {pipeline_mode = #tpu.pipeline_mode<synchronous>, transform_indices = @transform_3, window_bounds = array<i64: 32, 32>}, {pipeline_mode = #tpu.pipeline_mode<synchronous>, transform_indices = @transform_4, window_bounds = array<i64: 1, 32>}, {pipeline_mode = #tpu.pipeline_mode<synchronous>, transform_indices = @transform_5, window_bounds = array<i64: 32, 32>}, {pipeline_mode = #tpu.pipeline_mode<synchronous>, transform_indices = @transform_6, window_bounds = array<i64: 1, 32>}, {pipeline_mode = #tpu.pipeline_mode<synchronous>, transform_indices = @transform_7, window_bounds = array<i64: 31, 32>}, {pipeline_mode = #tpu.pipeline_mode<synchronous>, transform_indices = @transform_8, window_bounds = array<i64: 1, 32>}, {pipeline_mode = #tpu.pipeline_mode<synchronous>, transform_indices = @transform_9, window_bounds = array<i64: 1, 32>}, {pipeline_mode = #tpu.pipeline_mode<synchronous>, transform_indices = @transform_10, window_bounds = array<i64: 1, 32>}, {pipeline_mode = #tpu.pipeline_mode<synchronous>, transform_indices = @transform_11, window_bounds = array<i64: 1, 32>}, {pipeline_mode = #tpu.pipeline_mode<synchronous>, transform_indices = @transform_12, window_bounds = array<i64: 32, 32>}, {pipeline_mode = #tpu.pipeline_mode<synchronous>, transform_indices = @transform_13, window_bounds = array<i64: 1, 32>}, {transform_indices = @transform_14, window_bounds = array<i64: 1, 8, 32>}]} {
    %c0 = arith.constant 0 : index
    %c0_0 = arith.constant 0 : index
    %c0_1 = arith.constant 0 : index
    %0 = vector.load %arg1[%c0, %c0_0, %c0_1] : memref<1x8x32xf32, #tpu.memory_space<vmem>>, vector<1x8x32xf32>
    %1 = vector.shape_cast %0 : vector<1x8x32xf32> to vector<8x32xf32>
    %c0_2 = arith.constant 0 : index
    %c0_3 = arith.constant 0 : index
    %2 = vector.load %arg2[%c0_2, %c0_3] : memref<1x32xf32, #tpu.memory_space<vmem>>, vector<1x32xf32>
    %c0_4 = arith.constant 0 : index
    %c0_5 = arith.constant 0 : index
    %3 = vector.load %arg3[%c0_4, %c0_5] : memref<1x32xf32, #tpu.memory_space<vmem>>, vector<1x32xf32>
    %cst = arith.constant dense<0.000000e+00> : vector<8xf32>
    %4 = vector.multi_reduction <add>, %1, %cst [1] : vector<8x32xf32> to vector<8xf32>
    %5 = vector.shape_cast %4 : vector<8xf32> to vector<8x1xf32>
    %cst_6 = arith.constant 3.200000e+01 : f32
    %6 = vector.broadcast %cst_6 : f32 to vector<8x1xf32>
    %7 = arith.divf %5, %6 : vector<8x1xf32>
    %8 = vector.broadcast %7 : vector<8x1xf32> to vector<8x32xf32>
    %9 = arith.subf %1, %8 : vector<8x32xf32>
    %10 = arith.mulf %9, %9 : vector<8x32xf32>
    %cst_7 = arith.constant dense<0.000000e+00> : vector<8xf32>
    %11 = vector.multi_reduction <add>, %10, %cst_7 [1] : vector<8x32xf32> to vector<8xf32>
    %12 = vector.shape_cast %11 : vector<8xf32> to vector<8x1xf32>
    %cst_8 = arith.constant 3.200000e+01 : f32
    %13 = vector.broadcast %cst_8 : f32 to vector<8x1xf32>
    %14 = arith.divf %12, %13 : vector<8x1xf32>
    %15 = vector.broadcast %7 : vector<8x1xf32> to vector<8x32xf32>
    %16 = arith.subf %1, %15 : vector<8x32xf32>
    %cst_9 = arith.constant 9.99999974E-6 : f32
    %17 = vector.broadcast %cst_9 : f32 to vector<8x1xf32>
    %18 = arith.addf %14, %17 : vector<8x1xf32>
    %19 = math.rsqrt %18 : vector<8x1xf32>
    %20 = vector.broadcast %19 : vector<8x1xf32> to vector<8x32xf32>
    %21 = arith.mulf %16, %20 : vector<8x32xf32>
    %22 = vector.broadcast %2 : vector<1x32xf32> to vector<8x32xf32>
    %23 = arith.mulf %21, %22 : vector<8x32xf32>
    %24 = vector.broadcast %3 : vector<1x32xf32> to vector<8x32xf32>
    %25 = arith.addf %23, %24 : vector<8x32xf32>
    %26 = arith.truncf %25 : vector<8x32xf32> to vector<8x32xbf16>
    %c0_10 = arith.constant 0 : index
    %c0_11 = arith.constant 0 : index
    %27 = vector.load %arg4[%c0_10, %c0_11] : memref<32x32xbf16, #tpu.memory_space<vmem>>, vector<32x32xbf16>
    %cst_12 = arith.constant dense<0.000000e+00> : vector<8x32xf32>
    %28 = tpu.matmul %26, %27, %cst_12 {dimension_numbers = #tpu.dot_dimension_numbers<[1], [0], [0], [1], [0, 0, 1, 1], [], []>} : vector<8x32xbf16>, vector<32x32xbf16>, vector<8x32xf32> -> vector<8x32xf32>
    %c0_13 = arith.constant 0 : index
    %c0_14 = arith.constant 0 : index
    %29 = vector.load %arg5[%c0_13, %c0_14] : memref<1x32xf32, #tpu.memory_space<vmem>>, vector<1x32xf32>
    %30 = vector.broadcast %29 : vector<1x32xf32> to vector<8x32xf32>
    %31 = arith.addf %28, %30 : vector<8x32xf32>
    %c0_15 = arith.constant 0 : index
    %c0_16 = arith.constant 0 : index
    %32 = vector.load %arg6[%c0_15, %c0_16] : memref<32x32xbf16, #tpu.memory_space<vmem>>, vector<32x32xbf16>
    %cst_17 = arith.constant dense<0.000000e+00> : vector<8x32xf32>
    %33 = tpu.matmul %26, %32, %cst_17 {dimension_numbers = #tpu.dot_dimension_numbers<[1], [0], [0], [1], [0, 0, 1, 1], [], []>} : vector<8x32xbf16>, vector<32x32xbf16>, vector<8x32xf32> -> vector<8x32xf32>
    %c0_18 = arith.constant 0 : index
    %c0_19 = arith.constant 0 : index
    %34 = vector.load %arg7[%c0_18, %c0_19] : memref<1x32xf32, #tpu.memory_space<vmem>>, vector<1x32xf32>
    %35 = vector.broadcast %34 : vector<1x32xf32> to vector<8x32xf32>
    %36 = arith.addf %33, %35 : vector<8x32xf32>
    %37 = arith.negf %36 : vector<8x32xf32>
    %38 = math.exp %37 : vector<8x32xf32>
    %cst_20 = arith.constant 1.000000e+00 : f32
    %39 = vector.broadcast %cst_20 : f32 to vector<8x32xf32>
    %40 = arith.addf %39, %38 : vector<8x32xf32>
    %41 = arith.divf %39, %40 : vector<8x32xf32>
    %42 = arith.mulf %31, %41 : vector<8x32xf32>
    %cst_21 = arith.constant 0.000000e+00 : f32
    %43 = vector.broadcast %cst_21 : f32 to vector<15x32xf32>
    %c0_22 = arith.constant 0 : index
    %c0_23 = arith.constant 0 : index
    %44 = vector.load %arg16[%c0_22, %c0_23] : memref<38x32xf32, #tpu.memory_space<vmem>>, vector<15x32xf32>
    tpu.vector_store %arg16[%c0_22, %c0_23], %43 {strides = array<i32>} : memref<38x32xf32, #tpu.memory_space<vmem>>, vector<15x32xf32>,
    %cst_24 = arith.constant 0.000000e+00 : f32
    %45 = vector.broadcast %cst_24 : f32 to vector<15x32xf32>
    %c23 = arith.constant 23 : index
    %c0_25 = arith.constant 0 : index
    %46 = vector.load %arg16[%c23, %c0_25] : memref<38x32xf32, #tpu.memory_space<vmem>>, vector<15x32xf32>
    tpu.vector_store %arg16[%c23, %c0_25], %45 {strides = array<i32>} : memref<38x32xf32, #tpu.memory_space<vmem>>, vector<15x32xf32>,
    %c15 = arith.constant 15 : index
    %c0_26 = arith.constant 0 : index
    %47 = vector.load %arg16[%c15, %c0_26] : memref<38x32xf32, #tpu.memory_space<vmem>>, vector<8x32xf32>
    tpu.vector_store %arg16[%c15, %c0_26], %42 {strides = array<i32>} : memref<38x32xf32, #tpu.memory_space<vmem>>, vector<8x32xf32>,
    %c0_27 = arith.constant 0 : index
    %c0_28 = arith.constant 0 : index
    %48 = vector.load %arg8[%c0_27, %c0_28] : memref<31x32xf32, #tpu.memory_space<vmem>>, vector<31x32xf32>
    %cst_29 = arith.constant 0.000000e+00 : f32
    %49 = vector.broadcast %cst_29 : f32 to vector<8x32xf32>
    %c0_30 = arith.constant 0 : index
    %c0_31 = arith.constant 0 : index
    %50 = vector.load %arg16[%c0_30, %c0_31] : memref<38x32xf32, #tpu.memory_space<vmem>>, vector<32x32xf32>
    %51 = vector.extract_strided_slice %50 {offsets = [0, 0], sizes = [8, 32], strides = [1, 1]} : vector<32x32xf32> to vector<8x32xf32>
    %52 = vector.extract_strided_slice %48 {offsets = [0, 0], sizes = [1, 32], strides = [1, 1]} : vector<31x32xf32> to vector<1x32xf32>
    %53 = vector.broadcast %52 : vector<1x32xf32> to vector<8x32xf32>
    %54 = arith.mulf %51, %53 : vector<8x32xf32>
    %55 = arith.addf %49, %54 : vector<8x32xf32>
    %56 = vector.extract_strided_slice %50 {offsets = [8, 0], sizes = [8, 32], strides = [1, 1]} : vector<32x32xf32> to vector<8x32xf32>
    %57 = vector.extract_strided_slice %48 {offsets = [8, 0], sizes = [1, 32], strides = [1, 1]} : vector<31x32xf32> to vector<1x32xf32>
    %58 = vector.broadcast %57 : vector<1x32xf32> to vector<8x32xf32>
    %59 = arith.mulf %56, %58 : vector<8x32xf32>
    %60 = arith.addf %55, %59 : vector<8x32xf32>
    %61 = vector.extract_strided_slice %50 {offsets = [16, 0], sizes = [8, 32], strides = [1, 1]} : vector<32x32xf32> to vector<8x32xf32>
    %62 = vector.extract_strided_slice %48 {offsets = [16, 0], sizes = [1, 32], strides = [1, 1]} : vector<31x32xf32> to vector<1x32xf32>
    %63 = vector.broadcast %62 : vector<1x32xf32> to vector<8x32xf32>
    %64 = arith.mulf %61, %63 : vector<8x32xf32>
    %65 = arith.addf %60, %64 : vector<8x32xf32>
    %66 = vector.extract_strided_slice %50 {offsets = [24, 0], sizes = [8, 32], strides = [1, 1]} : vector<32x32xf32> to vector<8x32xf32>
    %67 = vector.extract_strided_slice %48 {offsets = [24, 0], sizes = [1, 32], strides = [1, 1]} : vector<31x32xf32> to vector<1x32xf32>
    %68 = vector.broadcast %67 : vector<1x32xf32> to vector<8x32xf32>
    %69 = arith.mulf %66, %68 : vector<8x32xf32>
    %70 = arith.addf %65, %69 : vector<8x32xf32>
    %c1 = arith.constant 1 : index
    %c0_32 = arith.constant 0 : index
    %71 = vector.load %arg16[%c1, %c0_32] : memref<38x32xf32, #tpu.memory_space<vmem>>, vector<32x32xf32>
    %72 = vector.extract_strided_slice %71 {offsets = [0, 0], sizes = [8, 32], strides = [1, 1]} : vector<32x32xf32> to vector<8x32xf32>
    %73 = vector.extract_strided_slice %48 {offsets = [1, 0], sizes = [1, 32], strides = [1, 1]} : vector<31x32xf32> to vector<1x32xf32>
    %74 = vector.broadcast %73 : vector<1x32xf32> to vector<8x32xf32>
    %75 = arith.mulf %72, %74 : vector<8x32xf32>
    %76 = arith.addf %70, %75 : vector<8x32xf32>
    %77 = vector.extract_strided_slice %71 {offsets = [8, 0], sizes = [8, 32], strides = [1, 1]} : vector<32x32xf32> to vector<8x32xf32>
    %78 = vector.extract_strided_slice %48 {offsets = [9, 0], sizes = [1, 32], strides = [1, 1]} : vector<31x32xf32> to vector<1x32xf32>
    %79 = vector.broadcast %78 : vector<1x32xf32> to vector<8x32xf32>
    %80 = arith.mulf %77, %79 : vector<8x32xf32>
    %81 = arith.addf %76, %80 : vector<8x32xf32>
    %82 = vector.extract_strided_slice %71 {offsets = [16, 0], sizes = [8, 32], strides = [1, 1]} : vector<32x32xf32> to vector<8x32xf32>
    %83 = vector.extract_strided_slice %48 {offsets = [17, 0], sizes = [1, 32], strides = [1, 1]} : vector<31x32xf32> to vector<1x32xf32>
    %84 = vector.broadcast %83 : vector<1x32xf32> to vector<8x32xf32>
    %85 = arith.mulf %82, %84 : vector<8x32xf32>
    %86 = arith.addf %81, %85 : vector<8x32xf32>
    %87 = vector.extract_strided_slice %71 {offsets = [24, 0], sizes = [8, 32], strides = [1, 1]} : vector<32x32xf32> to vector<8x32xf32>
    %88 = vector.extract_strided_slice %48 {offsets = [25, 0], sizes = [1, 32], strides = [1, 1]} : vector<31x32xf32> to vector<1x32xf32>
    %89 = vector.broadcast %88 : vector<1x32xf32> to vector<8x32xf32>
    %90 = arith.mulf %87, %89 : vector<8x32xf32>
    %91 = arith.addf %86, %90 : vector<8x32xf32>
    %c2 = arith.constant 2 : index
    %c0_33 = arith.constant 0 : index
    %92 = vector.load %arg16[%c2, %c0_33] : memref<38x32xf32, #tpu.memory_space<vmem>>, vector<32x32xf32>
    %93 = vector.extract_strided_slice %92 {offsets = [0, 0], sizes = [8, 32], strides = [1, 1]} : vector<32x32xf32> to vector<8x32xf32>
    %94 = vector.extract_strided_slice %48 {offsets = [2, 0], sizes = [1, 32], strides = [1, 1]} : vector<31x32xf32> to vector<1x32xf32>
    %95 = vector.broadcast %94 : vector<1x32xf32> to vector<8x32xf32>
    %96 = arith.mulf %93, %95 : vector<8x32xf32>
    %97 = arith.addf %91, %96 : vector<8x32xf32>
    %98 = vector.extract_strided_slice %92 {offsets = [8, 0], sizes = [8, 32], strides = [1, 1]} : vector<32x32xf32> to vector<8x32xf32>
    %99 = vector.extract_strided_slice %48 {offsets = [10, 0], sizes = [1, 32], strides = [1, 1]} : vector<31x32xf32> to vector<1x32xf32>
    %100 = vector.broadcast %99 : vector<1x32xf32> to vector<8x32xf32>
    %101 = arith.mulf %98, %100 : vector<8x32xf32>
    %102 = arith.addf %97, %101 : vector<8x32xf32>
    %103 = vector.extract_strided_slice %92 {offsets = [16, 0], sizes = [8, 32], strides = [1, 1]} : vector<32x32xf32> to vector<8x32xf32>
    %104 = vector.extract_strided_slice %48 {offsets = [18, 0], sizes = [1, 32], strides = [1, 1]} : vector<31x32xf32> to vector<1x32xf32>
    %105 = vector.broadcast %104 : vector<1x32xf32> to vector<8x32xf32>
    %106 = arith.mulf %103, %105 : vector<8x32xf32>
    %107 = arith.addf %102, %106 : vector<8x32xf32>
    %108 = vector.extract_strided_slice %92 {offsets = [24, 0], sizes = [8, 32], strides = [1, 1]} : vector<32x32xf32> to vector<8x32xf32>
    %109 = vector.extract_strided_slice %48 {offsets = [26, 0], sizes = [1, 32], strides = [1, 1]} : vector<31x32xf32> to vector<1x32xf32>
    %110 = vector.broadcast %109 : vector<1x32xf32> to vector<8x32xf32>
    %111 = arith.mulf %108, %110 : vector<8x32xf32>
    %112 = arith.addf %107, %111 : vector<8x32xf32>
    %c3 = arith.constant 3 : index
    %c0_34 = arith.constant 0 : index
    %113 = vector.load %arg16[%c3, %c0_34] : memref<38x32xf32, #tpu.memory_space<vmem>>, vector<32x32xf32>
    %114 = vector.extract_strided_slice %113 {offsets = [0, 0], sizes = [8, 32], strides = [1, 1]} : vector<32x32xf32> to vector<8x32xf32>
    %115 = vector.extract_strided_slice %48 {offsets = [3, 0], sizes = [1, 32], strides = [1, 1]} : vector<31x32xf32> to vector<1x32xf32>
    %116 = vector.broadcast %115 : vector<1x32xf32> to vector<8x32xf32>
    %117 = arith.mulf %114, %116 : vector<8x32xf32>
    %118 = arith.addf %112, %117 : vector<8x32xf32>
    %119 = vector.extract_strided_slice %113 {offsets = [8, 0], sizes = [8, 32], strides = [1, 1]} : vector<32x32xf32> to vector<8x32xf32>
    %120 = vector.extract_strided_slice %48 {offsets = [11, 0], sizes = [1, 32], strides = [1, 1]} : vector<31x32xf32> to vector<1x32xf32>
    %121 = vector.broadcast %120 : vector<1x32xf32> to vector<8x32xf32>
    %122 = arith.mulf %119, %121 : vector<8x32xf32>
    %123 = arith.addf %118, %122 : vector<8x32xf32>
    %124 = vector.extract_strided_slice %113 {offsets = [16, 0], sizes = [8, 32], strides = [1, 1]} : vector<32x32xf32> to vector<8x32xf32>
    %125 = vector.extract_strided_slice %48 {offsets = [19, 0], sizes = [1, 32], strides = [1, 1]} : vector<31x32xf32> to vector<1x32xf32>
    %126 = vector.broadcast %125 : vector<1x32xf32> to vector<8x32xf32>
    %127 = arith.mulf %124, %126 : vector<8x32xf32>
    %128 = arith.addf %123, %127 : vector<8x32xf32>
    %129 = vector.extract_strided_slice %113 {offsets = [24, 0], sizes = [8, 32], strides = [1, 1]} : vector<32x32xf32> to vector<8x32xf32>
    %130 = vector.extract_strided_slice %48 {offsets = [27, 0], sizes = [1, 32], strides = [1, 1]} : vector<31x32xf32> to vector<1x32xf32>
    %131 = vector.broadcast %130 : vector<1x32xf32> to vector<8x32xf32>
    %132 = arith.mulf %129, %131 : vector<8x32xf32>
    %133 = arith.addf %128, %132 : vector<8x32xf32>
    %c4 = arith.constant 4 : index
    %c0_35 = arith.constant 0 : index
    %134 = vector.load %arg16[%c4, %c0_35] : memref<38x32xf32, #tpu.memory_space<vmem>>, vector<32x32xf32>
    %135 = vector.extract_strided_slice %134 {offsets = [0, 0], sizes = [8, 32], strides = [1, 1]} : vector<32x32xf32> to vector<8x32xf32>
    %136 = vector.extract_strided_slice %48 {offsets = [4, 0], sizes = [1, 32], strides = [1, 1]} : vector<31x32xf32> to vector<1x32xf32>
    %137 = vector.broadcast %136 : vector<1x32xf32> to vector<8x32xf32>
    %138 = arith.mulf %135, %137 : vector<8x32xf32>
    %139 = arith.addf %133, %138 : vector<8x32xf32>
    %140 = vector.extract_strided_slice %134 {offsets = [8, 0], sizes = [8, 32], strides = [1, 1]} : vector<32x32xf32> to vector<8x32xf32>
    %141 = vector.extract_strided_slice %48 {offsets = [12, 0], sizes = [1, 32], strides = [1, 1]} : vector<31x32xf32> to vector<1x32xf32>
    %142 = vector.broadcast %141 : vector<1x32xf32> to vector<8x32xf32>
    %143 = arith.mulf %140, %142 : vector<8x32xf32>
    %144 = arith.addf %139, %143 : vector<8x32xf32>
    %145 = vector.extract_strided_slice %134 {offsets = [16, 0], sizes = [8, 32], strides = [1, 1]} : vector<32x32xf32> to vector<8x32xf32>
    %146 = vector.extract_strided_slice %48 {offsets = [20, 0], sizes = [1, 32], strides = [1, 1]} : vector<31x32xf32> to vector<1x32xf32>
    %147 = vector.broadcast %146 : vector<1x32xf32> to vector<8x32xf32>
    %148 = arith.mulf %145, %147 : vector<8x32xf32>
    %149 = arith.addf %144, %148 : vector<8x32xf32>
    %150 = vector.extract_strided_slice %134 {offsets = [24, 0], sizes = [8, 32], strides = [1, 1]} : vector<32x32xf32> to vector<8x32xf32>
    %151 = vector.extract_strided_slice %48 {offsets = [28, 0], sizes = [1, 32], strides = [1, 1]} : vector<31x32xf32> to vector<1x32xf32>
    %152 = vector.broadcast %151 : vector<1x32xf32> to vector<8x32xf32>
    %153 = arith.mulf %150, %152 : vector<8x32xf32>
    %154 = arith.addf %149, %153 : vector<8x32xf32>
    %c5 = arith.constant 5 : index
    %c0_36 = arith.constant 0 : index
    %155 = vector.load %arg16[%c5, %c0_36] : memref<38x32xf32, #tpu.memory_space<vmem>>, vector<32x32xf32>
    %156 = vector.extract_strided_slice %155 {offsets = [0, 0], sizes = [8, 32], strides = [1, 1]} : vector<32x32xf32> to vector<8x32xf32>
    %157 = vector.extract_strided_slice %48 {offsets = [5, 0], sizes = [1, 32], strides = [1, 1]} : vector<31x32xf32> to vector<1x32xf32>
    %158 = vector.broadcast %157 : vector<1x32xf32> to vector<8x32xf32>
    %159 = arith.mulf %156, %158 : vector<8x32xf32>
    %160 = arith.addf %154, %159 : vector<8x32xf32>
    %161 = vector.extract_strided_slice %155 {offsets = [8, 0], sizes = [8, 32], strides = [1, 1]} : vector<32x32xf32> to vector<8x32xf32>
    %162 = vector.extract_strided_slice %48 {offsets = [13, 0], sizes = [1, 32], strides = [1, 1]} : vector<31x32xf32> to vector<1x32xf32>
    %163 = vector.broadcast %162 : vector<1x32xf32> to vector<8x32xf32>
    %164 = arith.mulf %161, %163 : vector<8x32xf32>
    %165 = arith.addf %160, %164 : vector<8x32xf32>
    %166 = vector.extract_strided_slice %155 {offsets = [16, 0], sizes = [8, 32], strides = [1, 1]} : vector<32x32xf32> to vector<8x32xf32>
    %167 = vector.extract_strided_slice %48 {offsets = [21, 0], sizes = [1, 32], strides = [1, 1]} : vector<31x32xf32> to vector<1x32xf32>
    %168 = vector.broadcast %167 : vector<1x32xf32> to vector<8x32xf32>
    %169 = arith.mulf %166, %168 : vector<8x32xf32>
    %170 = arith.addf %165, %169 : vector<8x32xf32>
    %171 = vector.extract_strided_slice %155 {offsets = [24, 0], sizes = [8, 32], strides = [1, 1]} : vector<32x32xf32> to vector<8x32xf32>
    %172 = vector.extract_strided_slice %48 {offsets = [29, 0], sizes = [1, 32], strides = [1, 1]} : vector<31x32xf32> to vector<1x32xf32>
    %173 = vector.broadcast %172 : vector<1x32xf32> to vector<8x32xf32>
    %174 = arith.mulf %171, %173 : vector<8x32xf32>
    %175 = arith.addf %170, %174 : vector<8x32xf32>
    %c6 = arith.constant 6 : index
    %c0_37 = arith.constant 0 : index
    %176 = vector.load %arg16[%c6, %c0_37] : memref<38x32xf32, #tpu.memory_space<vmem>>, vector<32x32xf32>
    %177 = vector.extract_strided_slice %176 {offsets = [0, 0], sizes = [8, 32], strides = [1, 1]} : vector<32x32xf32> to vector<8x32xf32>
    %178 = vector.extract_strided_slice %48 {offsets = [6, 0], sizes = [1, 32], strides = [1, 1]} : vector<31x32xf32> to vector<1x32xf32>
    %179 = vector.broadcast %178 : vector<1x32xf32> to vector<8x32xf32>
    %180 = arith.mulf %177, %179 : vector<8x32xf32>
    %181 = arith.addf %175, %180 : vector<8x32xf32>
    %182 = vector.extract_strided_slice %176 {offsets = [8, 0], sizes = [8, 32], strides = [1, 1]} : vector<32x32xf32> to vector<8x32xf32>
    %183 = vector.extract_strided_slice %48 {offsets = [14, 0], sizes = [1, 32], strides = [1, 1]} : vector<31x32xf32> to vector<1x32xf32>
    %184 = vector.broadcast %183 : vector<1x32xf32> to vector<8x32xf32>
    %185 = arith.mulf %182, %184 : vector<8x32xf32>
    %186 = arith.addf %181, %185 : vector<8x32xf32>
    %187 = vector.extract_strided_slice %176 {offsets = [16, 0], sizes = [8, 32], strides = [1, 1]} : vector<32x32xf32> to vector<8x32xf32>
    %188 = vector.extract_strided_slice %48 {offsets = [22, 0], sizes = [1, 32], strides = [1, 1]} : vector<31x32xf32> to vector<1x32xf32>
    %189 = vector.broadcast %188 : vector<1x32xf32> to vector<8x32xf32>
    %190 = arith.mulf %187, %189 : vector<8x32xf32>
    %191 = arith.addf %186, %190 : vector<8x32xf32>
    %192 = vector.extract_strided_slice %176 {offsets = [24, 0], sizes = [8, 32], strides = [1, 1]} : vector<32x32xf32> to vector<8x32xf32>
    %193 = vector.extract_strided_slice %48 {offsets = [30, 0], sizes = [1, 32], strides = [1, 1]} : vector<31x32xf32> to vector<1x32xf32>
    %194 = vector.broadcast %193 : vector<1x32xf32> to vector<8x32xf32>
    %195 = arith.mulf %192, %194 : vector<8x32xf32>
    %196 = arith.addf %191, %195 : vector<8x32xf32>
    %c7 = arith.constant 7 : index
    %c0_38 = arith.constant 0 : index
    %197 = vector.load %arg16[%c7, %c0_38] : memref<38x32xf32, #tpu.memory_space<vmem>>, vector<24x32xf32>
    %198 = vector.extract_strided_slice %197 {offsets = [0, 0], sizes = [8, 32], strides = [1, 1]} : vector<24x32xf32> to vector<8x32xf32>
    %199 = vector.extract_strided_slice %48 {offsets = [7, 0], sizes = [1, 32], strides = [1, 1]} : vector<31x32xf32> to vector<1x32xf32>
    %200 = vector.broadcast %199 : vector<1x32xf32> to vector<8x32xf32>
    %201 = arith.mulf %198, %200 : vector<8x32xf32>
    %202 = arith.addf %196, %201 : vector<8x32xf32>
    %203 = vector.extract_strided_slice %197 {offsets = [8, 0], sizes = [8, 32], strides = [1, 1]} : vector<24x32xf32> to vector<8x32xf32>
    %204 = vector.extract_strided_slice %48 {offsets = [15, 0], sizes = [1, 32], strides = [1, 1]} : vector<31x32xf32> to vector<1x32xf32>
    %205 = vector.broadcast %204 : vector<1x32xf32> to vector<8x32xf32>
    %206 = arith.mulf %203, %205 : vector<8x32xf32>
    %207 = arith.addf %202, %206 : vector<8x32xf32>
    %208 = vector.extract_strided_slice %197 {offsets = [16, 0], sizes = [8, 32], strides = [1, 1]} : vector<24x32xf32> to vector<8x32xf32>
    %209 = vector.extract_strided_slice %48 {offsets = [23, 0], sizes = [1, 32], strides = [1, 1]} : vector<31x32xf32> to vector<1x32xf32>
    %210 = vector.broadcast %209 : vector<1x32xf32> to vector<8x32xf32>
    %211 = arith.mulf %208, %210 : vector<8x32xf32>
    %212 = arith.addf %207, %211 : vector<8x32xf32>
    %c0_39 = arith.constant 0 : index
    %c0_40 = arith.constant 0 : index
    %213 = vector.load %arg11[%c0_39, %c0_40] : memref<1x32xf32, #tpu.memory_space<vmem>>, vector<1x32xf32>
    %214 = vector.broadcast %213 : vector<1x32xf32> to vector<8x32xf32>
    %215 = arith.subf %212, %214 : vector<8x32xf32>
    %c0_41 = arith.constant 0 : index
    %c0_42 = arith.constant 0 : index
    %216 = vector.load %arg12[%c0_41, %c0_42] : memref<1x32xf32, #tpu.memory_space<vmem>>, vector<1x32xf32>
    %cst_43 = arith.constant 9.99999974E-6 : f32
    %217 = vector.broadcast %cst_43 : f32 to vector<1x32xf32>
    %218 = arith.addf %216, %217 : vector<1x32xf32>
    %219 = math.rsqrt %218 : vector<1x32xf32>
    %220 = vector.broadcast %219 : vector<1x32xf32> to vector<8x32xf32>
    %221 = arith.mulf %215, %220 : vector<8x32xf32>
    %c0_44 = arith.constant 0 : index
    %c0_45 = arith.constant 0 : index
    %222 = vector.load %arg9[%c0_44, %c0_45] : memref<1x32xf32, #tpu.memory_space<vmem>>, vector<1x32xf32>
    %223 = vector.broadcast %222 : vector<1x32xf32> to vector<8x32xf32>
    %224 = arith.mulf %221, %223 : vector<8x32xf32>
    %c0_46 = arith.constant 0 : index
    %c0_47 = arith.constant 0 : index
    %225 = vector.load %arg10[%c0_46, %c0_47] : memref<1x32xf32, #tpu.memory_space<vmem>>, vector<1x32xf32>
    %226 = vector.broadcast %225 : vector<1x32xf32> to vector<8x32xf32>
    %227 = arith.addf %224, %226 : vector<8x32xf32>
    %228 = arith.negf %227 : vector<8x32xf32>
    %229 = math.exp %228 : vector<8x32xf32>
    %cst_48 = arith.constant 1.000000e+00 : f32
    %230 = vector.broadcast %cst_48 : f32 to vector<8x32xf32>
    %231 = arith.addf %230, %229 : vector<8x32xf32>
    %232 = arith.divf %230, %231 : vector<8x32xf32>
    %233 = arith.mulf %227, %232 : vector<8x32xf32>
    %234 = arith.truncf %233 : vector<8x32xf32> to vector<8x32xbf16>
    %c0_49 = arith.constant 0 : index
    %c0_50 = arith.constant 0 : index
    %235 = vector.load %arg13[%c0_49, %c0_50] : memref<32x32xbf16, #tpu.memory_space<vmem>>, vector<32x32xbf16>
    %cst_51 = arith.constant dense<0.000000e+00> : vector<8x32xf32>
    %236 = tpu.matmul %234, %235, %cst_51 {dimension_numbers = #tpu.dot_dimension_numbers<[1], [0], [0], [1], [0, 0, 1, 1], [], []>} : vector<8x32xbf16>, vector<32x32xbf16>, vector<8x32xf32> -> vector<8x32xf32>
    %c0_52 = arith.constant 0 : index
    %c0_53 = arith.constant 0 : index
    %237 = vector.load %arg14[%c0_52, %c0_53] : memref<1x32xf32, #tpu.memory_space<vmem>>, vector<1x32xf32>
    %238 = vector.broadcast %237 : vector<1x32xf32> to vector<8x32xf32>
    %239 = arith.addf %236, %238 : vector<8x32xf32>
    %240 = arith.addf %1, %239 : vector<8x32xf32>
    %c0_54 = arith.constant 0 : index
    %c0_55 = arith.constant 0 : index
    %c0_56 = arith.constant 0 : index
    %241 = vector.load %arg15[%c0_54, %c0_55, %c0_56] : memref<1x8x32xf32, #tpu.memory_space<vmem>>, vector<1x8x32xf32>
    %242 = vector.shape_cast %241 : vector<1x8x32xf32> to vector<8x32xf32>
    %243 = vector.shape_cast %240 : vector<8x32xf32> to vector<1x8x32xf32>
    tpu.vector_store %arg15[%c0_54, %c0_55, %c0_56], %243 {strides = array<i32>} : memref<1x8x32xf32, #tpu.memory_space<vmem>>, vector<1x8x32xf32>,
    return
  }
  func.func @transform_0(%arg0: i32) -> (i32, i32, i32) {
    %c0_i32 = arith.constant 0 : i32
    %c0_i32_0 = arith.constant 0 : i32
    %c0_i32_1 = arith.constant 0 : i32
    return %arg0, %c0_i32, %c0_i32_0 : i32, i32, i32
  }
  func.func @transform_1(%arg0: i32) -> (i32, i32) {
    %c0_i32 = arith.constant 0 : i32
    %c0_i32_0 = arith.constant 0 : i32
    %c0_i32_1 = arith.constant 0 : i32
    return %c0_i32, %c0_i32_0 : i32, i32
  }
  func.func @transform_2(%arg0: i32) -> (i32, i32) {
    %c0_i32 = arith.constant 0 : i32
    %c0_i32_0 = arith.constant 0 : i32
    %c0_i32_1 = arith.constant 0 : i32
    return %c0_i32, %c0_i32_0 : i32, i32
  }
  func.func @transform_3(%arg0: i32) -> (i32, i32) {
    %c0_i32 = arith.constant 0 : i32
    %c0_i32_0 = arith.constant 0 : i32
    %c0_i32_1 = arith.constant 0 : i32
    return %c0_i32, %c0_i32_0 : i32, i32
  }
  func.func @transform_4(%arg0: i32) -> (i32, i32) {
    %c0_i32 = arith.constant 0 : i32
    %c0_i32_0 = arith.constant 0 : i32
    %c0_i32_1 = arith.constant 0 : i32
    return %c0_i32, %c0_i32_0 : i32, i32
  }
  func.func @transform_5(%arg0: i32) -> (i32, i32) {
    %c0_i32 = arith.constant 0 : i32
    %c0_i32_0 = arith.constant 0 : i32
    %c0_i32_1 = arith.constant 0 : i32
    return %c0_i32, %c0_i32_0 : i32, i32
  }
  func.func @transform_6(%arg0: i32) -> (i32, i32) {
    %c0_i32 = arith.constant 0 : i32
    %c0_i32_0 = arith.constant 0 : i32
    %c0_i32_1 = arith.constant 0 : i32
    return %c0_i32, %c0_i32_0 : i32, i32
  }
  func.func @transform_7(%arg0: i32) -> (i32, i32) {
    %c0_i32 = arith.constant 0 : i32
    %c0_i32_0 = arith.constant 0 : i32
    %c0_i32_1 = arith.constant 0 : i32
    return %c0_i32, %c0_i32_0 : i32, i32
  }
  func.func @transform_8(%arg0: i32) -> (i32, i32) {
    %c0_i32 = arith.constant 0 : i32
    %c0_i32_0 = arith.constant 0 : i32
    %c0_i32_1 = arith.constant 0 : i32
    return %c0_i32, %c0_i32_0 : i32, i32
  }
  func.func @transform_9(%arg0: i32) -> (i32, i32) {
    %c0_i32 = arith.constant 0 : i32
    %c0_i32_0 = arith.constant 0 : i32
    %c0_i32_1 = arith.constant 0 : i32
    return %c0_i32, %c0_i32_0 : i32, i32
  }
  func.func @transform_10(%arg0: i32) -> (i32, i32) {
    %c0_i32 = arith.constant 0 : i32
    %c0_i32_0 = arith.constant 0 : i32
    %c0_i32_1 = arith.constant 0 : i32
    return %c0_i32, %c0_i32_0 : i32, i32
  }
  func.func @transform_11(%arg0: i32) -> (i32, i32) {
    %c0_i32 = arith.constant 0 : i32
    %c0_i32_0 = arith.constant 0 : i32
    %c0_i32_1 = arith.constant 0 : i32
    return %c0_i32, %c0_i32_0 : i32, i32
  }
  func.func @transform_12(%arg0: i32) -> (i32, i32) {
    %c0_i32 = arith.constant 0 : i32
    %c0_i32_0 = arith.constant 0 : i32
    %c0_i32_1 = arith.constant 0 : i32
    return %c0_i32, %c0_i32_0 : i32, i32
  }
  func.func @transform_13(%arg0: i32) -> (i32, i32) {
    %c0_i32 = arith.constant 0 : i32
    %c0_i32_0 = arith.constant 0 : i32
    %c0_i32_1 = arith.constant 0 : i32
    return %c0_i32, %c0_i32_0 : i32, i32
  }
  func.func @transform_14(%arg0: i32) -> (i32, i32, i32) {
    %c0_i32 = arith.constant 0 : i32
    %c0_i32_0 = arith.constant 0 : i32
    %c0_i32_1 = arith.constant 0 : i32
    return %arg0, %c0_i32, %c0_i32_0 : i32, i32, i32
  }
}

module attributes {stable_mosaic.version = 11 : i64} {
  func.func @ffn_ln_kernel(%arg0: i32, %arg1: memref<16x32xf32, #tpu.memory_space<vmem>>, %arg2: memref<1x32xf32, #tpu.memory_space<vmem>>, %arg3: memref<1x32xf32, #tpu.memory_space<vmem>>, %arg4: memref<32x128xbf16, #tpu.memory_space<vmem>>, %arg5: memref<1x128xf32, #tpu.memory_space<vmem>>, %arg6: memref<128x32xbf16, #tpu.memory_space<vmem>>, %arg7: memref<1x32xf32, #tpu.memory_space<vmem>>, %arg8: memref<1x32xf32, #tpu.memory_space<vmem>>, %arg9: memref<1x32xf32, #tpu.memory_space<vmem>>, %arg10: memref<16x32xf32, #tpu.memory_space<vmem>>) attributes {dimension_semantics = [#tpu.dimension_semantics<parallel>], iteration_bounds = array<i64: 1>, scalar_prefetch = 0 : i64, scratch_operands = 0 : i64, tpu.core_type = #tpu.core_type<tc>, window_params = [{transform_indices = @transform_0, window_bounds = array<i64: 16, 32>}, {pipeline_mode = #tpu.pipeline_mode<synchronous>, transform_indices = @transform_1, window_bounds = array<i64: 1, 32>}, {pipeline_mode = #tpu.pipeline_mode<synchronous>, transform_indices = @transform_2, window_bounds = array<i64: 1, 32>}, {pipeline_mode = #tpu.pipeline_mode<synchronous>, transform_indices = @transform_3, window_bounds = array<i64: 32, 128>}, {pipeline_mode = #tpu.pipeline_mode<synchronous>, transform_indices = @transform_4, window_bounds = array<i64: 1, 128>}, {pipeline_mode = #tpu.pipeline_mode<synchronous>, transform_indices = @transform_5, window_bounds = array<i64: 128, 32>}, {pipeline_mode = #tpu.pipeline_mode<synchronous>, transform_indices = @transform_6, window_bounds = array<i64: 1, 32>}, {pipeline_mode = #tpu.pipeline_mode<synchronous>, transform_indices = @transform_7, window_bounds = array<i64: 1, 32>}, {pipeline_mode = #tpu.pipeline_mode<synchronous>, transform_indices = @transform_8, window_bounds = array<i64: 1, 32>}, {transform_indices = @transform_9, window_bounds = array<i64: 16, 32>}]} {
    %c0 = arith.constant 0 : index
    %c0_0 = arith.constant 0 : index
    %0 = vector.load %arg1[%c0, %c0_0] : memref<16x32xf32, #tpu.memory_space<vmem>>, vector<16x32xf32>
    %c0_1 = arith.constant 0 : index
    %c0_2 = arith.constant 0 : index
    %1 = vector.load %arg2[%c0_1, %c0_2] : memref<1x32xf32, #tpu.memory_space<vmem>>, vector<1x32xf32>
    %c0_3 = arith.constant 0 : index
    %c0_4 = arith.constant 0 : index
    %2 = vector.load %arg3[%c0_3, %c0_4] : memref<1x32xf32, #tpu.memory_space<vmem>>, vector<1x32xf32>
    %cst = arith.constant dense<0.000000e+00> : vector<16xf32>
    %3 = vector.multi_reduction <add>, %0, %cst [1] : vector<16x32xf32> to vector<16xf32>
    %4 = vector.shape_cast %3 : vector<16xf32> to vector<16x1xf32>
    %cst_5 = arith.constant 3.200000e+01 : f32
    %5 = vector.broadcast %cst_5 : f32 to vector<16x1xf32>
    %6 = arith.divf %4, %5 : vector<16x1xf32>
    %7 = vector.broadcast %6 : vector<16x1xf32> to vector<16x32xf32>
    %8 = arith.subf %0, %7 : vector<16x32xf32>
    %9 = arith.mulf %8, %8 : vector<16x32xf32>
    %cst_6 = arith.constant dense<0.000000e+00> : vector<16xf32>
    %10 = vector.multi_reduction <add>, %9, %cst_6 [1] : vector<16x32xf32> to vector<16xf32>
    %11 = vector.shape_cast %10 : vector<16xf32> to vector<16x1xf32>
    %cst_7 = arith.constant 3.200000e+01 : f32
    %12 = vector.broadcast %cst_7 : f32 to vector<16x1xf32>
    %13 = arith.divf %11, %12 : vector<16x1xf32>
    %14 = vector.broadcast %6 : vector<16x1xf32> to vector<16x32xf32>
    %15 = arith.subf %0, %14 : vector<16x32xf32>
    %cst_8 = arith.constant 9.99999974E-6 : f32
    %16 = vector.broadcast %cst_8 : f32 to vector<16x1xf32>
    %17 = arith.addf %13, %16 : vector<16x1xf32>
    %18 = math.rsqrt %17 : vector<16x1xf32>
    %19 = vector.broadcast %18 : vector<16x1xf32> to vector<16x32xf32>
    %20 = arith.mulf %15, %19 : vector<16x32xf32>
    %21 = vector.broadcast %1 : vector<1x32xf32> to vector<16x32xf32>
    %22 = arith.mulf %20, %21 : vector<16x32xf32>
    %23 = vector.broadcast %2 : vector<1x32xf32> to vector<16x32xf32>
    %24 = arith.addf %22, %23 : vector<16x32xf32>
    %25 = arith.truncf %24 : vector<16x32xf32> to vector<16x32xbf16>
    %c0_9 = arith.constant 0 : index
    %c0_10 = arith.constant 0 : index
    %26 = vector.load %arg4[%c0_9, %c0_10] : memref<32x128xbf16, #tpu.memory_space<vmem>>, vector<32x128xbf16>
    %cst_11 = arith.constant dense<0.000000e+00> : vector<16x128xf32>
    %27 = tpu.matmul %25, %26, %cst_11 {dimension_numbers = #tpu.dot_dimension_numbers<[1], [0], [0], [1], [0, 0, 1, 1], [], []>} : vector<16x32xbf16>, vector<32x128xbf16>, vector<16x128xf32> -> vector<16x128xf32>
    %c0_12 = arith.constant 0 : index
    %c0_13 = arith.constant 0 : index
    %28 = vector.load %arg5[%c0_12, %c0_13] : memref<1x128xf32, #tpu.memory_space<vmem>>, vector<1x128xf32>
    %29 = vector.broadcast %28 : vector<1x128xf32> to vector<16x128xf32>
    %30 = arith.addf %27, %29 : vector<16x128xf32>
    %31 = arith.negf %30 : vector<16x128xf32>
    %32 = math.exp %31 : vector<16x128xf32>
    %cst_14 = arith.constant 1.000000e+00 : f32
    %33 = vector.broadcast %cst_14 : f32 to vector<16x128xf32>
    %34 = arith.addf %33, %32 : vector<16x128xf32>
    %35 = arith.divf %33, %34 : vector<16x128xf32>
    %36 = arith.mulf %30, %35 : vector<16x128xf32>
    %37 = arith.truncf %36 : vector<16x128xf32> to vector<16x128xbf16>
    %c0_15 = arith.constant 0 : index
    %c0_16 = arith.constant 0 : index
    %38 = vector.load %arg6[%c0_15, %c0_16] : memref<128x32xbf16, #tpu.memory_space<vmem>>, vector<128x32xbf16>
    %cst_17 = arith.constant dense<0.000000e+00> : vector<16x32xf32>
    %39 = tpu.matmul %37, %38, %cst_17 {dimension_numbers = #tpu.dot_dimension_numbers<[1], [0], [0], [1], [0, 0, 1, 1], [], []>} : vector<16x128xbf16>, vector<128x32xbf16>, vector<16x32xf32> -> vector<16x32xf32>
    %c0_18 = arith.constant 0 : index
    %c0_19 = arith.constant 0 : index
    %40 = vector.load %arg7[%c0_18, %c0_19] : memref<1x32xf32, #tpu.memory_space<vmem>>, vector<1x32xf32>
    %41 = vector.broadcast %40 : vector<1x32xf32> to vector<16x32xf32>
    %42 = arith.addf %39, %41 : vector<16x32xf32>
    %cst_20 = arith.constant 5.000000e-01 : f32
    %43 = vector.broadcast %cst_20 : f32 to vector<16x32xf32>
    %44 = arith.mulf %43, %0 : vector<16x32xf32>
    %45 = arith.addf %44, %42 : vector<16x32xf32>
    %c0_21 = arith.constant 0 : index
    %c0_22 = arith.constant 0 : index
    %46 = vector.load %arg8[%c0_21, %c0_22] : memref<1x32xf32, #tpu.memory_space<vmem>>, vector<1x32xf32>
    %c0_23 = arith.constant 0 : index
    %c0_24 = arith.constant 0 : index
    %47 = vector.load %arg9[%c0_23, %c0_24] : memref<1x32xf32, #tpu.memory_space<vmem>>, vector<1x32xf32>
    %cst_25 = arith.constant dense<0.000000e+00> : vector<16xf32>
    %48 = vector.multi_reduction <add>, %45, %cst_25 [1] : vector<16x32xf32> to vector<16xf32>
    %49 = vector.shape_cast %48 : vector<16xf32> to vector<16x1xf32>
    %cst_26 = arith.constant 3.200000e+01 : f32
    %50 = vector.broadcast %cst_26 : f32 to vector<16x1xf32>
    %51 = arith.divf %49, %50 : vector<16x1xf32>
    %52 = vector.broadcast %51 : vector<16x1xf32> to vector<16x32xf32>
    %53 = arith.subf %45, %52 : vector<16x32xf32>
    %54 = arith.mulf %53, %53 : vector<16x32xf32>
    %cst_27 = arith.constant dense<0.000000e+00> : vector<16xf32>
    %55 = vector.multi_reduction <add>, %54, %cst_27 [1] : vector<16x32xf32> to vector<16xf32>
    %56 = vector.shape_cast %55 : vector<16xf32> to vector<16x1xf32>
    %cst_28 = arith.constant 3.200000e+01 : f32
    %57 = vector.broadcast %cst_28 : f32 to vector<16x1xf32>
    %58 = arith.divf %56, %57 : vector<16x1xf32>
    %59 = vector.broadcast %51 : vector<16x1xf32> to vector<16x32xf32>
    %60 = arith.subf %45, %59 : vector<16x32xf32>
    %cst_29 = arith.constant 9.99999974E-6 : f32
    %61 = vector.broadcast %cst_29 : f32 to vector<16x1xf32>
    %62 = arith.addf %58, %61 : vector<16x1xf32>
    %63 = math.rsqrt %62 : vector<16x1xf32>
    %64 = vector.broadcast %63 : vector<16x1xf32> to vector<16x32xf32>
    %65 = arith.mulf %60, %64 : vector<16x32xf32>
    %66 = vector.broadcast %46 : vector<1x32xf32> to vector<16x32xf32>
    %67 = arith.mulf %65, %66 : vector<16x32xf32>
    %68 = vector.broadcast %47 : vector<1x32xf32> to vector<16x32xf32>
    %69 = arith.addf %67, %68 : vector<16x32xf32>
    %c0_30 = arith.constant 0 : index
    %c0_31 = arith.constant 0 : index
    %70 = vector.load %arg10[%c0_30, %c0_31] : memref<16x32xf32, #tpu.memory_space<vmem>>, vector<16x32xf32>
    tpu.vector_store %arg10[%c0_30, %c0_31], %69 {strides = array<i32>} : memref<16x32xf32, #tpu.memory_space<vmem>>, vector<16x32xf32>,
    return
  }
  func.func @transform_0(%arg0: i32) -> (i32, i32) {
    %c0_i32 = arith.constant 0 : i32
    %c0_i32_0 = arith.constant 0 : i32
    return %arg0, %c0_i32 : i32, i32
  }
  func.func @transform_1(%arg0: i32) -> (i32, i32) {
    %c0_i32 = arith.constant 0 : i32
    %c0_i32_0 = arith.constant 0 : i32
    %c0_i32_1 = arith.constant 0 : i32
    return %c0_i32, %c0_i32_0 : i32, i32
  }
  func.func @transform_2(%arg0: i32) -> (i32, i32) {
    %c0_i32 = arith.constant 0 : i32
    %c0_i32_0 = arith.constant 0 : i32
    %c0_i32_1 = arith.constant 0 : i32
    return %c0_i32, %c0_i32_0 : i32, i32
  }
  func.func @transform_3(%arg0: i32) -> (i32, i32) {
    %c0_i32 = arith.constant 0 : i32
    %c0_i32_0 = arith.constant 0 : i32
    %c0_i32_1 = arith.constant 0 : i32
    return %c0_i32, %c0_i32_0 : i32, i32
  }
  func.func @transform_4(%arg0: i32) -> (i32, i32) {
    %c0_i32 = arith.constant 0 : i32
    %c0_i32_0 = arith.constant 0 : i32
    %c0_i32_1 = arith.constant 0 : i32
    return %c0_i32, %c0_i32_0 : i32, i32
  }
  func.func @transform_5(%arg0: i32) -> (i32, i32) {
    %c0_i32 = arith.constant 0 : i32
    %c0_i32_0 = arith.constant 0 : i32
    %c0_i32_1 = arith.constant 0 : i32
    return %c0_i32, %c0_i32_0 : i32, i32
  }
  func.func @transform_6(%arg0: i32) -> (i32, i32) {
    %c0_i32 = arith.constant 0 : i32
    %c0_i32_0 = arith.constant 0 : i32
    %c0_i32_1 = arith.constant 0 : i32
    return %c0_i32, %c0_i32_0 : i32, i32
  }
  func.func @transform_7(%arg0: i32) -> (i32, i32) {
    %c0_i32 = arith.constant 0 : i32
    %c0_i32_0 = arith.constant 0 : i32
    %c0_i32_1 = arith.constant 0 : i32
    return %c0_i32, %c0_i32_0 : i32, i32
  }
  func.func @transform_8(%arg0: i32) -> (i32, i32) {
    %c0_i32 = arith.constant 0 : i32
    %c0_i32_0 = arith.constant 0 : i32
    %c0_i32_1 = arith.constant 0 : i32
    return %c0_i32, %c0_i32_0 : i32, i32
  }
  func.func @transform_9(%arg0: i32) -> (i32, i32) {
    %c0_i32 = arith.constant 0 : i32
    %c0_i32_0 = arith.constant 0 : i32
    return %arg0, %c0_i32 : i32, i32
  }
}

</mosaic_0001>

<bundles_post_ra>
// kernel: conformer_encoder_layer.4
= control target key start
LH: loop header
LB: loop body
LE: loop exit
PB: predicated region body
PF: predicated region fallthrough
CT: control target
= control target key end

     0   :  { %12 = vsyncpa [#allocation3], 0  ;;  %s850_s0 = inlined_call_operand.hbm [shape: f32[16,32], index: 0, kind: input, shape index: {}]   ;;  %s851_s1 = inlined_call_operand.hbm [shape: f32[1,32], index: 1, kind: input, shape index: {}]   ;;  %s852_s2 = inlined_call_operand.hbm [shape: f32[1,32], index: 2, kind: input, shape index: {}]   ;;  %s853_s3 = inlined_call_operand.hbm [shape: bf16[32,128], index: 3, kind: input, shape index: {}]   ;;  %s854_s4 = inlined_call_operand.hbm [shape: f32[1,128], index: 4, kind: input, shape index: {}]   ;;  %s855_s5 = inlined_call_operand.hbm [shape: bf16[128,32], index: 5, kind: input, shape index: {}]   ;;  %s856_s6 = inlined_call_operand.hbm [shape: f32[1,32], index: 6, kind: input, shape index: {}]   ;;  %s857_s7 = inlined_call_operand.hbm [shape: f32[16,32], index: 7, kind: output, shape index: {}]  }
   0x1   :  { %13 = vsyncpa [#allocation6], 0 }
   0x2   :  { %14 = vsyncpa [#allocation9], 0 }
   0x3   :  { %15 = vsyncpa [#allocation12], 0 }
   0x4   :  { %16 = vsyncpa [#allocation4], 0  ;;  %s663_s24 = smov [#allocation5]   ;;  %s664_s26 = smov [#allocation8]  }
   0x5   :  { %s35_s25 = sshll.u32 %s663_s24, 4  ;;  %s54_s27 = sshll.u32 %s664_s26, 4  ;;  %s36_s25 = int_to_ptr.vmem [resolvable:$true] %s35_s25  ;;  %s717_s27 = int_to_ptr.vmem [resolvable:$true] %s54_s27 }
   0x6   :  { %s477_s30 = scalar_lea.hbm %s851_s1, 16 }
   0x7   :  { %p478_p0 = scmp.ne.s32.totalorder %s851_s1, %s477_s30  ;;  %p481_p1 = scmp.lt.u32.totalorder %s477_s30, %s851_s1 }
   0x9   :  { %p483_p2 = pnand %p481_p1, %p478_p0 }
   0xb   :  { %486 = shalt.err (!%p483_p2)
}
   0xc   :  { %s487_s12 = scalar_lea.vmem %s36_s25, 16  ;;  %s491_s13 = scalar_lea.vmem %s36_s25, 32 }
   0xd   :  { %p488_p3 = scmp.ne.s32.totalorder %s36_s25, %s487_s12  ;;  %p492_p4 = scmp.lt.s32.totalorder %s36_s25, %s36_s25 }
   0xe   :  { %p493_p5 = scmp.lt.s32.totalorder %s491_s13, %s487_s12 }
  0x10   :  { %p494_p6 = por %p493_p5, %p492_p4 }
  0x12   :  { %p495_p7 = pnand %p494_p6, %p488_p3 }
  0x14   :  { %498 = shalt.err (!%p495_p7)
}
  0x15   :  { %38 = dma.hbm_to_vmem [thread:$0]  %s851_s1, 16, %s36_s25, [#allocation6]  }
  0x16   :  { %s499_s18 = scalar_lea.hbm %s853_s3, 256 }
  0x17   :  { %p500_p8 = scmp.ne.s32.totalorder %s853_s3, %s499_s18  ;;  %p503_p9 = scmp.lt.u32.totalorder %s499_s18, %s853_s3 }
  0x19   :  { %p505_p10 = pnand %p503_p9, %p500_p8 }
  0x1b   :  { %508 = shalt.err (!%p505_p10)
}
  0x1c   :  { %s509_s23 = scalar_lea.vmem %s717_s27, 256  ;;  %p514_p12 = scmp.lt.s32.totalorder %s717_s27, %s717_s27 }
  0x1d   :  { %p510_p11 = scmp.ne.s32.totalorder %s717_s27, %s509_s23  ;;  %p515_p13 = scmp.lt.s32.totalorder %s509_s23, %s509_s23 }
  0x1f   :  { %p516_p0 = por %p515_p13, %p514_p12 }
  0x21   :  { %p517_p1 = pnand %p516_p0, %p510_p11 }
  0x23   :  { %520 = shalt.err (!%p517_p1)
}
  0x24   :  { %s665_s1 = smov 64   ;;  %s666_s24 = smov 4  }
  0x25   :  { %60 = dma.hbm_to_vmem [thread:$0]  %s853_s3, 256, %s717_s27, [#allocation9], %s665_s1, %s665_s1, %s666_s24  }
  0x26   :  { %s667_s28 = smov [#allocation11]   ;;  %s668_s30 = smov [#allocation2]  }
  0x27   :  { %s76_s29 = sshll.u32 %s667_s28, 4  ;;  %s22_s8 = sshll.u32 %s668_s30, 4  ;;  %s77_s29 = int_to_ptr.vmem [resolvable:$true] %s76_s29  ;;  %s748_s8 = int_to_ptr.vmem [resolvable:$true] %s22_s8 }
  0x28   :  { %s521_s11 = scalar_lea.hbm %s855_s5, 1024 }
  0x29   :  { %p522_p2 = scmp.ne.s32.totalorder %s855_s5, %s521_s11  ;;  %p525_p3 = scmp.lt.u32.totalorder %s521_s11, %s855_s5 }
  0x2b   :  { %p527_p4 = pnand %p525_p3, %p522_p2 }
  0x2d   :  { %530 = shalt.err (!%p527_p4)
}
  0x2e   :  { %s531_s3 = scalar_lea.vmem %s77_s29, 1024  ;;  %p536_p6 = scmp.lt.s32.totalorder %s77_s29, %s77_s29 }
  0x2f   :  { %p532_p5 = scmp.ne.s32.totalorder %s77_s29, %s531_s3  ;;  %p537_p7 = scmp.lt.s32.totalorder %s531_s3, %s531_s3 }
  0x31   :  { %p538_p8 = por %p537_p7, %p536_p6 }
  0x33   :  { %p539_p9 = pnand %p538_p8, %p532_p5 }
  0x35   :  { %542 = shalt.err (!%p539_p9)
}
  0x36   :  { %82 = dma.hbm_to_vmem [thread:$0]  %s855_s5, 1024, %s77_s29, [#allocation12], %s665_s1, %s665_s1, %s666_s24  }
  0x37   :  { %s543_s19 = scalar_lea.hbm %s850_s0, 256 }
  0x38   :  { %p544_p10 = scmp.ne.s32.totalorder %s850_s0, %s543_s19  ;;  %p547_p11 = scmp.lt.u32.totalorder %s543_s19, %s850_s0 }
  0x3a   :  { %p549_p12 = pnand %p547_p11, %p544_p10 }
  0x3c   :  { %552 = shalt.err (!%p549_p12)
}
  0x3d   :  { %s553_s25 = scalar_lea.vmem %s748_s8, 256  ;;  %p558_p0 = scmp.lt.s32.totalorder %s748_s8, %s748_s8 }
  0x3e   :  { %p554_p13 = scmp.ne.s32.totalorder %s748_s8, %s553_s25  ;;  %p559_p1 = scmp.lt.s32.totalorder %s553_s25, %s553_s25 }
  0x40   :  { %p560_p2 = por %p559_p1, %p558_p0 }
  0x42   :  { %p561_p3 = pnand %p560_p2, %p554_p13 }
  0x44   :  { %564 = shalt.err (!%p561_p3)
}
  0x45   :  { %s669_s5 = smov 128   ;;  %s670_s1 = smov 8  }
  0x46   :  { %28 = dma.hbm_to_vmem [thread:$0]  %s850_s0, 256, %s748_s8, [#allocation3], %s669_s5, %s669_s5, %s670_s1  }
  0x47   :  { %s671_s28 = smov [#allocation7]   ;;  %s672_s30 = smov [#allocation10]  }
  0x48   :  { %s45_s29 = sshll.u32 %s671_s28, 4  ;;  %s67_s9 = sshll.u32 %s672_s30, 4  ;;  %s46_s29 = int_to_ptr.vmem [resolvable:$true] %s45_s29  ;;  %s68_s9 = int_to_ptr.vmem [resolvable:$true] %s67_s9 }
  0x49   :  { %s565_s12 = scalar_lea.hbm %s852_s2, 16 }
  0x4a   :  { %p566_p4 = scmp.ne.s32.totalorder %s852_s2, %s565_s12  ;;  %p569_p5 = scmp.lt.u32.totalorder %s565_s12, %s852_s2 }
  0x4c   :  { %p571_p6 = pnand %p569_p5, %p566_p4 }
  0x4e   :  { %574 = shalt.err (!%p571_p6)
}
  0x4f   :  { %s575_s0 = scalar_lea.vmem %s46_s29, 16  ;;  %s579_s8 = scalar_lea.vmem %s46_s29, 32 }
  0x50   :  { %p576_p7 = scmp.ne.s32.totalorder %s46_s29, %s575_s0  ;;  %p580_p8 = scmp.lt.s32.totalorder %s46_s29, %s46_s29 }
  0x51   :  { %p581_p9 = scmp.lt.s32.totalorder %s579_s8, %s575_s0 }
  0x53   :  { %p582_p10 = por %p581_p9, %p580_p8 }
  0x55   :  { %p583_p11 = pnand %p582_p10, %p576_p7 }
  0x57   :  { %586 = shalt.err (!%p583_p11)
}
  0x58   :  { %48 = dma.hbm_to_vmem [thread:$0]  %s852_s2, 16, %s46_s29, [#allocation6]  }
  0x59   :  { %s587_s19 = scalar_lea.hbm %s854_s4, 16 }
  0x5a   :  { %p588_p12 = scmp.ne.s32.totalorder %s854_s4, %s587_s19  ;;  %p591_p13 = scmp.lt.u32.totalorder %s587_s19, %s854_s4 }
  0x5c   :  { %p593_p0 = pnand %p591_p13, %p588_p12 }
  0x5e   :  { %596 = shalt.err (!%p593_p0)
}
  0x5f   :  { %s597_s25 = scalar_lea.vmem %s68_s9, 16  ;;  %s601_s24 = scalar_lea.vmem %s68_s9, 32 }
  0x60   :  { %p598_p1 = scmp.ne.s32.totalorder %s68_s9, %s597_s25  ;;  %p602_p2 = scmp.lt.s32.totalorder %s68_s9, %s68_s9 }
  0x61   :  { %p603_p3 = scmp.lt.s32.totalorder %s601_s24, %s597_s25 }
  0x63   :  { %p604_p4 = por %p603_p3, %p602_p2 }
  0x65   :  { %p605_p5 = pnand %p604_p4, %p598_p1 }
  0x67   :  { %608 = shalt.err (!%p605_p5)
}
  0x68   :  { %70 = dma.hbm_to_vmem [thread:$0]  %s854_s4, 16, %s68_s9, [#allocation9]  }
  0x69   :  { %s673_s28 = smov [#allocation13]   ;;  %s609_s11 = scalar_lea.hbm %s856_s6, 16 }
  0x6a   :  { %s89_s29 = sshll.u32 %s673_s28, 4  ;;  %p610_p6 = scmp.ne.s32.totalorder %s856_s6, %s609_s11  ;;  %s90_s29 = int_to_ptr.vmem [resolvable:$true] %s89_s29 }
  0x6b   :  { %p613_p7 = scmp.lt.u32.totalorder %s609_s11, %s856_s6 }
  0x6d   :  { %p615_p8 = pnand %p613_p7, %p610_p6 }
  0x6f   :  { %618 = shalt.err (!%p615_p8)
}
  0x70   :  { %s619_s3 = scalar_lea.vmem %s90_s29, 16  ;;  %s623_s4 = scalar_lea.vmem %s90_s29, 32 }
  0x71   :  { %p620_p9 = scmp.ne.s32.totalorder %s90_s29, %s619_s3  ;;  %p624_p10 = scmp.lt.s32.totalorder %s90_s29, %s90_s29 }
  0x72   :  { %p625_p11 = scmp.lt.s32.totalorder %s623_s4, %s619_s3 }
  0x74   :  { %p626_p12 = por %p625_p11, %p624_p10 }
  0x76   :  { %p627_p13 = pnand %p626_p12, %p620_p9 }
  0x78   :  { %630 = shalt.err (!%p627_p13)
}
  0x79   :  { %92 = dma.hbm_to_vmem [thread:$0]  %s856_s6, 16, %s90_s29, [#allocation12]  }
  0x7a   :  { %653 = dma.done.wait [#allocation3], 256  }
  0x7b   :  { %654 = vsyncadd [#allocation3], 4294967040 }
  0x7c   :  { %655 = dma.done.wait [#allocation6], 32  }
  0x7d   :  { %656 = vsyncadd [#allocation6], 4294967264 }
  0x7e   :  { %657 = dma.done.wait [#allocation9], 272  }
  0x7f   :  { %658 = vsyncadd [#allocation9], 4294967024 }
  0x80   :  { %659 = dma.done.wait [#allocation12], 1040  }
  0x81   :  { %660 = vsyncadd [#allocation12], 4294966256  ;;  %vm119_vm0 = vcmask 261120   ;;  %v818_v0 = vld [vmem:[#allocation2] sm:$0xff]  ;;  %v820_v1 = vld [vmem:[#allocation2 + $0x8] sm:$0xff]  ;;  %v674_v15 = vmov 0.0  }
  0x82   :  { %v120_v2 = vsel %vm119_vm0, %v818_v0, 0.0  ;;  %v123_v3 = vsel %vm119_vm0, %v820_v1, 0.0  ;;  %v455_v14 = vld [vmem:[#allocation8] sm:$0xff]   ;;  %413 = vmatprep.subr.bf16.mxu0 %v674_v15  ;;  %421 = vmatprep.subr.bf16.mxu1 %v674_v15  ;;  %v456_v16 = vld [vmem:[#allocation8 + $0x8] sm:$0xff]   ;;  %vm675_vm1 = vmmov 0   ;;  %v457_v34 = vld [vmem:[#allocation11] sm:$0xff]  }
  0x83   :  { %121 = vadd.xlane.f32.xlu0 %v120_v2  ;;  %414 = vmatpush3.bf16.msra.mxu0 %v455_v14  ;;  %v384_v25 = vld [vmem:[#allocation5] ss:$0 sm:$0xff]  ;;  %v385_v29 = vld [vmem:[#allocation7] ss:$0 sm:$0xff]  ;;  %v459_v36 = vld [vmem:[#allocation11 + $0x10] sm:$0xff]   ;;  %v358_v61 = vmul.f32 0.5, %v818_v0 }
  0x84   :  { %417 = vmatprep.mubr.msk.bf16.mxu0 %vm675_vm1, %v674_v15  ;;  %415 = vmatprep.subr.bf16.mxu0 %v674_v15  ;;  %v458_v35 = vld [vmem:[#allocation11 + $0x8] sm:$0xff]   ;;  %v460_v37 = vld [vmem:[#allocation11 + $0x18] sm:$0xff]   ;;  %v461_v38 = vld [vmem:[#allocation11 + $0x20] sm:$0xff]   ;;  %s676_s6 = smov [#allocation14]  }
  0x85   :  { %437 = vmatprep.mubr.msk.bf16.mxu1 %vm675_vm1, %v674_v15  ;;  %422 = vmatpush3.bf16.msra.mxu1 %v457_v34  ;;  %v462_v39 = vld [vmem:[#allocation11 + $0x28] sm:$0xff]   ;;  %v463_v40 = vld [vmem:[#allocation11 + $0x30] sm:$0xff]   ;;  %v464_v41 = vld [vmem:[#allocation11 + $0x38] sm:$0xff]   ;;  %s369_s8 = sshll.u32 %s676_s6, 4  ;;  %s370_s8 = int_to_ptr.vmem [resolvable:$true] %s369_s8 }
  0x86   :  { %423 = vmatprep.subr.bf16.mxu1 %v674_v15  ;;  %v386_v42 = vld [vmem:[#allocation10] ss:$0 sm:$0xff]  ;;  %v392_v60 = vld [vmem:[#allocation13] ss:$0 sm:$0xff]  ;;  %s631_s27 = scalar_lea.vmem %s370_s8, 256  ;;  %p636_p1 = scmp.lt.s32.totalorder %s370_s8, %s370_s8 }
  0x87   :  { %124 = vadd.xlane.f32.xlu0 %v123_v3  ;;  %416 = vmatpush3.bf16.msra.mxu0 %v456_v16  ;;  %v359_v3 = vmul.f32 0.5, %v820_v1  ;;  %p632_p0 = scmp.ne.s32.totalorder %s370_s8, %s631_s27  ;;  %p637_p2 = scmp.lt.s32.totalorder %s631_s27, %s631_s27 }
  0x89   :  { %424 = vmatpush3.bf16.msra.mxu1 %v458_v35  ;;  %p638_p3 = por %p637_p2, %p636_p1 }
  0x8a   :  { %425 = vmatprep.subr.bf16.mxu1 %v674_v15 }
  0x8b   :  { %p639_p4 = pnand %p638_p3, %p632_p0 }
  0x8d   :  { %426 = vmatpush3.bf16.msra.mxu1 %v459_v36 }
  0x8e   :  { %427 = vmatprep.subr.bf16.mxu1 %v674_v15 }
  0x91   :  { %428 = vmatpush3.bf16.msra.mxu1 %v460_v37 }
  0x92   :  { %429 = vmatprep.subr.bf16.mxu1 %v674_v15 }
  0x95   :  { %430 = vmatpush3.bf16.msra.mxu1 %v461_v38 }
  0x96   :  { %431 = vmatprep.subr.bf16.mxu1 %v674_v15 }
  0x99   :  { %432 = vmatpush3.bf16.msra.mxu1 %v462_v39 }
  0x9a   :  { %433 = vmatprep.subr.bf16.mxu1 %v674_v15 }
  0x9d   :  { %434 = vmatpush3.bf16.msra.mxu1 %v463_v40 }
  0x9e   :  { %435 = vmatprep.subr.bf16.mxu1 %v674_v15 }
  0xa1   :  { %436 = vmatpush3.bf16.msra.mxu1 %v464_v41 }
 0x110   :  { %v122_v4 = vpop.xlane.xlu0 %121 }
 0x111   :  { %v127_v5 = vmul.f32 0.03125, %v122_v4 }
 0x113   :  { %v129_v6 = vsub.f32 %v818_v0, %v127_v5 }
 0x114   :  { %v125_v7 = vpop.xlane.xlu0 %124 }
 0x115   :  { %v128_v8 = vmul.f32 0.03125, %v125_v7  ;;  %v131_v9 = vmul.f32 %v129_v6, %v129_v6 }
 0x117   :  { %v130_v10 = vsub.f32 %v820_v1, %v128_v8  ;;  %v133_v11 = vsel %vm119_vm0, %v131_v9, 0.0 }
 0x118   :  { %134 = vadd.xlane.f32.xlu1 %v133_v11 }
 0x119   :  { %v132_v12 = vmul.f32 %v130_v10, %v130_v10 }
 0x11b   :  { %v136_v13 = vsel %vm119_vm0, %v132_v12, 0.0 }
 0x11c   :  { %137 = vadd.xlane.f32.xlu1 %v136_v13 }
 0x1a5   :  { %v135_v17 = vpop.xlane.xlu1 %134 }
 0x1a6   :  { %v139_v18 = vmul.f32 0.03125, %v135_v17 }
 0x1a8   :  { %v141_v19 = vadd.f32 1e-05, %v139_v18 }
 0x1a9   :  { %v138_v20 = vpop.xlane.xlu1 %137 }
 0x1aa   :  { %465 = vrsqrt.f32 %v141_v19  ;;  %v140_v21 = vmul.f32 0.03125, %v138_v20 }
 0x1ac   :  { %v142_v22 = vadd.f32 1e-05, %v140_v21 }
 0x1ae   :  { %467 = vrsqrt.f32 %v142_v22 }
 0x1b4   :  { %v466_v23 = vpop.eup %465 }
 0x1b5   :  { %v145_v24 = vmul.f32 %v466_v23, %v129_v6 }
 0x1b7   :  { %v153_v28 = vmul.f32 %v384_v25, %v145_v24 }
 0x1b8   :  { %v468_v26 = vpop.eup %467 }
 0x1b9   :  { %v146_v27 = vmul.f32 %v468_v26, %v130_v10  ;;  %v161_v31 = vadd.f32 %v385_v29, %v153_v28 }
 0x1bb   :  { %v154_v30 = vmul.f32 %v384_v25, %v146_v27 }
 0x1bd   :  { %v162_v32 = vadd.f32 %v385_v29, %v154_v30 }
 0x1bf   :  { %v163_v33 = vpack.c.bf16 %v162_v32, %v161_v31 }
 0x1c1   :  { %418 = vmatmul.mubr.msk.bf16.vlgmr.msra.gmra.mrb[0].mxu0 %vm119_vm0, %v163_v33 }
 0x294   :  { %v224_v43 = vpop.f32.mrb[0].mxu0 }
 0x295   :  { %v225_v44 = vadd.f32 %v386_v42, %v224_v43  ;;  %v419_v45 = vpop.f32.mrb[1].mxu0 }
 0x296   :  { %v227_v46 = vpop.f32.mrb[2].mxu0 }
 0x297   :  { %v390_v47 = vmul.f32 -1.442695, %v225_v44  ;;  %v228_v48 = vadd.f32 %v386_v42, %v227_v46  ;;  %v420_v49 = vpop.f32.mrb[3].mxu0 }
 0x299   :  { %469 = vpow2.f32 %v390_v47  ;;  %v391_v50 = vmul.f32 -1.442695, %v228_v48 }
 0x29b   :  { %471 = vpow2.f32 %v391_v50 }
 0x2a3   :  { %v470_v51 = vpop.eup %469 }
 0x2a4   :  { %v237_v52 = vadd.f32 1.0, %v470_v51 }
 0x2a5   :  { %v472_v53 = vpop.eup %471 }
 0x2a6   :  { %473 = vrcp.f32 %v237_v52  ;;  %v238_v54 = vadd.f32 1.0, %v472_v53 }
 0x2a8   :  { %475 = vrcp.f32 %v238_v54 }
 0x2b0   :  { %v474_v55 = vpop.eup %473 }
 0x2b1   :  { %v243_v57 = vmul.f32 %v474_v55, %v225_v44 }
 0x2b2   :  { %v476_v56 = vpop.eup %475 }
 0x2b3   :  { %v244_v58 = vmul.f32 %v476_v56, %v228_v48 }
 0x2b5   :  { %v245_v59 = vpack.c.bf16 %v244_v58, %v243_v57 }
 0x2b7   :  { %438 = vmatmul.mubr.bf16.vlgmr.msra.gmra.mrb[0].mxu1 %v245_v59 }
 0x38a   :  { %v351_v62 = vpop.f32.mrb[0].mxu1 }
 0x38b   :  { %v352_v63 = vadd.f32 %v392_v60, %v351_v62  ;;  %v439_v2 = vpop.f32.mrb[1].mxu1 }
 0x38c   :  { %v354_v4 = vpop.f32.mrb[2].mxu1 }
 0x38d   :  { %v360_v5 = vadd.f32 %v358_v61, %v352_v63  ;;  %v355_v6 = vadd.f32 %v392_v60, %v354_v4  ;;  %v440_v7 = vpop.f32.mrb[3].mxu1 }
 0x38f   :  { %362 = vst.msk [vmem:[#allocation14] sm:$0xff] %vm119_vm0, %v360_v5  ;;  %v361_v8 = vadd.f32 %v359_v3, %v355_v6 }
 0x391   :  { %363 = vst.msk [vmem:[#allocation14 + $0x8] sm:$0xff] %vm119_vm0, %v361_v8 }
 0x392   :  { %642 = shalt.err (!%p639_p4)
}
 0x393   :  { %s643_s18 = scalar_lea.hbm %s857_s7, 256 }
 0x394   :  { %p644_p5 = scmp.ne.s32.totalorder %s857_s7, %s643_s18  ;;  %p647_p6 = scmp.lt.u32.totalorder %s643_s18, %s857_s7 }
 0x396   :  { %p649_p7 = pnand %p647_p6, %p644_p5 }
 0x398   :  { %652 = shalt.err (!%p649_p7)
}
 0x399   :  { %375 = dma.vmem_to_hbm [thread:$0]  %s370_s8, 256, %s857_s7, [#allocation4], %s669_s5, %s669_s5, %s670_s1  }
 0x39a   :  { %661 = dma.done.wait [#allocation4], 256  }
 0x39b   :  { %662 = vsyncadd [#allocation4], 4294967040 }
 0x39c   :  { %379 = vsyncpa [#allocation3], 1 }
 0x39d   :  { %380 = vsyncpa [#allocation6], 1 }
 0x39e   :  { %381 = vsyncpa [#allocation9], 1 }
 0x39f   :  { %382 = vsyncpa [#allocation12], 1 }
 0x3a0   :  { %383 = vsyncpa [#allocation4], 1 }

// kernel: conformer_encoder_layer.7
= control target key start
LH: loop header
LB: loop body
LE: loop exit
PB: predicated region body
PF: predicated region fallthrough
CT: control target
= control target key end

     0   :  { %14 = vsyncpa [#allocation3], 0  ;;  %s1011_s0 = inlined_call_operand.hbm [shape: f32[16,32], index: 0, kind: input, shape index: {}]   ;;  %s1012_s1 = inlined_call_operand.hbm [shape: f32[1,32], index: 1, kind: input, shape index: {}]   ;;  %s1013_s2 = inlined_call_operand.hbm [shape: f32[1,32], index: 2, kind: input, shape index: {}]   ;;  %s1014_s3 = inlined_call_operand.hbm [shape: bf16[32,128], index: 3, kind: input, shape index: {}]   ;;  %s1015_s4 = inlined_call_operand.hbm [shape: f32[1,128], index: 4, kind: input, shape index: {}]   ;;  %s1016_s5 = inlined_call_operand.hbm [shape: bf16[128,32], index: 5, kind: input, shape index: {}]   ;;  %s1017_s6 = inlined_call_operand.hbm [shape: f32[1,32], index: 6, kind: input, shape index: {}]   ;;  %s1018_s7 = inlined_call_operand.hbm [shape: f32[1,32], index: 7, kind: input, shape index: {}]   ;;  %s1019_s8 = inlined_call_operand.hbm [shape: f32[1,32], index: 8, kind: input, shape index: {}]   ;;  %s1020_s9 = inlined_call_operand.hbm [shape: f32[16,32], index: 9, kind: output, shape index: {}]  }
   0x1   :  { %15 = vsyncpa [#allocation6], 0 }
   0x2   :  { %16 = vsyncpa [#allocation9], 0 }
   0x3   :  { %17 = vsyncpa [#allocation12], 0 }
   0x4   :  { %18 = vsyncpa [#allocation15], 0 }
   0x5   :  { %19 = vsyncpa [#allocation4], 0  ;;  %s791_s30 = smov [#allocation5]   ;;  %s792_s11 = smov [#allocation8]  }
   0x6   :  { %s38_s10 = sshll.u32 %s791_s30, 4  ;;  %s57_s12 = sshll.u32 %s792_s11, 4  ;;  %s39_s10 = int_to_ptr.vmem [resolvable:$true] %s38_s10  ;;  %s857_s12 = int_to_ptr.vmem [resolvable:$true] %s57_s12 }
   0x7   :  { %s559_s15 = scalar_lea.hbm %s1012_s1, 16 }
   0x8   :  { %p560_p0 = scmp.ne.s32.totalorder %s1012_s1, %s559_s15  ;;  %p563_p1 = scmp.lt.u32.totalorder %s559_s15, %s1012_s1 }
   0xa   :  { %p565_p2 = pnand %p563_p1, %p560_p0 }
   0xc   :  { %568 = shalt.err (!%p565_p2)
}
   0xd   :  { %s569_s20 = scalar_lea.vmem %s39_s10, 16  ;;  %s573_s21 = scalar_lea.vmem %s39_s10, 32 }
   0xe   :  { %p570_p3 = scmp.ne.s32.totalorder %s39_s10, %s569_s20  ;;  %p574_p4 = scmp.lt.s32.totalorder %s39_s10, %s39_s10 }
   0xf   :  { %p575_p5 = scmp.lt.s32.totalorder %s573_s21, %s569_s20 }
  0x11   :  { %p576_p6 = por %p575_p5, %p574_p4 }
  0x13   :  { %p577_p7 = pnand %p576_p6, %p570_p3 }
  0x15   :  { %580 = shalt.err (!%p577_p7)
}
  0x16   :  { %41 = dma.hbm_to_vmem [thread:$0]  %s1012_s1, 16, %s39_s10, [#allocation6]  }
  0x17   :  { %s581_s26 = scalar_lea.hbm %s1014_s3, 256 }
  0x18   :  { %p582_p8 = scmp.ne.s32.totalorder %s1014_s3, %s581_s26  ;;  %p585_p9 = scmp.lt.u32.totalorder %s581_s26, %s1014_s3 }
  0x1a   :  { %p587_p10 = pnand %p585_p9, %p582_p8 }
  0x1c   :  { %590 = shalt.err (!%p587_p10)
}
  0x1d   :  { %s591_s11 = scalar_lea.vmem %s857_s12, 256  ;;  %p596_p12 = scmp.lt.s32.totalorder %s857_s12, %s857_s12 }
  0x1e   :  { %p592_p11 = scmp.ne.s32.totalorder %s857_s12, %s591_s11  ;;  %p597_p13 = scmp.lt.s32.totalorder %s591_s11, %s591_s11 }
  0x20   :  { %p598_p0 = por %p597_p13, %p596_p12 }
  0x22   :  { %p599_p1 = pnand %p598_p0, %p592_p11 }
  0x24   :  { %602 = shalt.err (!%p599_p1)
}
  0x25   :  { %s793_s1 = smov 64   ;;  %s794_s10 = smov 4  }
  0x26   :  { %63 = dma.hbm_to_vmem [thread:$0]  %s1014_s3, 256, %s857_s12, [#allocation9], %s793_s1, %s793_s1, %s794_s10  }
  0x27   :  { %s795_s15 = smov [#allocation11]   ;;  %s796_s17 = smov [#allocation14]  }
  0x28   :  { %s79_s16 = sshll.u32 %s795_s15, 4  ;;  %s102_s18 = sshll.u32 %s796_s17, 4  ;;  %s80_s16 = int_to_ptr.vmem [resolvable:$true] %s79_s16  ;;  %s103_s18 = int_to_ptr.vmem [resolvable:$true] %s102_s18 }
  0x29   :  { %s603_s21 = scalar_lea.hbm %s1016_s5, 1024 }
  0x2a   :  { %p604_p2 = scmp.ne.s32.totalorder %s1016_s5, %s603_s21  ;;  %p607_p3 = scmp.lt.u32.totalorder %s603_s21, %s1016_s5 }
  0x2c   :  { %p609_p4 = pnand %p607_p3, %p604_p2 }
  0x2e   :  { %612 = shalt.err (!%p609_p4)
}
  0x2f   :  { %s613_s3 = scalar_lea.vmem %s80_s16, 1024  ;;  %p618_p6 = scmp.lt.s32.totalorder %s80_s16, %s80_s16 }
  0x30   :  { %p614_p5 = scmp.ne.s32.totalorder %s80_s16, %s613_s3  ;;  %p619_p7 = scmp.lt.s32.totalorder %s613_s3, %s613_s3 }
  0x32   :  { %p620_p8 = por %p619_p7, %p618_p6 }
  0x34   :  { %p621_p9 = pnand %p620_p8, %p614_p5 }
  0x36   :  { %624 = shalt.err (!%p621_p9)
}
  0x37   :  { %85 = dma.hbm_to_vmem [thread:$0]  %s1016_s5, 1024, %s80_s16, [#allocation12], %s793_s1, %s793_s1, %s794_s10  }
  0x38   :  { %s625_s29 = scalar_lea.hbm %s1018_s7, 16 }
  0x39   :  { %p626_p10 = scmp.ne.s32.totalorder %s1018_s7, %s625_s29  ;;  %p629_p11 = scmp.lt.u32.totalorder %s625_s29, %s1018_s7 }
  0x3b   :  { %p631_p12 = pnand %p629_p11, %p626_p10 }
  0x3d   :  { %634 = shalt.err (!%p631_p12)
}
  0x3e   :  { %s635_s15 = scalar_lea.vmem %s103_s18, 16  ;;  %s639_s17 = scalar_lea.vmem %s103_s18, 32 }
  0x3f   :  { %p636_p13 = scmp.ne.s32.totalorder %s103_s18, %s635_s15  ;;  %p640_p0 = scmp.lt.s32.totalorder %s103_s18, %s103_s18 }
  0x40   :  { %p641_p1 = scmp.lt.s32.totalorder %s639_s17, %s635_s15 }
  0x42   :  { %p642_p2 = por %p641_p1, %p640_p0 }
  0x44   :  { %p643_p3 = pnand %p642_p2, %p636_p13 }
  0x46   :  { %646 = shalt.err (!%p643_p3)
}
  0x47   :  { %105 = dma.hbm_to_vmem [thread:$0]  %s1018_s7, 16, %s103_s18, [#allocation15]  }
  0x48   :  { %s797_s10 = smov [#allocation2]   ;;  %s647_s21 = scalar_lea.hbm %s1011_s0, 256 }
  0x49   :  { %s25_s16 = sshll.u32 %s797_s10, 4  ;;  %p648_p4 = scmp.ne.s32.totalorder %s1011_s0, %s647_s21  ;;  %s26_s16 = int_to_ptr.vmem [resolvable:$true] %s25_s16 }
  0x4a   :  { %p651_p5 = scmp.lt.u32.totalorder %s647_s21, %s1011_s0 }
  0x4c   :  { %p653_p6 = pnand %p651_p5, %p648_p4 }
  0x4e   :  { %656 = shalt.err (!%p653_p6)
}
  0x4f   :  { %s657_s3 = scalar_lea.vmem %s26_s16, 256  ;;  %p662_p8 = scmp.lt.s32.totalorder %s26_s16, %s26_s16 }
  0x50   :  { %p658_p7 = scmp.ne.s32.totalorder %s26_s16, %s657_s3  ;;  %p663_p9 = scmp.lt.s32.totalorder %s657_s3, %s657_s3 }
  0x52   :  { %p664_p10 = por %p663_p9, %p662_p8 }
  0x54   :  { %p665_p11 = pnand %p664_p10, %p658_p7 }
  0x56   :  { %668 = shalt.err (!%p665_p11)
}
  0x57   :  { %s798_s7 = smov 128   ;;  %s799_s18 = smov 8  }
  0x58   :  { %31 = dma.hbm_to_vmem [thread:$0]  %s1011_s0, 256, %s26_s16, [#allocation3], %s798_s7, %s798_s7, %s799_s18  }
  0x59   :  { %s800_s27 = smov [#allocation7]   ;;  %s801_s29 = smov [#allocation10]  }
  0x5a   :  { %s48_s28 = sshll.u32 %s800_s27, 4  ;;  %s70_s30 = sshll.u32 %s801_s29, 4  ;;  %s49_s28 = int_to_ptr.vmem [resolvable:$true] %s48_s28  ;;  %s71_s30 = int_to_ptr.vmem [resolvable:$true] %s70_s30 }
  0x5b   :  { %s669_s14 = scalar_lea.hbm %s1013_s2, 16 }
  0x5c   :  { %p670_p12 = scmp.ne.s32.totalorder %s1013_s2, %s669_s14  ;;  %p673_p13 = scmp.lt.u32.totalorder %s669_s14, %s1013_s2 }
  0x5e   :  { %p675_p0 = pnand %p673_p13, %p670_p12 }
  0x60   :  { %678 = shalt.err (!%p675_p0)
}
  0x61   :  { %s679_s0 = scalar_lea.vmem %s49_s28, 16  ;;  %s683_s10 = scalar_lea.vmem %s49_s28, 32 }
  0x62   :  { %p680_p1 = scmp.ne.s32.totalorder %s49_s28, %s679_s0  ;;  %p684_p2 = scmp.lt.s32.totalorder %s49_s28, %s49_s28 }
  0x63   :  { %p685_p3 = scmp.lt.s32.totalorder %s683_s10, %s679_s0 }
  0x65   :  { %p686_p4 = por %p685_p3, %p684_p2 }
  0x67   :  { %p687_p5 = pnand %p686_p4, %p680_p1 }
  0x69   :  { %690 = shalt.err (!%p687_p5)
}
  0x6a   :  { %51 = dma.hbm_to_vmem [thread:$0]  %s1013_s2, 16, %s49_s28, [#allocation6]  }
  0x6b   :  { %s691_s22 = scalar_lea.hbm %s1015_s4, 16 }
  0x6c   :  { %p692_p6 = scmp.ne.s32.totalorder %s1015_s4, %s691_s22  ;;  %p695_p7 = scmp.lt.u32.totalorder %s691_s22, %s1015_s4 }
  0x6e   :  { %p697_p8 = pnand %p695_p7, %p692_p6 }
  0x70   :  { %700 = shalt.err (!%p697_p8)
}
  0x71   :  { %s701_s12 = scalar_lea.vmem %s71_s30, 16  ;;  %s705_s26 = scalar_lea.vmem %s71_s30, 32 }
  0x72   :  { %p702_p9 = scmp.ne.s32.totalorder %s71_s30, %s701_s12  ;;  %p706_p10 = scmp.lt.s32.totalorder %s71_s30, %s71_s30 }
  0x73   :  { %p707_p11 = scmp.lt.s32.totalorder %s705_s26, %s701_s12 }
  0x75   :  { %p708_p12 = por %p707_p11, %p706_p10 }
  0x77   :  { %p709_p13 = pnand %p708_p12, %p702_p9 }
  0x79   :  { %712 = shalt.err (!%p709_p13)
}
  0x7a   :  { %73 = dma.hbm_to_vmem [thread:$0]  %s1015_s4, 16, %s71_s30, [#allocation9]  }
  0x7b   :  { %s802_s28 = smov [#allocation13]   ;;  %s803_s11 = smov [#allocation16]  }
  0x7c   :  { %s92_s29 = sshll.u32 %s802_s28, 4  ;;  %s112_s13 = sshll.u32 %s803_s11, 4  ;;  %s93_s29 = int_to_ptr.vmem [resolvable:$true] %s92_s29  ;;  %s113_s13 = int_to_ptr.vmem [resolvable:$true] %s112_s13 }
  0x7d   :  { %s713_s17 = scalar_lea.hbm %s1017_s6, 16 }
  0x7e   :  { %p714_p0 = scmp.ne.s32.totalorder %s1017_s6, %s713_s17  ;;  %p717_p1 = scmp.lt.u32.totalorder %s713_s17, %s1017_s6 }
  0x80   :  { %p719_p2 = pnand %p717_p1, %p714_p0 }
  0x82   :  { %722 = shalt.err (!%p719_p2)
}
  0x83   :  { %s723_s4 = scalar_lea.vmem %s93_s29, 16  ;;  %s727_s30 = scalar_lea.vmem %s93_s29, 32 }
  0x84   :  { %p724_p3 = scmp.ne.s32.totalorder %s93_s29, %s723_s4  ;;  %p728_p4 = scmp.lt.s32.totalorder %s93_s29, %s93_s29 }
  0x85   :  { %p729_p5 = scmp.lt.s32.totalorder %s727_s30, %s723_s4 }
  0x87   :  { %p730_p6 = por %p729_p5, %p728_p4 }
  0x89   :  { %p731_p7 = pnand %p730_p6, %p724_p3 }
  0x8b   :  { %734 = shalt.err (!%p731_p7)
}
  0x8c   :  { %95 = dma.hbm_to_vmem [thread:$0]  %s1017_s6, 16, %s93_s29, [#allocation12]  }
  0x8d   :  { %s735_s22 = scalar_lea.hbm %s1019_s8, 16 }
  0x8e   :  { %p736_p8 = scmp.ne.s32.totalorder %s1019_s8, %s735_s22  ;;  %p739_p9 = scmp.lt.u32.totalorder %s735_s22, %s1019_s8 }
  0x90   :  { %p741_p10 = pnand %p739_p9, %p736_p8 }
  0x92   :  { %744 = shalt.err (!%p741_p10)
}
  0x93   :  { %s745_s12 = scalar_lea.vmem %s113_s13, 16  ;;  %s749_s26 = scalar_lea.vmem %s113_s13, 32 }
  0x94   :  { %p746_p11 = scmp.ne.s32.totalorder %s113_s13, %s745_s12  ;;  %p750_p12 = scmp.lt.s32.totalorder %s113_s13, %s113_s13 }
  0x95   :  { %p751_p13 = scmp.lt.s32.totalorder %s749_s26, %s745_s12 }
  0x97   :  { %p752_p0 = por %p751_p13, %p750_p12 }
  0x99   :  { %p753_p1 = pnand %p752_p0, %p746_p11 }
  0x9b   :  { %756 = shalt.err (!%p753_p1)
}
  0x9c   :  { %115 = dma.hbm_to_vmem [thread:$0]  %s1019_s8, 16, %s113_s13, [#allocation15]  }
  0x9d   :  { %779 = dma.done.wait [#allocation3], 256  }
  0x9e   :  { %780 = vsyncadd [#allocation3], 4294967040 }
  0x9f   :  { %781 = dma.done.wait [#allocation6], 32  }
  0xa0   :  { %782 = vsyncadd [#allocation6], 4294967264 }
  0xa1   :  { %783 = dma.done.wait [#allocation9], 272  }
  0xa2   :  { %784 = vsyncadd [#allocation9], 4294967024 }
  0xa3   :  { %785 = dma.done.wait [#allocation12], 1040  }
  0xa4   :  { %786 = vsyncadd [#allocation12], 4294966256 }
  0xa5   :  { %787 = dma.done.wait [#allocation15], 32  }
  0xa6   :  { %788 = vsyncadd [#allocation15], 4294967264  ;;  %vm148_vm0 = vcmask 261120   ;;  %v975_v0 = vld [vmem:[#allocation2] sm:$0xff]  ;;  %v977_v1 = vld [vmem:[#allocation2 + $0x8] sm:$0xff]  ;;  %v804_v15 = vmov 0.0  }
  0xa7   :  { %v149_v2 = vsel %vm148_vm0, %v975_v0, 0.0  ;;  %v152_v3 = vsel %vm148_vm0, %v977_v1, 0.0  ;;  %v533_v14 = vld [vmem:[#allocation8] sm:$0xff]   ;;  %489 = vmatprep.subr.bf16.mxu0 %v804_v15  ;;  %497 = vmatprep.subr.bf16.mxu1 %v804_v15  ;;  %v534_v16 = vld [vmem:[#allocation8 + $0x8] sm:$0xff]   ;;  %vm805_vm1 = vmmov 0   ;;  %v535_v34 = vld [vmem:[#allocation11] sm:$0xff]  }
  0xa8   :  { %150 = vadd.xlane.f32.xlu0 %v149_v2  ;;  %490 = vmatpush3.bf16.msra.mxu0 %v533_v14  ;;  %v458_v25 = vld [vmem:[#allocation5] ss:$0 sm:$0xff]  ;;  %v459_v29 = vld [vmem:[#allocation7] ss:$0 sm:$0xff]  ;;  %v537_v36 = vld [vmem:[#allocation11 + $0x10] sm:$0xff]   ;;  %v387_v61 = vmul.f32 0.5, %v975_v0 }
  0xa9   :  { %493 = vmatprep.mubr.msk.bf16.mxu0 %vm805_vm1, %v804_v15  ;;  %491 = vmatprep.subr.bf16.mxu0 %v804_v15  ;;  %v536_v35 = vld [vmem:[#allocation11 + $0x8] sm:$0xff]   ;;  %v538_v37 = vld [vmem:[#allocation11 + $0x18] sm:$0xff]   ;;  %v539_v38 = vld [vmem:[#allocation11 + $0x20] sm:$0xff]   ;;  %s806_s8 = smov [#allocation17]  }
  0xaa   :  { %513 = vmatprep.mubr.msk.bf16.mxu1 %vm805_vm1, %v804_v15  ;;  %498 = vmatpush3.bf16.msra.mxu1 %v535_v34  ;;  %v540_v39 = vld [vmem:[#allocation11 + $0x28] sm:$0xff]   ;;  %v541_v40 = vld [vmem:[#allocation11 + $0x30] sm:$0xff]   ;;  %v542_v41 = vld [vmem:[#allocation11 + $0x38] sm:$0xff]   ;;  %s442_s27 = sshll.u32 %s806_s8, 4  ;;  %s443_s27 = int_to_ptr.vmem [resolvable:$true] %s442_s27 }
  0xab   :  { %499 = vmatprep.subr.bf16.mxu1 %v804_v15  ;;  %v460_v42 = vld [vmem:[#allocation10] ss:$0 sm:$0xff]  ;;  %v466_v60 = vld [vmem:[#allocation13] ss:$0 sm:$0xff]  ;;  %s757_s28 = scalar_lea.vmem %s443_s27, 256  ;;  %p762_p3 = scmp.lt.s32.totalorder %s443_s27, %s443_s27 }
  0xac   :  { %153 = vadd.xlane.f32.xlu0 %v152_v3  ;;  %492 = vmatpush3.bf16.msra.mxu0 %v534_v16  ;;  %v388_v3 = vmul.f32 0.5, %v977_v1  ;;  %p758_p2 = scmp.ne.s32.totalorder %s443_s27, %s757_s28  ;;  %p763_p4 = scmp.lt.s32.totalorder %s757_s28, %s757_s28 }
  0xae   :  { %500 = vmatpush3.bf16.msra.mxu1 %v536_v35  ;;  %p764_p5 = por %p763_p4, %p762_p3 }
  0xaf   :  { %501 = vmatprep.subr.bf16.mxu1 %v804_v15 }
  0xb0   :  { %p765_p6 = pnand %p764_p5, %p758_p2 }
  0xb2   :  { %502 = vmatpush3.bf16.msra.mxu1 %v537_v36 }
  0xb3   :  { %503 = vmatprep.subr.bf16.mxu1 %v804_v15 }
  0xb6   :  { %504 = vmatpush3.bf16.msra.mxu1 %v538_v37 }
  0xb7   :  { %505 = vmatprep.subr.bf16.mxu1 %v804_v15 }
  0xba   :  { %506 = vmatpush3.bf16.msra.mxu1 %v539_v38 }
  0xbb   :  { %507 = vmatprep.subr.bf16.mxu1 %v804_v15 }
  0xbe   :  { %508 = vmatpush3.bf16.msra.mxu1 %v540_v39 }
  0xbf   :  { %509 = vmatprep.subr.bf16.mxu1 %v804_v15 }
  0xc2   :  { %510 = vmatpush3.bf16.msra.mxu1 %v541_v40 }
  0xc3   :  { %511 = vmatprep.subr.bf16.mxu1 %v804_v15 }
  0xc6   :  { %512 = vmatpush3.bf16.msra.mxu1 %v542_v41 }
 0x135   :  { %v151_v4 = vpop.xlane.xlu0 %150 }
 0x136   :  { %v156_v5 = vmul.f32 0.03125, %v151_v4 }
 0x138   :  { %v158_v6 = vsub.f32 %v975_v0, %v156_v5 }
 0x139   :  { %v154_v7 = vpop.xlane.xlu0 %153 }
 0x13a   :  { %v157_v8 = vmul.f32 0.03125, %v154_v7  ;;  %v160_v9 = vmul.f32 %v158_v6, %v158_v6 }
 0x13c   :  { %v159_v10 = vsub.f32 %v977_v1, %v157_v8  ;;  %v162_v11 = vsel %vm148_vm0, %v160_v9, 0.0 }
 0x13d   :  { %163 = vadd.xlane.f32.xlu1 %v162_v11 }
 0x13e   :  { %v161_v12 = vmul.f32 %v159_v10, %v159_v10 }
 0x140   :  { %v165_v13 = vsel %vm148_vm0, %v161_v12, 0.0 }
 0x141   :  { %166 = vadd.xlane.f32.xlu1 %v165_v13 }
 0x1ca   :  { %v164_v17 = vpop.xlane.xlu1 %163 }
 0x1cb   :  { %v168_v18 = vmul.f32 0.03125, %v164_v17 }
 0x1cd   :  { %v170_v19 = vadd.f32 1e-05, %v168_v18 }
 0x1ce   :  { %v167_v20 = vpop.xlane.xlu1 %166 }
 0x1cf   :  { %543 = vrsqrt.f32 %v170_v19  ;;  %v169_v21 = vmul.f32 0.03125, %v167_v20 }
 0x1d1   :  { %v171_v22 = vadd.f32 1e-05, %v169_v21 }
 0x1d3   :  { %545 = vrsqrt.f32 %v171_v22 }
 0x1d9   :  { %v544_v23 = vpop.eup %543 }
 0x1da   :  { %v174_v24 = vmul.f32 %v544_v23, %v158_v6 }
 0x1dc   :  { %v182_v28 = vmul.f32 %v458_v25, %v174_v24 }
 0x1dd   :  { %v546_v26 = vpop.eup %545 }
 0x1de   :  { %v175_v27 = vmul.f32 %v546_v26, %v159_v10  ;;  %v190_v31 = vadd.f32 %v459_v29, %v182_v28  ;;  %v475_v26 = vld [vmem:[#allocation14] ss:$0 sm:$0xff] }
 0x1e0   :  { %v183_v30 = vmul.f32 %v458_v25, %v175_v27 }
 0x1e2   :  { %v191_v32 = vadd.f32 %v459_v29, %v183_v30  ;;  %v476_v29 = vld [vmem:[#allocation16] ss:$0 sm:$0xff] }
 0x1e4   :  { %v192_v33 = vpack.c.bf16 %v191_v32, %v190_v31 }
 0x1e6   :  { %494 = vmatmul.mubr.msk.bf16.vlgmr.msra.gmra.mrb[0].mxu0 %vm148_vm0, %v192_v33 }
 0x2b9   :  { %v253_v43 = vpop.f32.mrb[0].mxu0 }
 0x2ba   :  { %v254_v44 = vadd.f32 %v460_v42, %v253_v43  ;;  %v495_v45 = vpop.f32.mrb[1].mxu0 }
 0x2bb   :  { %v256_v46 = vpop.f32.mrb[2].mxu0 }
 0x2bc   :  { %v464_v47 = vmul.f32 -1.442695, %v254_v44  ;;  %v257_v48 = vadd.f32 %v460_v42, %v256_v46  ;;  %v496_v49 = vpop.f32.mrb[3].mxu0 }
 0x2be   :  { %547 = vpow2.f32 %v464_v47  ;;  %v465_v50 = vmul.f32 -1.442695, %v257_v48 }
 0x2c0   :  { %549 = vpow2.f32 %v465_v50 }
 0x2c8   :  { %v548_v51 = vpop.eup %547 }
 0x2c9   :  { %v266_v52 = vadd.f32 1.0, %v548_v51 }
 0x2ca   :  { %v550_v53 = vpop.eup %549 }
 0x2cb   :  { %551 = vrcp.f32 %v266_v52  ;;  %v267_v54 = vadd.f32 1.0, %v550_v53 }
 0x2cd   :  { %553 = vrcp.f32 %v267_v54 }
 0x2d5   :  { %v552_v55 = vpop.eup %551 }
 0x2d6   :  { %v272_v57 = vmul.f32 %v552_v55, %v254_v44 }
 0x2d7   :  { %v554_v56 = vpop.eup %553 }
 0x2d8   :  { %v273_v58 = vmul.f32 %v554_v56, %v257_v48 }
 0x2da   :  { %v274_v59 = vpack.c.bf16 %v273_v58, %v272_v57 }
 0x2dc   :  { %514 = vmatmul.mubr.bf16.vlgmr.msra.gmra.mrb[0].mxu1 %v274_v59 }
 0x3af   :  { %v380_v62 = vpop.f32.mrb[0].mxu1 }
 0x3b0   :  { %v381_v63 = vadd.f32 %v466_v60, %v380_v62  ;;  %v515_v2 = vpop.f32.mrb[1].mxu1 }
 0x3b1   :  { %v383_v4 = vpop.f32.mrb[2].mxu1 }
 0x3b2   :  { %v384_v5 = vadd.f32 %v466_v60, %v383_v4  ;;  %v516_v6 = vpop.f32.mrb[3].mxu1  ;;  %v389_v7 = vadd.f32 %v387_v61, %v381_v63 }
 0x3b4   :  { %v393_v8 = vsel %vm148_vm0, %v389_v7, 0.0  ;;  %v390_v9 = vadd.f32 %v388_v3, %v384_v5 }
 0x3b5   :  { %394 = vadd.xlane.f32.xlu0 %v393_v8 }
 0x3b6   :  { %v396_v10 = vsel %vm148_vm0, %v390_v9, 0.0 }
 0x3b7   :  { %397 = vadd.xlane.f32.xlu1 %v396_v10 }
 0x442   :  { %v395_v11 = vpop.xlane.xlu0 %394 }
 0x443   :  { %v399_v12 = vmul.f32 0.03125, %v395_v11 }
 0x444   :  { %v398_v13 = vpop.xlane.xlu1 %397 }
 0x445   :  { %v401_v0 = vsub.f32 %v389_v7, %v399_v12  ;;  %v400_v14 = vmul.f32 0.03125, %v398_v13 }
 0x447   :  { %v402_v15 = vsub.f32 %v390_v9, %v400_v14  ;;  %v403_v16 = vmul.f32 %v401_v0, %v401_v0 }
 0x449   :  { %v405_v1 = vsel %vm148_vm0, %v403_v16, 0.0  ;;  %v404_v17 = vmul.f32 %v402_v15, %v402_v15 }
 0x44a   :  { %406 = vadd.xlane.f32.xlu0 %v405_v1 }
 0x44b   :  { %v408_v18 = vsel %vm148_vm0, %v404_v17, 0.0 }
 0x44c   :  { %409 = vadd.xlane.f32.xlu1 %v408_v18 }
 0x4d7   :  { %v407_v19 = vpop.xlane.xlu0 %406 }
 0x4d8   :  { %v411_v20 = vmul.f32 0.03125, %v407_v19 }
 0x4d9   :  { %v410_v21 = vpop.xlane.xlu1 %409 }
 0x4da   :  { %v413_v22 = vadd.f32 1e-05, %v411_v20  ;;  %v412_v23 = vmul.f32 0.03125, %v410_v21 }
 0x4dc   :  { %555 = vrsqrt.f32 %v413_v22  ;;  %v414_v24 = vadd.f32 1e-05, %v412_v23 }
 0x4de   :  { %557 = vrsqrt.f32 %v414_v24 }
 0x4e6   :  { %v556_v25 = vpop.eup %555 }
 0x4e7   :  { %v417_v27 = vmul.f32 %v556_v25, %v401_v0 }
 0x4e8   :  { %v558_v28 = vpop.eup %557 }
 0x4e9   :  { %v418_v30 = vmul.f32 %v558_v28, %v402_v15  ;;  %v425_v31 = vmul.f32 %v475_v26, %v417_v27 }
 0x4eb   :  { %v426_v32 = vmul.f32 %v475_v26, %v418_v30  ;;  %v433_v33 = vadd.f32 %v476_v29, %v425_v31 }
 0x4ed   :  { %v434_v34 = vadd.f32 %v476_v29, %v426_v32  ;;  %435 = vst.msk [vmem:[#allocation17] sm:$0xff] %vm148_vm0, %v433_v33 }
 0x4ef   :  { %436 = vst.msk [vmem:[#allocation17 + $0x8] sm:$0xff] %vm148_vm0, %v434_v34 }
 0x4f0   :  { %768 = shalt.err (!%p765_p6)
}
 0x4f1   :  { %s769_s13 = scalar_lea.hbm %s1020_s9, 256 }
 0x4f2   :  { %p770_p7 = scmp.ne.s32.totalorder %s1020_s9, %s769_s13  ;;  %p773_p8 = scmp.lt.u32.totalorder %s769_s13, %s1020_s9 }
 0x4f4   :  { %p775_p9 = pnand %p773_p8, %p770_p7 }
 0x4f6   :  { %778 = shalt.err (!%p775_p9)
}
 0x4f7   :  { %448 = dma.vmem_to_hbm [thread:$0]  %s443_s27, 256, %s1020_s9, [#allocation4], %s798_s7, %s798_s7, %s799_s18  }
 0x4f8   :  { %789 = dma.done.wait [#allocation4], 256  }
 0x4f9   :  { %790 = vsyncadd [#allocation4], 4294967040 }
 0x4fa   :  { %452 = vsyncpa [#allocation3], 1 }
 0x4fb   :  { %453 = vsyncpa [#allocation6], 1 }
 0x4fc   :  { %454 = vsyncpa [#allocation9], 1 }
 0x4fd   :  { %455 = vsyncpa [#allocation12], 1 }
 0x4fe   :  { %456 = vsyncpa [#allocation15], 1 }
 0x4ff   :  { %457 = vsyncpa [#allocation4], 1 }

// kernel: conformer_encoder_layer.5
= control target key start
LH: loop header
LB: loop body
LE: loop exit
PB: predicated region body
PF: predicated region fallthrough
CT: control target
= control target key end

     0   :  { %s3228_s0 = inlined_call_operand.hbm [shape: f32[2,8,32], index: 0, kind: input, shape index: {}]   ;;  %s3229_s1 = inlined_call_operand.hbm [shape: f32[1,32], index: 1, kind: input, shape index: {}]   ;;  %s3230_s2 = inlined_call_operand.hbm [shape: f32[1,32], index: 2, kind: input, shape index: {}]   ;;  %s3231_s3 = inlined_call_operand.hbm [shape: bf16[4,32,8], index: 3, kind: input, shape index: {}]   ;;  %s3232_s4 = inlined_call_operand.hbm [shape: f32[4,1,8], index: 4, kind: input, shape index: {}]   ;;  %s3233_s5 = inlined_call_operand.hbm [shape: bf16[4,32,8], index: 5, kind: input, shape index: {}]   ;;  %s3234_s6 = inlined_call_operand.hbm [shape: f32[4,1,8], index: 6, kind: input, shape index: {}]   ;;  %s3235_s7 = inlined_call_operand.hbm [shape: bf16[4,32,8], index: 7, kind: input, shape index: {}]   ;;  %s3236_s8 = inlined_call_operand.hbm [shape: f32[4,1,8], index: 8, kind: input, shape index: {}]   ;;  %s3237_s9 = inlined_call_operand.hbm [shape: bf16[4,8,32], index: 9, kind: input, shape index: {}]   ;;  %s3238_s10 = inlined_call_operand.hbm [shape: f32[1,32], index: 10, kind: input, shape index: {}]   ;;  %s3239_s11 = inlined_call_operand.hbm [shape: bf16[8,128], index: 11, kind: input, shape index: {}]   ;;  %s3240_s12 = inlined_call_operand.hbm [shape: f32[2,8,32], index: 12, kind: output, shape index: {}]  }
   0x1   :  { %3276 = sst [smem:[#allocation41_spill]] %s3228_s0 }
   0x2   :  { %3277 = sst [smem:[#allocation42_spill]] %s3229_s1 }
   0x3   :  { %3278 = sst [smem:[#allocation43_spill]] %s3230_s2 }
   0x4   :  { %3279 = sst [smem:[#allocation44_spill]] %s3231_s3 }
   0x5   :  { %3280 = sst [smem:[#allocation45_spill]] %s3232_s4 }
   0x6   :  { %3281 = sst [smem:[#allocation46_spill]] %s3233_s5 }
   0x7   :  { %3282 = sst [smem:[#allocation47_spill]] %s3234_s6 }
   0x8   :  { %3283 = sst [smem:[#allocation48_spill]] %s3235_s7 }
   0x9   :  { %3284 = sst [smem:[#allocation49_spill]] %s3236_s8 }
   0xa   :  { %3285 = sst [smem:[#allocation50_spill]] %s3237_s9 }
   0xb   :  { %3286 = sst [smem:[#allocation51_spill]] %s3238_s10 }
   0xc   :  { %3287 = sst [smem:[#allocation52_spill]] %s3239_s11 }
   0xd   :  { %3288 = sst [smem:[#allocation53_spill]] %s3240_s12 }
   0xe   :  { %17 = vsyncpa [#allocation5], 0 }
   0xf   :  { %19 = vsyncpa [#allocation5 + $0x1], 0 }
  0x10   :  { %20 = vsyncpa [#allocation8], 0 }
  0x11   :  { %21 = vsyncpa [#allocation11], 0 }
  0x12   :  { %23 = vsyncpa [#allocation11 + $0x1], 0 }
  0x13   :  { %24 = vsyncpa [#allocation14], 0 }
  0x14   :  { %26 = vsyncpa [#allocation14 + $0x1], 0 }
  0x15   :  { %27 = vsyncpa [#allocation17], 0 }
  0x16   :  { %29 = vsyncpa [#allocation17 + $0x1], 0 }
  0x17   :  { %30 = vsyncpa [#allocation20], 0 }
  0x18   :  { %32 = vsyncpa [#allocation20 + $0x1], 0 }
  0x19   :  { %33 = vsyncpa [#allocation23], 0 }
  0x1a   :  { %34 = vsyncpa [#allocation6], 0 }
  0x1b   :  { %36 = vsyncpa [#allocation6 + $0x1], 0  ;;  %s2542_s21 = smov 0   ;;  %s2544_s22 = smov 0  }
  0x1c   :  { %s2546_s23 = smov 0   ;;  %s2548_s24 = smov 0  }
  0x1d   :  { %s2550_s25 = smov 0   ;;  %s2552_s26 = smov 0  }
  0x1e   :  { %s2554_s27 = smov 0   ;;  %s2556_s28 = smov 0  }
  0x1f   :  { %s2558_s29 = smov 0   ;;  %s2560_s30 = smov 0  }
  0x20   :  { %s2562_s13 = smov 0  }
  0x21 LB: > { %3289 = sst [smem:[#allocation34_spill]] %s2405_s22  ;;  %s2596_s14 = sadd.s32 4294967295, %s2441_s13   ;;  %s2441_s13 = sphi %s2562_s13, %s42_s13   ;;  %s2437_s30 = sphi %s2560_s30, %s3366_s30   ;;  %s2433_s29 = sphi %s2558_s29, %s3365_s29   ;;  %s2429_s28 = sphi %s2556_s28, %s3364_s28   ;;  %s2425_s27 = sphi %s2554_s27, %s3363_s27   ;;  %s2421_s26 = sphi %s2552_s26, %s3362_s26   ;;  %s2417_s25 = sphi %s2550_s25, %s3361_s25   ;;  %s2413_s24 = sphi %s2548_s24, %s3360_s24   ;;  %s2409_s23 = sphi %s2546_s23, %s3359_s23   ;;  %s2405_s22 = sphi %s2544_s22, %s3356_s22   ;;  %s2401_s21 = sphi %s2542_s21, %s3358_s21  }
  0x22   : > { %3290 = sst [smem:[#allocation35_spill]] %s2409_s23  ;;  %p142_p0 = scmp.ne.s32.totalorder %s2405_s22, %s2401_s21 }
  0x23   : > { %3291 = sst [smem:[#allocation36_spill]] %s2425_s27  ;;  %p3246_p1 = scmp.eq.s32.totalorder %s2596_s14, 0 }
  0x24   : > { %3292 = sst [smem:[#allocation37_spill]] %s2429_s28  ;;  %p1584_p2 = scmp.ge.s32.totalorder %s2441_s13, 1 }
  0x25   : > { %p377_p3 = scmp.lt.s32.totalorder %s2441_s13, 9  ;;  %p2604_p4 = por %p142_p0, %p3246_p1 }
  0x26   : > { %s2443_s17 = smov [#allocation7]   ;;  %s2444_s19 = smov [#allocation21]  }
  0x27   : > { %s3293_s15 = scalar_select %p2604_p4, 1, 0 }
  0x28   : > { %p2608_p5 = pnand %p1584_p2, %p377_p3  ;;  %s390_s18 = sshll.u32 %s2443_s17, 4  ;;  %s391_s18 = int_to_ptr.vmem [resolvable:$true] %s390_s18 }
  0x29   : > { %3294 = sst [smem:[#allocation38_spill]] %s3293_s15  ;;  %s412_s20 = sshll.u32 %s2444_s19, 4  ;;  %s2620_s20 = int_to_ptr.vmem [resolvable:$true] %s412_s20 }
  0x2a   : > { %s3295_s16 = scalar_select %p2608_p5, 1, 0 }
  0x2b   : > { %p1744_p6 = pneg %p2608_p5  ;;  %s3298_s1 = sld [smem:[#allocation42_spill]] }
  0x2c   : > { %3296 = sst [smem:[#allocation39_spill]] %s3295_s16 }
  0x2d   : > { %p2616_p7 = pnand %p1744_p6, %p3246_p1 }
  0x2f   : > { %s3297_s21 = scalar_select %p2616_p7, 1, 0 }
  0x30   : > { %p2630_p9 = pneg %p2616_p7 }
  0x31   : > { %s1939_s27 = scalar_lea.hbm %s3298_s1, 16 }
  0x32   : > { %p1940_p8 = scmp.ne.s32.totalorder %s3298_s1, %s1939_s27  ;;  %p1946_p12 = scmp.lt.u32.totalorder %s1939_s27, %s3298_s1 }
  0x33   : > { %s3299_s17 = scalar_select %p2630_p9, 1, 0 }
  0x34   : > { %p1942_p10 = pnand %p2630_p9, %p1940_p8 }
  0x36   : > { %p1943_p11 = pneg %p1942_p10 }
  0x38   : > { %p1948_p13 = pnand %p1946_p12, %p1943_p11 }
  0x3a   : > { %1951 = shalt.err (!%p1948_p13)
}
  0x3b   : > { %s1952_s12 = scalar_lea.vmem %s391_s18, 16  ;;  %s1959_s9 = scalar_lea.vmem %s391_s18, 32 }
  0x3c   : > { %p1953_p0 = scmp.ne.s32.totalorder %s391_s18, %s1952_s12  ;;  %p1960_p6 = scmp.lt.s32.totalorder %s391_s18, %s391_s18 }
  0x3d   : > { %p1961_p1 = scmp.lt.s32.totalorder %s1959_s9, %s1952_s12 }
  0x3e   : > { %p1955_p2 = pnand %p1953_p0, %p2630_p9 }
  0x3f   : > { %p1962_p4 = por %p1961_p1, %p1960_p6 }
  0x40   : > { %p1956_p3 = pneg %p1955_p2 }
  0x42   : > { %p1963_p5 = pnand %p1962_p4, %p1956_p3 }
  0x44   : > { %1966 = shalt.err (!%p1963_p5)
}
  0x45   : > { %1747 = dma.hbm_to_vmem [thread:$0]  (!%p2616_p7), %s3298_s1, 16, %s391_s18, [#allocation8]  }
  0x46   : > { %s3300_s10 = sld [smem:[#allocation51_spill]] }
  0x4c   : > { %s1967_s19 = scalar_lea.hbm %s3300_s10, 16 }
  0x4d   : > { %p1968_p8 = scmp.ne.s32.totalorder %s3300_s10, %s1967_s19  ;;  %p1974_p4 = scmp.lt.u32.totalorder %s1967_s19, %s3300_s10 }
  0x4f   : > { %p1970_p10 = pnand %p1968_p8, %p2630_p9 }
  0x51   : > { %p1971_p1 = pneg %p1970_p10 }
  0x53   : > { %p1976_p5 = pnand %p1974_p4, %p1971_p1 }
  0x55   : > { %1979 = shalt.err (!%p1976_p5)
}
  0x56   : > { %s1980_s18 = scalar_lea.vmem %s2620_s20, 16  ;;  %s1987_s6 = scalar_lea.vmem %s2620_s20, 32 }
  0x57   : > { %p1981_p11 = scmp.ne.s32.totalorder %s2620_s20, %s1980_s18  ;;  %p1988_p0 = scmp.lt.s32.totalorder %s2620_s20, %s2620_s20 }
  0x58   : > { %p1989_p2 = scmp.lt.s32.totalorder %s1987_s6, %s1980_s18 }
  0x59   : > { %p1983_p12 = pnand %p1981_p11, %p2630_p9 }
  0x5a   : > { %p1990_p3 = por %p1989_p2, %p1988_p0 }
  0x5b   : > { %p1984_p13 = pneg %p1983_p12 }
  0x5d   : > { %p1991_p6 = pnand %p1990_p3, %p1984_p13 }
  0x5f   : > { %1994 = shalt.err (!%p1991_p6)
}
  0x60   : > { %1753 = dma.hbm_to_vmem [thread:$0]  (!%p2616_p7), %s3300_s10, 16, %s2620_s20, [#allocation20]  }
  0x61   : > { %p3254_p8 = scmp.eq.s32.totalorder %s2441_s13, 0  ;;  %p136_p10 = scmp.ne.s32.totalorder %s2409_s23, %s2405_s22 }
  0x62   : > { %p3253_p1 = scmp.lt.s32.totalorder %s2441_s13, 8  ;;  %s2676_s27 = sand.u32 1, %s2441_s13  }
  0x63   : > { %s2679_s16 = sand.u32 1, %s2409_s23   ;;  %p138_p4 = por %p136_p10, %p3254_p8 }
  0x64   : > { %3301 = sst [smem:[#allocation40_spill]] %s2679_s16  ;;  %s2684_s19 = sshll.u32 %s2679_s16, 4 }
  0x65   : > { %s2687_s12 = sshll.u32 %s2433_s29, 8  ;;  %s3302_s3 = sld [smem:[#allocation44_spill]] }
  0x66   : > { %s456_s6 = scalar_lea.vmem [#allocation10], %s2684_s19  ;;  %p2698_p5 = pnand %p3253_p1, %p138_p4 }
  0x67   : > { %s463_s8 = sshll.u32 %s456_s6, 4  ;;  %s2702_s8 = int_to_ptr.vmem [resolvable:$true] %s463_s8 }
  0x68   : > { %s3303_s28 = scalar_select %p2698_p5, 1, 0 }
  0x69   : > { %p2709_p12 = pneg %p2698_p5 }
  0x6b   : > { %s2693_s18 = scalar_lea.hbm %s3302_s3, %s2687_s12  ;;  %s2000_s10 = scalar_lea.hbm %s3302_s3, 1024 }
  0x6c   : > { %s1995_s1 = scalar_lea.hbm %s2693_s18, 256  ;;  %p2001_p2 = scmp.lt.u32.totalorder %s2693_s18, %s3302_s3 }
  0x6d   : > { %p1996_p11 = scmp.ne.s32.totalorder %s2693_s18, %s1995_s1  ;;  %p2002_p3 = scmp.lt.u32.totalorder %s2000_s10, %s1995_s1 }
  0x6e   : > { %s3304_s9 = scalar_select %p2709_p12, 1, 0 }
  0x6f   : > { %p1998_p13 = pnand %p2709_p12, %p1996_p11  ;;  %p2003_p6 = por %p2002_p3, %p2001_p2 }
  0x70   : > { %p2004_p10 = scmp.lt.u32.totalorder %s1995_s1, %s2693_s18 }
  0x71   : > { %p1999_p0 = pneg %p1998_p13 }
  0x72   : > { %p2005_p4 = por %p2004_p10, %p2003_p6 }
  0x74   : > { %p2006_p1 = pnand %p2005_p4, %p1999_p0 }
  0x76   : > { %2009 = shalt.err (!%p2006_p1)
}
  0x77   : > { %s2010_s15 = scalar_lea.vmem %s2702_s8, 256  ;;  %s2445_s20 = smov [#allocation10]  }
  0x78   : > { %p2011_p11 = scmp.ne.s32.totalorder %s2702_s8, %s2010_s15  ;;  %s2015_s6 = sshll.u32 %s2445_s20, 4  ;;  %s2016_s6 = int_to_ptr.vmem [resolvable:$false] %s2015_s6 }
  0x79   : > { %s2017_s4 = scalar_lea.vmem %s2016_s6, 512  ;;  %p2018_p7 = scmp.lt.s32.totalorder %s2702_s8, %s2016_s6 }
  0x7a   : > { %p2013_p13 = pnand %p2011_p11, %p2709_p12  ;;  %p2019_p9 = scmp.lt.s32.totalorder %s2017_s4, %s2010_s15 }
  0x7c   : > { %p2014_p8 = pneg %p2013_p13  ;;  %p2020_p2 = por %p2019_p9, %p2018_p7 }
  0x7e   : > { %p2021_p3 = pnand %p2020_p2, %p2014_p8 }
  0x80   : > { %2024 = shalt.err (!%p2021_p3)
}
  0x81   : > { %s2446_s1 = smov 64   ;;  %s2447_s10 = smov 4  }
  0x82   : > { %s3305_s22 = scalar_lea.sflag [#allocation11], %s2676_s27  ;;  %s3306_s5 = sld [smem:[#allocation46_spill]] }
  0x83   : > { %1763 = dma.hbm_to_vmem [thread:$0]  (!%p2698_p5), %s2693_s18, 256, %s2702_s8, %s3305_s22, %s2446_s1, %s2446_s1, %s2447_s10  }
  0x84   : > { %s494_s4 = scalar_lea.vmem [#allocation13], %s2684_s19  ;;  %s3269_s16 = scalar_lea.sflag [#allocation14], %s2676_s27 }
  0x85   : > { %s501_s3 = sshll.u32 %s494_s4, 4  ;;  %s2744_s3 = int_to_ptr.vmem [resolvable:$true] %s501_s3 }
  0x88   : > { %s2741_s6 = scalar_lea.hbm %s3306_s5, %s2687_s12  ;;  %s2030_s22 = scalar_lea.hbm %s3306_s5, 1024 }
  0x89   : > { %s2025_s0 = scalar_lea.hbm %s2741_s6, 256  ;;  %p2031_p1 = scmp.lt.u32.totalorder %s2741_s6, %s3306_s5 }
  0x8a   : > { %p2026_p7 = scmp.ne.s32.totalorder %s2741_s6, %s2025_s0  ;;  %p2032_p0 = scmp.lt.u32.totalorder %s2030_s22, %s2025_s0 }
  0x8b   : > { %p2034_p10 = scmp.lt.u32.totalorder %s2025_s0, %s2741_s6 }
  0x8c   : > { %p2028_p9 = pnand %p2026_p7, %p2709_p12  ;;  %p2033_p6 = por %p2032_p0, %p2031_p1 }
  0x8e   : > { %p2029_p8 = pneg %p2028_p9  ;;  %p2035_p4 = por %p2034_p10, %p2033_p6 }
  0x90   : > { %p2036_p11 = pnand %p2035_p4, %p2029_p8 }
  0x92   : > { %2039 = shalt.err (!%p2036_p11)
}
  0x93   : > { %s2040_s4 = scalar_lea.vmem %s2744_s3, 256  ;;  %s2448_s18 = smov [#allocation13]  }
  0x94   : > { %p2041_p13 = scmp.ne.s32.totalorder %s2744_s3, %s2040_s4  ;;  %s2045_s8 = sshll.u32 %s2448_s18, 4  ;;  %s2046_s8 = int_to_ptr.vmem [resolvable:$false] %s2045_s8 }
  0x95   : > { %s2047_s15 = scalar_lea.vmem %s2046_s8, 512  ;;  %p2048_p7 = scmp.lt.s32.totalorder %s2744_s3, %s2046_s8 }
  0x96   : > { %p2043_p2 = pnand %p2041_p13, %p2709_p12  ;;  %p2049_p9 = scmp.lt.s32.totalorder %s2047_s15, %s2040_s4 }
  0x98   : > { %p2044_p3 = pneg %p2043_p2  ;;  %p2050_p1 = por %p2049_p9, %p2048_p7 }
  0x9a   : > { %p2051_p0 = pnand %p2050_p1, %p2044_p3 }
  0x9c   : > { %2054 = shalt.err (!%p2051_p0)
}
  0x9d   : > { %1769 = dma.hbm_to_vmem [thread:$0]  (!%p2698_p5), %s2741_s6, 256, %s2744_s3, %s3269_s16, %s2446_s1, %s2446_s1, %s2447_s10  }
  0x9e   : > { %s3307_s7 = sld [smem:[#allocation48_spill]]  ;;  %s532_s4 = scalar_lea.vmem [#allocation16], %s2684_s19 }
  0x9f   : > { %s539_s18 = sshll.u32 %s532_s4, 4  ;;  %s2449_s8 = smov [#allocation9]   ;;  %s2780_s18 = int_to_ptr.vmem [resolvable:$true] %s539_s18 }
  0xa0   : > { %s2782_s15 = sshll.u32 %s2449_s8, 4  ;;  %s3268_s5 = scalar_lea.sflag [#allocation17], %s2676_s27  ;;  %s402_s15 = int_to_ptr.vmem [resolvable:$true] %s2782_s15 }
  0xa4   : > { %s2777_s20 = scalar_lea.hbm %s3307_s7, %s2687_s12  ;;  %s2060_s6 = scalar_lea.hbm %s3307_s7, 1024 }
  0xa5   : > { %s2055_s23 = scalar_lea.hbm %s2777_s20, 256  ;;  %p2061_p4 = scmp.lt.u32.totalorder %s2777_s20, %s3307_s7 }
  0xa6   : > { %p2056_p8 = scmp.ne.s32.totalorder %s2777_s20, %s2055_s23  ;;  %p2062_p11 = scmp.lt.u32.totalorder %s2060_s6, %s2055_s23 }
  0xa7   : > { %p2064_p2 = scmp.lt.u32.totalorder %s2055_s23, %s2777_s20 }
  0xa8   : > { %p2058_p6 = pnand %p2056_p8, %p2709_p12  ;;  %p2063_p13 = por %p2062_p11, %p2061_p4 }
  0xaa   : > { %p2059_p10 = pneg %p2058_p6  ;;  %p2065_p3 = por %p2064_p2, %p2063_p13 }
  0xac   : > { %p2066_p7 = pnand %p2065_p3, %p2059_p10 }
  0xae   : > { %2069 = shalt.err (!%p2066_p7)
}
  0xaf   : > { %s2070_s19 = scalar_lea.vmem %s2780_s18, 256  ;;  %s2450_s4 = smov [#allocation16]  }
  0xb0   : > { %p2071_p9 = scmp.ne.s32.totalorder %s2780_s18, %s2070_s19  ;;  %s2075_s8 = sshll.u32 %s2450_s4, 4  ;;  %s2076_s8 = int_to_ptr.vmem [resolvable:$false] %s2075_s8 }
  0xb1   : > { %s2077_s3 = scalar_lea.vmem %s2076_s8, 512  ;;  %p2078_p8 = scmp.lt.s32.totalorder %s2780_s18, %s2076_s8 }
  0xb2   : > { %p2073_p1 = pnand %p2071_p9, %p2709_p12  ;;  %p2079_p6 = scmp.lt.s32.totalorder %s2077_s3, %s2070_s19 }
  0xb4   : > { %p2074_p0 = pneg %p2073_p1  ;;  %p2080_p4 = por %p2079_p6, %p2078_p8 }
  0xb6   : > { %p2081_p11 = pnand %p2080_p4, %p2074_p0 }
  0xb8   : > { %2084 = shalt.err (!%p2081_p11)
}
  0xb9   : > { %1775 = dma.hbm_to_vmem [thread:$0]  (!%p2698_p5), %s2777_s20, 256, %s2780_s18, %s3268_s5, %s2446_s1, %s2446_s1, %s2447_s10  }
  0xba   : > { %s3308_s2 = sld [smem:[#allocation43_spill]]  ;;  %p3309_p13 = scmp.ne.s32.totalorder %s3299_s17, 0 }
  0xc0   : > { %s2085_s6 = scalar_lea.hbm %s3308_s2, 16 }
  0xc1   : > { %p2086_p10 = scmp.ne.s32.totalorder %s3308_s2, %s2085_s6  ;;  %p2092_p7 = scmp.lt.u32.totalorder %s2085_s6, %s3308_s2 }
  0xc3   : > { %p2088_p2 = pnand %p2086_p10, %p3309_p13 }
  0xc5   : > { %p2089_p3 = pneg %p2088_p2 }
  0xc7   : > { %p2094_p9 = pnand %p2092_p7, %p2089_p3 }
  0xc9   : > { %2097 = shalt.err (!%p2094_p9)
}
  0xca   : > { %s2098_s8 = scalar_lea.vmem %s402_s15, 16  ;;  %s2105_s1 = scalar_lea.vmem %s402_s15, 32 }
  0xcb   : > { %p2099_p1 = scmp.ne.s32.totalorder %s402_s15, %s2098_s8  ;;  %p2106_p6 = scmp.lt.s32.totalorder %s402_s15, %s402_s15 }
  0xcc   : > { %p2107_p4 = scmp.lt.s32.totalorder %s2105_s1, %s2098_s8 }
  0xcd   : > { %p2101_p0 = pnand %p2099_p1, %p3309_p13 }
  0xce   : > { %p2108_p11 = por %p2107_p4, %p2106_p6 }
  0xcf   : > { %p2102_p8 = pneg %p2101_p0 }
  0xd1   : > { %p2109_p5 = pnand %p2108_p11, %p2102_p8 }
  0xd3   : > { %2112 = shalt.err (!%p2109_p5)
}
  0xd4   : > { %p3310_p10 = scmp.ne.s32.totalorder %s3297_s21, 0  ;;  %s2451_s18 = smov [#allocation22]  }
  0xd5   : > { %s423_s3 = sshll.u32 %s2451_s18, 4  ;;  %s3311_s11 = sld [smem:[#allocation52_spill]]  ;;  %s424_s3 = int_to_ptr.vmem [resolvable:$true] %s423_s3 }
  0xd6   : > { %1750 = dma.hbm_to_vmem [thread:$0]  (!%p3310_p10), %s3308_s2, 16, %s402_s15, [#allocation8]  }
  0xdb   : > { %s2113_s6 = scalar_lea.hbm %s3311_s11, 64 }
  0xdc   : > { %p2114_p2 = scmp.ne.s32.totalorder %s3311_s11, %s2113_s6  ;;  %p2120_p7 = scmp.lt.u32.totalorder %s2113_s6, %s3311_s11 }
  0xde   : > { %p2116_p5 = pnand %p2114_p2, %p3309_p13 }
  0xe0   : > { %p2117_p3 = pneg %p2116_p5 }
  0xe2   : > { %p2122_p9 = pnand %p2120_p7, %p2117_p3 }
  0xe4   : > { %2125 = shalt.err (!%p2122_p9)
}
  0xe5   : > { %s2126_s15 = scalar_lea.vmem %s424_s3, 64  ;;  %p2134_p6 = scmp.lt.s32.totalorder %s424_s3, %s424_s3 }
  0xe6   : > { %p2127_p1 = scmp.ne.s32.totalorder %s424_s3, %s2126_s15  ;;  %p2135_p4 = scmp.lt.s32.totalorder %s2126_s15, %s2126_s15 }
  0xe8   : > { %p2129_p0 = pnand %p2127_p1, %p3309_p13  ;;  %p2136_p11 = por %p2135_p4, %p2134_p6 }
  0xea   : > { %p2130_p8 = pneg %p2129_p0 }
  0xec   : > { %p2137_p12 = pnand %p2136_p11, %p2130_p8 }
  0xee   : > { %2140 = shalt.err (!%p2137_p12)
}
  0xef   : > { %1756 = dma.hbm_to_vmem [thread:$0]  (!%p3310_p10), %s3311_s11, 64, %s424_s3, [#allocation23]  }
  0xf0   : > { %s3312_s21 = sld [smem:[#allocation35_spill]]  ;;  %s1583_s17 = sadd.s32 4294967294, %s2441_s13  }
  0xf1   : > { %s51_s10 = sadd.s32 1, %s2433_s29  ;;  %s54_s20 = sadd.s32 1, %s2437_s30 }
  0xf2   : > { %p52_p12 = scmp.ge.s32.totalorder %s51_s10, 4  ;;  %s61_s18 = sadd.s32 1, %s2421_s26 }
  0xf3   : > { %p68_p13 = scmp.ne.s32.totalorder %s2421_s26, %s2417_s25  ;;  %p3313_p10 = scmp.eq.s32.totalorder %s2441_s13, 0 }
  0xf4   : > { %s3368_s10 = smov (%p52_p12, %s51_s10), 0  ;;  %s3370_s20 = smov (!%p52_p12, %s54_s20), %s2437_s30 }
  0xf5   : > { %p2862_p2 = por %p3313_p10, %p68_p13  ;;  %p74_p5 = scmp.ne.s32.totalorder %s2417_s25, %s2413_s24 }
  0xf6   : > { %p56_p3 = scmp.ge.s32.totalorder %s3370_s20, 2  ;;  %s126_s23 = ssub.s32 %s2433_s29, %s3368_s10 }
  0xf7   : > { %p3315_p7 = scmp.eq.s32.totalorder %s2596_s14, 0  ;;  %p127_p1 = scmp.eq.s32.totalorder %s126_s23, 0 }
  0xf8   : > { %s3372_s20 = smov (%p56_p3, %s3370_s20), 0  ;;  %s3317_s6 = sadd.s32 1, %s3312_s21 }
  0xf9   : > { %p2875_p9 = por %p3315_p7, %p74_p5  ;;  %s3374_s21 = smov (!%p127_p1, %s3312_s21), %s3317_s6 }
  0xfa   : > { %s58_s0 = ssub.s32 %s2437_s30, %s3372_s20  ;;  %p364_p0 = scmp.eq.s32.totalorder %s2596_s14, 7 }
  0xfb   : > { %s3316_s12 = scalar_select %p2875_p9, 1, 0 }
  0xfc   : > { %p59_p8 = scmp.eq.s32.totalorder %s58_s0, 0  ;;  %p370_p6 = scmp.eq.s32.totalorder %s1583_s17, 7 }
  0xfd   : > { %p2892_p4 = por %p364_p0, %p68_p13  ;;  %s434_s19 = sand.u32 1, %s2421_s26  }
  0xfe   : > { %s2898_s4 = scalar_select %p59_p8, %s2421_s26, %s61_s18  }
  0xff   : > { %s3318_s22 = scalar_select %p2892_p4, 1, 0 }
 0x100   : > { %p2903_p11 = por %p370_p6, %p74_p5  ;;  %s1590_s8 = sshll.u32 %s434_s19, 3 }
 0x101   : > { %s1591_s1 = sshll.u32 %s2437_s30, 7  ;;  %s3320_s5 = sld [smem:[#allocation41_spill]] }
 0x102   : > { %s3319_s15 = scalar_select %p2903_p11, 1, 0 }
 0x103   : > { %s438_s17 = scalar_lea.vmem [#allocation4], %s1590_s8  ;;  %p3321_p12 = scmp.lt.s32.totalorder %s2441_s13, 8 }
 0x104   : > { %s445_s16 = sshll.u32 %s438_s17, 4  ;;  %s2924_s2 = sshll.u32 %s2433_s29, 4  ;;  %s2921_s16 = int_to_ptr.vmem [resolvable:$true] %s445_s16 }
 0x105   : > { %p2917_p13 = pnand %p3321_p12, %p2862_p2 }
 0x107   : > { %s2911_s0 = scalar_lea.hbm %s3320_s5, %s1591_s1  ;;  %s435_s1 = scalar_lea.sflag [#allocation5], %s434_s19 }
 0x108   : > { %s2141_s23 = scalar_lea.hbm %s2911_s0, 128  ;;  %p2143_p5 = pneg %p2917_p13 }
 0x109   : > { %p2142_p10 = scmp.ne.s32.totalorder %s2911_s0, %s2141_s23  ;;  %s2146_s6 = scalar_lea.hbm %s3320_s5, 256 }
 0x10a   : > { %p2147_p2 = scmp.lt.u32.totalorder %s2911_s0, %s3320_s5  ;;  %p2148_p1 = scmp.lt.u32.totalorder %s2146_s6, %s2141_s23 }
 0x10b   : > { %p2144_p3 = pnand %p2143_p5, %p2142_p10  ;;  %p2150_p8 = scmp.lt.u32.totalorder %s2141_s23, %s2911_s0 }
 0x10c   : > { %p2149_p0 = por %p2148_p1, %p2147_p2 }
 0x10d   : > { %p2145_p7 = pneg %p2144_p3 }
 0x10e   : > { %p2151_p6 = por %p2150_p8, %p2149_p0 }
 0x110   : > { %p2152_p12 = pnand %p2151_p6, %p2145_p7 }
 0x112   : > { %2155 = shalt.err (!%p2152_p12)
}
 0x113   : > { %s2156_s19 = scalar_lea.vmem %s2921_s16, 128  ;;  %s2452_s3 = smov [#allocation4]  }
 0x114   : > { %p2157_p10 = scmp.ne.s32.totalorder %s2921_s16, %s2156_s19  ;;  %s2161_s8 = sshll.u32 %s2452_s3, 4  ;;  %s2162_s8 = int_to_ptr.vmem [resolvable:$false] %s2161_s8 }
 0x115   : > { %s2163_s7 = scalar_lea.vmem %s2162_s8, 256  ;;  %p2164_p4 = scmp.lt.s32.totalorder %s2921_s16, %s2162_s8 }
 0x116   : > { %p2159_p3 = pnand %p2157_p10, %p2143_p5  ;;  %p2165_p2 = scmp.lt.s32.totalorder %s2163_s7, %s2156_s19 }
 0x118   : > { %p2160_p11 = pneg %p2159_p3  ;;  %p2166_p1 = por %p2165_p2, %p2164_p4 }
 0x11a   : > { %p2167_p0 = pnand %p2166_p1, %p2160_p11 }
 0x11c   : > { %2170 = shalt.err (!%p2167_p0)
}
 0x11d   : > { %s3323_s23 = sld [smem:[#allocation40_spill]]  ;;  %s3324_s5 = sld [smem:[#allocation45_spill]] }
 0x11e   : > { %1760 = dma.hbm_to_vmem [thread:$0]  (!%p2917_p13), %s2911_s0, 128, %s2921_s16, %s435_s1  }
 0x11f   : > { %p3325_p11 = scmp.ne.s32.totalorder %s3304_s9, 0 }
 0x123   : > { %s2955_s11 = scalar_lea.hbm %s3324_s5, %s2924_s2  ;;  %s476_s19 = scalar_lea.vmem [#allocation12], %s3323_s23 }
 0x124   : > { %s483_s3 = sshll.u32 %s476_s19, 4  ;;  %s2171_s8 = scalar_lea.hbm %s2955_s11, 16  ;;  %s484_s3 = int_to_ptr.vmem [resolvable:$true] %s483_s3 }
 0x125   : > { %p2172_p4 = scmp.ne.s32.totalorder %s2955_s11, %s2171_s8  ;;  %s2176_s16 = scalar_lea.hbm %s3324_s5, 64 }
 0x126   : > { %p2177_p13 = scmp.lt.u32.totalorder %s2955_s11, %s3324_s5  ;;  %p2178_p8 = scmp.lt.u32.totalorder %s2176_s16, %s2171_s8 }
 0x127   : > { %p2174_p5 = pnand %p2172_p4, %p3325_p11  ;;  %p2180_p12 = scmp.lt.u32.totalorder %s2171_s8, %s2955_s11 }
 0x128   : > { %p2179_p6 = por %p2178_p8, %p2177_p13 }
 0x129   : > { %p2175_p7 = pneg %p2174_p5 }
 0x12a   : > { %p2181_p10 = por %p2180_p12, %p2179_p6 }
 0x12c   : > { %p2182_p3 = pnand %p2181_p10, %p2175_p7 }
 0x12e   : > { %2185 = shalt.err (!%p2182_p3)
}
 0x12f   : > { %s2186_s6 = scalar_lea.vmem %s484_s3, 16  ;;  %s2453_s17 = smov [#allocation12]  }
 0x130   : > { %p2187_p2 = scmp.ne.s32.totalorder %s484_s3, %s2186_s6  ;;  %s2191_s19 = sshll.u32 %s2453_s17, 4  ;;  %s2192_s19 = int_to_ptr.vmem [resolvable:$false] %s2191_s19 }
 0x131   : > { %s2193_s18 = scalar_lea.vmem %s2192_s19, 32  ;;  %p2194_p4 = scmp.lt.s32.totalorder %s484_s3, %s2192_s19 }
 0x132   : > { %p2189_p1 = pnand %p2187_p2, %p3325_p11  ;;  %p2195_p5 = scmp.lt.s32.totalorder %s2193_s18, %s2186_s6 }
 0x134   : > { %p2190_p0 = pneg %p2189_p1  ;;  %p2196_p9 = por %p2195_p5, %p2194_p4 }
 0x136   : > { %p2197_p8 = pnand %p2196_p9, %p2190_p0 }
 0x138   : > { %2200 = shalt.err (!%p2197_p8)
}
 0x139   : > { %p3326_p13 = scmp.ne.s32.totalorder %s3303_s28, 0  ;;  %s3327_s8 = scalar_lea.sflag [#allocation11], %s2676_s27 }
 0x13a   : > { %s3328_s0 = sld [smem:[#allocation47_spill]]  ;;  %s514_s6 = scalar_lea.vmem [#allocation15], %s3323_s23 }
 0x13b   : > { %1766 = dma.hbm_to_vmem [thread:$0]  (!%p3326_p13), %s2955_s11, 16, %s484_s3, %s3327_s8  }
 0x13c   : > { %s521_s17 = sshll.u32 %s514_s6, 4  ;;  %s522_s17 = int_to_ptr.vmem [resolvable:$true] %s521_s17 }
 0x140   : > { %s2981_s1 = scalar_lea.hbm %s3328_s0, %s2924_s2  ;;  %s2206_s11 = scalar_lea.hbm %s3328_s0, 64 }
 0x141   : > { %s2201_s19 = scalar_lea.hbm %s2981_s1, 16  ;;  %p2207_p12 = scmp.lt.u32.totalorder %s2981_s1, %s3328_s0 }
 0x142   : > { %p2202_p9 = scmp.ne.s32.totalorder %s2981_s1, %s2201_s19  ;;  %p2208_p10 = scmp.lt.u32.totalorder %s2206_s11, %s2201_s19 }
 0x143   : > { %p2210_p2 = scmp.lt.u32.totalorder %s2201_s19, %s2981_s1 }
 0x144   : > { %p2204_p7 = pnand %p2202_p9, %p3325_p11  ;;  %p2209_p3 = por %p2208_p10, %p2207_p12 }
 0x146   : > { %p2205_p6 = pneg %p2204_p7  ;;  %p2211_p1 = por %p2210_p2, %p2209_p3 }
 0x148   : > { %p2212_p0 = pnand %p2211_p1, %p2205_p6 }
 0x14a   : > { %2215 = shalt.err (!%p2212_p0)
}
 0x14b   : > { %s2216_s7 = scalar_lea.vmem %s522_s17, 16  ;;  %s2454_s16 = smov [#allocation15]  }
 0x14c   : > { %p2217_p4 = scmp.ne.s32.totalorder %s522_s17, %s2216_s7  ;;  %s2221_s6 = sshll.u32 %s2454_s16, 4  ;;  %s2222_s6 = int_to_ptr.vmem [resolvable:$false] %s2221_s6 }
 0x14d   : > { %s2223_s5 = scalar_lea.vmem %s2222_s6, 32  ;;  %p2224_p9 = scmp.lt.s32.totalorder %s522_s17, %s2222_s6 }
 0x14e   : > { %p2219_p5 = pnand %p2217_p4, %p3325_p11  ;;  %p2225_p7 = scmp.lt.s32.totalorder %s2223_s5, %s2216_s7 }
 0x150   : > { %p2220_p8 = pneg %p2219_p5  ;;  %p2226_p13 = por %p2225_p7, %p2224_p9 }
 0x152   : > { %p2227_p10 = pnand %p2226_p13, %p2220_p8 }
 0x154   : > { %2230 = shalt.err (!%p2227_p10)
}
 0x155   : > { %p3329_p12 = scmp.ne.s32.totalorder %s3303_s28, 0  ;;  %s3330_s19 = scalar_lea.sflag [#allocation14], %s2676_s27 }
 0x156   : > { %s3331_s3 = sld [smem:[#allocation49_spill]]  ;;  %s552_s7 = scalar_lea.vmem [#allocation18], %s3323_s23 }
 0x157   : > { %1772 = dma.hbm_to_vmem [thread:$0]  (!%p3329_p12), %s2981_s1, 16, %s522_s17, %s3330_s19  }
 0x158   : > { %s559_s16 = sshll.u32 %s552_s7, 4  ;;  %s560_s16 = int_to_ptr.vmem [resolvable:$true] %s559_s16 }
 0x15c   : > { %s3007_s8 = scalar_lea.hbm %s3331_s3, %s2924_s2  ;;  %s2236_s1 = scalar_lea.hbm %s3331_s3, 64 }
 0x15d   : > { %s2231_s6 = scalar_lea.hbm %s3007_s8, 16  ;;  %p2237_p2 = scmp.lt.u32.totalorder %s3007_s8, %s3331_s3 }
 0x15e   : > { %p2232_p13 = scmp.ne.s32.totalorder %s3007_s8, %s2231_s6  ;;  %p2238_p1 = scmp.lt.u32.totalorder %s2236_s1, %s2231_s6 }
 0x15f   : > { %p2240_p4 = scmp.lt.u32.totalorder %s2231_s6, %s3007_s8 }
 0x160   : > { %p2234_p6 = pnand %p2232_p13, %p3325_p11  ;;  %p2239_p0 = por %p2238_p1, %p2237_p2 }
 0x162   : > { %p2235_p3 = pneg %p2234_p6  ;;  %p2241_p5 = por %p2240_p4, %p2239_p0 }
 0x164   : > { %p2242_p8 = pnand %p2241_p5, %p2235_p3 }
 0x166   : > { %2245 = shalt.err (!%p2242_p8)
}
 0x167   : > { %s2246_s2 = scalar_lea.vmem %s560_s16, 16  ;;  %s2455_s18 = smov [#allocation18]  }
 0x168   : > { %p2247_p9 = scmp.ne.s32.totalorder %s560_s16, %s2246_s2  ;;  %s2251_s11 = sshll.u32 %s2455_s18, 4  ;;  %s2252_s11 = int_to_ptr.vmem [resolvable:$false] %s2251_s11 }
 0x169   : > { %s2253_s0 = scalar_lea.vmem %s2252_s11, 32  ;;  %p2254_p13 = scmp.lt.s32.totalorder %s560_s16, %s2252_s11 }
 0x16a   : > { %p2249_p7 = pnand %p2247_p9, %p3325_p11  ;;  %p2255_p6 = scmp.lt.s32.totalorder %s2253_s0, %s2246_s2 }
 0x16c   : > { %p2250_p10 = pneg %p2249_p7  ;;  %p2256_p12 = por %p2255_p6, %p2254_p13 }
 0x16e   : > { %p2257_p1 = pnand %p2256_p12, %p2250_p10 }
 0x170   : > { %2260 = shalt.err (!%p2257_p1)
}
 0x171   : > { %p3332_p2 = scmp.ne.s32.totalorder %s3303_s28, 0  ;;  %s3333_s7 = scalar_lea.sflag [#allocation17], %s2676_s27 }
 0x172   : > { %s1604_s6 = sshll.u32 %s3323_s23, 2  ;;  %s1605_s5 = sshll.u32 %s2433_s29, 6 }
 0x173   : > { %1778 = dma.hbm_to_vmem [thread:$0]  (!%p3332_p2), %s3007_s8, 16, %s560_s16, %s3333_s7  }
 0x174   : > { %s3334_s19 = sld [smem:[#allocation50_spill]]  ;;  %s570_s2 = scalar_lea.vmem [#allocation19], %s1604_s6 }
 0x175   : > { %s577_s11 = sshll.u32 %s570_s2, 4  ;;  %s567_s0 = scalar_lea.sflag [#allocation20], %s2676_s27  ;;  %s578_s11 = int_to_ptr.vmem [resolvable:$true] %s577_s11 }
 0x17a   : > { %s3034_s18 = scalar_lea.hbm %s3334_s19, %s1605_s5  ;;  %s2266_s16 = scalar_lea.hbm %s3334_s19, 256 }
 0x17b   : > { %s2261_s3 = scalar_lea.hbm %s3034_s18, 64  ;;  %p2267_p4 = scmp.lt.u32.totalorder %s3034_s18, %s3334_s19 }
 0x17c   : > { %p2262_p12 = scmp.ne.s32.totalorder %s3034_s18, %s2261_s3  ;;  %p2268_p5 = scmp.lt.u32.totalorder %s2266_s16, %s2261_s3 }
 0x17d   : > { %p2270_p9 = scmp.lt.u32.totalorder %s2261_s3, %s3034_s18 }
 0x17e   : > { %p2264_p3 = pnand %p2262_p12, %p3325_p11  ;;  %p2269_p8 = por %p2268_p5, %p2267_p4 }
 0x180   : > { %p2265_p0 = pneg %p2264_p3  ;;  %p2271_p7 = por %p2270_p9, %p2269_p8 }
 0x182   : > { %p2272_p10 = pnand %p2271_p7, %p2265_p0 }
 0x184   : > { %2275 = shalt.err (!%p2272_p10)
}
 0x185   : > { %s2276_s27 = scalar_lea.vmem %s578_s11, 64  ;;  %s2456_s6 = smov [#allocation19]  }
 0x186   : > { %p2277_p13 = scmp.ne.s32.totalorder %s578_s11, %s2276_s27  ;;  %s2281_s1 = sshll.u32 %s2456_s6, 4  ;;  %s2282_s1 = int_to_ptr.vmem [resolvable:$false] %s2281_s1 }
 0x187   : > { %s2283_s17 = scalar_lea.vmem %s2282_s1, 128  ;;  %p2284_p12 = scmp.lt.s32.totalorder %s578_s11, %s2282_s1 }
 0x188   : > { %p2279_p6 = pnand %p2277_p13, %p3325_p11  ;;  %p2285_p3 = scmp.lt.s32.totalorder %s2283_s17, %s2276_s27 }
 0x18a   : > { %p2280_p1 = pneg %p2279_p6  ;;  %p2286_p2 = por %p2285_p3, %p2284_p12 }
 0x18c   : > { %p2287_p4 = pnand %p2286_p2, %p2280_p1 }
 0x18e   : > { %2290 = shalt.err (!%p2287_p4)
}
 0x18f   : > { %p3335_p5 = scmp.ne.s32.totalorder %s3303_s28, 0  ;;  %s3336_s3 = sld [smem:[#allocation39_spill]] }
 0x191   : > { %1781 = dma.hbm_to_vmem [thread:$0]  (!%p3335_p5), %s3034_s18, 64, %s578_s11, %s567_s0  }
 0x195   : > { %p3337_p0 = scmp.ne.s32.totalorder %s3336_s3, 0 }
 0x196   : > { %s3057_s9 = sand.u32 (!%p3337_p0), 1, %s2417_s25   ;;  %p3338_p11 = scmp.ne.s32.totalorder (!%p3337_p0), %s3316_s12, 0 }
 0x197   : > { %586 = sbr.rel (%p3337_p0) target bundleno = 2165 (0x875), region = 68  ;;  %s1607_s2 = sshll.u32 (!%p3337_p0), %s3057_s9, 3 }
 0x198   : > { %s589_s23 = scalar_lea.sflag (!%p3337_p0), [#allocation5], %s3057_s9  ;;  %s3063_s8 = scalar_lea.vmem (!%p3337_p0), [#allocation4], %s1607_s2 }
 0x19e   : > { %2364 = dma.done.wait (%p3338_p11), %s589_s23, 128  }
 0x19f   : > { %2366 = vsyncadd (%p3338_p11), %s589_s23, 4294967168  ;;  %p3339_p2 = scmp.eq.s32.totalorder %s2596_s14, 0 }
 0x1a1   : > { %2368 = dma.done.wait (%p3339_p2), [#allocation8], 32   ;;  %p3340_p8 = pmov %p3339_p2 }
 0x1a2   : > { %s3341_s28 = sld [smem:[#allocation34_spill]]  ;;  %s3342_s18 = sld [smem:[#allocation38_spill]] }
 0x1a3   : > { %2370 = vsyncadd (%p3340_p8), [#allocation8], 4294967264  ;;  %s605_s11 = sand.u32 1, %s2596_s14  }
 0x1a4   : > { %s606_s7 = scalar_lea.sflag [#allocation11], %s605_s11 }
 0x1a8   : > { %s3075_s0 = sand.u32 1, %s3341_s28   ;;  %p3343_p9 = scmp.ne.s32.totalorder %s3342_s18, 0 }
 0x1a9   : > { %s3078_s16 = sshll.u32 %s3075_s0, 4 }
 0x1aa   : > { %s609_s5 = scalar_lea.vmem [#allocation10], %s3078_s16 }
 0x1ab   : > { %2372 = dma.done.wait (%p3343_p9), %s606_s7, 272  }
 0x1ac   : > { %2374 = vsyncadd (%p3343_p9), %s606_s7, 4294967024  ;;  %s623_s27 = scalar_lea.sflag [#allocation14], %s605_s11  ;;  %s626_s6 = scalar_lea.vmem [#allocation13], %s3078_s16 }
 0x1ad   : > { %2376 = dma.done.wait (%p3343_p9), %s623_s27, 272  }
 0x1ae   : > { %2378 = vsyncadd (%p3343_p9), %s623_s27, 4294967024  ;;  %s634_s1 = scalar_lea.vmem [#allocation15], %s3075_s0  ;;  %s640_s17 = scalar_lea.sflag [#allocation17], %s605_s11 }
 0x1af   : > { %s643_s3 = scalar_lea.vmem [#allocation16], %s3078_s16 }
 0x1b0   : > { %2380 = dma.done.wait (%p3343_p9), %s640_s17, 272  }
 0x1b1   : > { %2382 = vsyncadd (%p3343_p9), %s640_s17, 4294967024  ;;  %s1613_s23 = sshll.u32 %s3075_s0, 2  ;;  %s651_s28 = scalar_lea.vmem [#allocation18], %s3075_s0 }
 0x1b2   : > { %s657_s7 = scalar_lea.sflag [#allocation20], %s605_s11  ;;  %s3099_s12 = scalar_lea.vmem [#allocation19], %s1613_s23 }
 0x1b3   : > { %2384 = dma.done.wait (%p3343_p9), %s657_s7, 64  }
 0x1b4   : > { %2386 = vsyncadd (%p3343_p9), %s657_s7, 4294967232  ;;  %p3344_p7 = pmov %p3339_p2 }
 0x1b5   : > { %p3345_p10 = pmov %p3339_p2 }
 0x1b6   : > { %2388 = dma.done.wait (%p3344_p7), [#allocation20], 16  }
 0x1b7   : > { %2390 = vsyncadd (%p3345_p10), [#allocation20], 4294967280  ;;  %p3346_p13 = pmov %p3339_p2 }
 0x1b8   : > { %p3347_p6 = pmov %p3339_p2 }
 0x1b9   : > { %2392 = dma.done.wait (%p3346_p13), [#allocation23], 64  }
 0x1ba   : > { %2394 = vsyncadd (%p3347_p6), [#allocation23], 4294967232  ;;  %s3115_s11 = scalar_lea.vmem [#allocation24], %s1607_s2  ;;  %s3348_s27 = sld [smem:[#allocation36_spill]] }
 0x1c0   : > { %p1617_p1 = scmp.ne.s32.totalorder %s3348_s27, 0 }
 0x1c1   : > { %v746_v0 = vld [vmem:[%s3063_s8] sm:$0xff] (!%p1617_p1)  ;;  %vm749_vm0 = vcmask (!%p1617_p1), 261120   ;;  %v2457_v2 = vmov (!%p1617_p1), 0.0   ;;  %v1618_v12 = vld [vmem:[#allocation7] ss:$0 sm:$0xff] (!%p1617_p1)  ;;  %vm779_vm1 = vcmask (!%p1617_p1), 257024  }
 0x1c2   : > { %745 = sbr.rel (%p1617_p1) target bundleno = 766 (0x2fe), region = 120  ;;  %v750_v1 = vsel (!%p1617_p1), %vm749_vm0, %v746_v0, 0.0  ;;  %781 = vst.msk [vmem:[#allocation3] sm:$0xff] (!%p1617_p1), %vm749_vm0, %v2457_v2  ;;  %v1619_v14 = vld [vmem:[#allocation9] ss:$0 sm:$0xff] (!%p1617_p1) }
 0x1c3   : > { %751 = vadd.xlane.f32.xlu0 (!%p1617_p1), %v750_v1 }
 0x250   : > { %v752_v3 = vpop.xlane.xlu0 %751 }
 0x251   : > { %v754_v4 = vmul.f32 0.03125, %v752_v3 }
 0x253   : > { %v755_v5 = vsub.f32 %v746_v0, %v754_v4 }
 0x255   : > { %v756_v6 = vmul.f32 %v755_v5, %v755_v5 }
 0x257   : > { %v757_v7 = vsel %vm749_vm0, %v756_v6, 0.0 }
 0x258   : > { %758 = vadd.xlane.f32.xlu0 %v757_v7 }
 0x2e5   : > { %v759_v8 = vpop.xlane.xlu0 %758 }
 0x2e6   : > { %v760_v9 = vmul.f32 0.03125, %v759_v8 }
 0x2e8   : > { %v761_v10 = vadd.f32 1e-05, %v760_v9 }
 0x2ea   : > { %1910 = vrsqrt.f32 %v761_v10 }
 0x2f4   : > { %v1911_v11 = vpop.eup %1910 }
 0x2f5   : > { %v763_v13 = vmul.f32 %v1911_v11, %v755_v5 }
 0x2f7   : > { %v770_v15 = vmul.f32 %v1618_v12, %v763_v13 }
 0x2f9   : > { %v777_v16 = vadd.f32 %v1619_v14, %v770_v15 }
 0x2fb   : > { %v778_v17 = vpack.c.bf16 %v777_v16, %v777_v16 }
 0x2fd   : > { %780 = vst.msk [vmem:[#allocation2] sm:$0xf] %vm779_vm1, %v778_v17 }
 0x2fe PF: > { %v1929_v18 = vld [vmem:[%s609_s5] sm:$0xff]   ;;  %v2458_v19 = vmov 0.0   ;;  %v1931_v21 = vld [vmem:[%s609_s5 + $0x8] sm:$0xff]   ;;  %vm2459_vm2 = vmmov 0   ;;  %vm984_vm3 = vcmask 1043456   ;;  %vm806_vm4 = vcmask 261120  }
 0x2ff   : > { %1662 = vmatprep.subr.bf16.mxu0 %v2458_v19  ;;  %1670 = vmatprep.subr.bf16.mxu1 %v2458_v19  ;;  %v1930_v20 = vld [vmem:[%s626_s6] sm:$0xff]   ;;  %v1932_v22 = vld [vmem:[%s626_s6 + $0x8] sm:$0xff]   ;;  %v2460_v28 = vmov 10   ;;  %v2461_v29 = vmov 32   ;;  %s3349_s14 = scalar_lea.vmem [#allocation12], %s3075_s0  ;;  %vm980_vm5 = vcmask 64512   ;;  %v1028_v13 = vlaneseq }
 0x300   : > { %1663 = vmatpush3.bf16.msra.mxu0 %v1929_v18  ;;  %1666 = vmatprep.mubr.msk.bf16.mxu0 %vm2459_vm2, %v2458_v19  ;;  %v1933_v24 = vld [vmem:[%s643_s3] sm:$0xff]   ;;  %v979_v25 = vld [vmem:[#allocation22] sm:$0xf]  ;;  %v1620_v30 = vld [vmem:[%s3349_s14] ss:$0 sm:$0xff]  ;;  %v2462_v58 = vmov 11  }
 0x301   : > { %1671 = vmatpush3.bf16.msra.mxu1 %v1930_v20  ;;  %1664 = vmatprep.subr.bf16.mxu0 %v2458_v19  ;;  %v986_v26 = vsel %vm984_vm3, %v979_v25, 0  ;;  %v1934_v27 = vld [vmem:[%s643_s3 + $0x8] sm:$0xff]   ;;  %v2463_v59 = vmov 9   ;;  %v2464_v0 = vmov 12   ;;  %v2465_v1 = vmov 13   ;;  %s3350_s2 = sld [smem:[#allocation36_spill]] }
 0x302   : > { %1672 = vmatprep.subr.bf16.mxu1 %v2458_v19  ;;  %1674 = vmatprep.mubr.msk.bf16.mxu1 %vm2459_vm2, %v2458_v19  ;;  %v1624_v31 = vld [vmem:[%s634_s1] ss:$0 sm:$0xff]  ;;  %v2466_v2 = vmov 14   ;;  %v2467_v3 = vmov 16   ;;  %v2468_v4 = vmov 15   ;;  %v2469_v5 = vmov 19  }
 0x303   : > { %1914 = vset.pattern.permute.xlu1 %v2460_v28  ;;  %1912 = vset.pattern.permute.xlu0 %v2461_v29  ;;  %v1628_v46 = vld [vmem:[%s651_s28] ss:$0 sm:$0xff]  ;;  %v2470_v6 = vmov 17   ;;  %v2471_v7 = vmov 22   ;;  %v2472_v8 = vmov 18   ;;  %v2473_v9 = vmov 23  }
 0x304   : > { %1665 = vmatpush3.bf16.msra.mxu0 %v1931_v21  ;;  %v782_v23 = vld [vmem:[#allocation2] sm:$0xf]  ;;  %v2474_v10 = vmov 20   ;;  %v2475_v11 = vmov 21   ;;  %v1029_v15 = vshrl.u32 %v1028_v13, 7  ;;  %v1031_v16 = vand.u32 127, %v1028_v13 }
 0x305   : > { %1673 = vmatpush3.bf16.msra.mxu1 %v1932_v22  ;;  %1678 = vmatprep.subr.bf16.mxu0 %v2458_v19 }
 0x306   : > { %1686 = vmatprep.subr.bf16.mxu1 %v2458_v19 }
 0x307   : > { %1667 = vmatmul.mubr.msk.bf16.vlgmr.msra.gmra.mrb[0].mxu0 %vm806_vm4, %v782_v23  ;;  %p1636_p12 = scmp.ne.s32.totalorder %s3350_s2, 3 }
 0x308   : > { %1675 = vmatmul.mubr.msk.bf16.vlgmr.msra.gmra.mrb[0].mxu1 %vm806_vm4, %v782_v23  ;;  %1679 = vmatpush3.bf16.msra.mxu0 %v1933_v24 }
 0x309   : > { %1680 = vmatprep.subr.bf16.mxu0 %v2458_v19  ;;  %1687 = vmatpush3.bf16.msra.mxu1 %v986_v26 }
 0x30a   : > { %1682 = vmatprep.mubr.msk.bf16.mxu0 %vm2459_vm2, %v2458_v19  ;;  %1688 = vmatprep.mubr.msk.bf16.mxu1 %vm2459_vm2, %v2458_v19 }
 0x30b   : > { %1698 = vmatprep.subr.bf16.mxu1 %v2458_v19 }
 0x30c   : > { %1681 = vmatpush3.bf16.msra.mxu0 %v1934_v27 }
 0x30d   : > { %1692 = vmatprep.subr.bf16.mxu0 %v2458_v19 }
 0x30f   : > { %1683 = vmatmul.mubr.msk.bf16.vlgmr.msra.gmra.mrb[4].mxu0 %vm806_vm4, %v782_v23 }
 0x310   : > { %1694 = vmatprep.mubr.msk.bf16.mxu0 %vm2459_vm2, %v2458_v19 }
 0x3da   : > { %v844_v32 = vpop.f32.mrb[0].mxu0 }
 0x3db   : > { %v845_v33 = vadd.f32 %v1620_v30, %v844_v32  ;;  %v908_v34 = vpop.f32.mrb[0].mxu1  ;;  %v1668_v35 = vpop.f32.mrb[1].mxu0 }
 0x3dc   : > { %v909_v36 = vadd.f32 %v1624_v31, %v908_v34  ;;  %v847_v37 = vpop.f32.mrb[2].mxu0  ;;  %v1676_v38 = vpop.f32.mrb[1].mxu1 }
 0x3dd   : > { %v850_v39 = vmul.f32 0.35355338, %v845_v33  ;;  %v1669_v40 = vpop.f32.mrb[3].mxu0  ;;  %v911_v41 = vpop.f32.mrb[2].mxu1 }
 0x3de   : > { %v978_v42 = vpack.c.bf16 %v909_v36, %v909_v36  ;;  %v1677_v43 = vpop.f32.mrb[3].mxu1 }
 0x3df   : > { %v977_v44 = vpack.c.bf16 %v850_v39, %v850_v39 }
 0x3e0   : > { %v1137_v45 = vsel %vm980_vm5, %v978_v42, 0 }
 0x3e1   : > { %1693 = vmatpush3.bf16.xpose.msra.mxu0 %v1137_v45  ;;  %1689 = vmatmul.mubr.msk.bf16.vlgmr.msra.gmra.mrb[4].mxu1 %vm980_vm5, %v977_v44 }
 0x3e2   : > { %1700 = vmatprep.mubr.msk.bf16.mxu1 %vm2459_vm2, %v2458_v19  ;;  %1704 = vmatprep.subr.bf16.mxu0 %v2458_v19  ;;  %v971_v47 = vpop.f32.mrb[4].mxu0 }
 0x3e3   : > { %v972_v48 = vadd.f32 %v1628_v46, %v971_v47  ;;  %v1684_v49 = vpop.f32.mrb[5].mxu0 }
 0x3e4   : > { %v974_v50 = vpop.f32.mrb[6].mxu0 }
 0x3e5   : > { %v1192_v51 = vpack.c.bf16 %v972_v48, %v972_v48  ;;  %v1685_v52 = vpop.f32.mrb[7].mxu0 }
 0x3e7   : > { %v1197_v53 = vsel %vm984_vm3, %v1192_v51, 0 }
 0x3e8   : > { %1695 = vmatmul.mubr.msk.bf16.vlgmr.msra.gmra.mrb[8].mxu0 %vm980_vm5, %v977_v44  ;;  %1699 = vmatpush3.bf16.msra.mxu1 %v1197_v53 }
 0x3e9   : > { %1706 = vmatprep.mubr.msk.bf16.mxu0 %vm2459_vm2, %v2458_v19  ;;  %v1032_v19 = vsub.s32 %v1031_v16, %v1029_v15 }
 0x3eb   : > { %vm1033_vm6 = vcmp.ge.s32.totalorder %v1032_v19, 16  ;;  %vm1046_vm7 = vcmp.eq.s32.totalorder %v1032_v19, 4294967289  ;;  %vm1052_vm8 = vcmp.eq.s32.totalorder %v1032_v19, 4294967290  ;;  %vm1058_vm9 = vcmp.eq.s32.totalorder %v1032_v19, 4294967291 }
 0x3ec   : > { %vm1064_vm10 = vcmp.eq.s32.totalorder %v1032_v19, 4294967292  ;;  %vm1070_vm11 = vcmp.eq.s32.totalorder %v1032_v19, 4294967293  ;;  %vm1076_vm12 = vcmp.eq.s32.totalorder %v1032_v19, 4294967294  ;;  %vm1082_vm13 = vcmp.eq.s32.totalorder %v1032_v19, 4294967295 }
 0x3ed   : > { %vm1088_vm14 = vcmp.eq.s32.totalorder %v1032_v19, 0  ;;  %vm1094_vm15 = vcmp.eq.s32.totalorder %v1032_v19, 1  ;;  %vm1100_vm0 = vcmp.eq.s32.totalorder %v1032_v19, 2  ;;  %vm1106_vm1 = vcmp.eq.s32.totalorder %v1032_v19, 3 }
 0x3ee   : > { %vm1112_vm2 = vcmp.eq.s32.totalorder %v1032_v19, 4 }
 0x4b4   : > { %v1022_v54 = vpop.f32.mrb[4].mxu1 }
 0x4b5   : > { %1054 = vperm.xlu1 %1914, %v1022_v54   ;;  %1042 = vperm.xlu0 %1912, %v1022_v54   ;;  %v1690_v55 = vpop.f32.mrb[5].mxu1 }
 0x4b6   : > { %v1025_v56 = vpop.f32.mrb[6].mxu1  ;;  %v1241_v55 = vld [vmem:[%s3099_s12] sm:$0xf] }
 0x4b7   : > { %v1691_v57 = vpop.f32.mrb[7].mxu1  ;;  %v1246_v56 = vsel %vm984_vm3, %v1241_v55, 0 }
 0x4b8   : > { %1705 = vmatpush3.bf16.msra.mxu0 %v1246_v56 }
 0x4b9   : > { %1915 = vset.pattern.permute.xlu1 %v2462_v58  ;;  %1913 = vset.pattern.permute.xlu0 %v2463_v59 }
 0x4ba   : > { %1060 = vperm.xlu1 %1915, %v1022_v54   ;;  %1048 = vperm.xlu0 %1913, %v1022_v54  }
 0x4bb   : > { %v3152_v60 = vpop.f32.mrb[8].mxu0 }
 0x4bc   : > { %v1696_v61 = vpop.f32.mrb[9].mxu0 }
 0x4bd   : > { %v1176_v62 = vpop.f32.mrb[10].mxu0 }
 0x4be   : > { %v1697_v63 = vpop.f32.mrb[11].mxu0  ;;  %1916 = vset.pattern.permute.xlu1 %v2464_v0  ;;  %1917 = vset.pattern.permute.xlu0 %v2465_v1 }
 0x4bf   : > { %1066 = vperm.xlu1 %1916, %v1022_v54   ;;  %1072 = vperm.xlu0 %1917, %v1022_v54  }
 0x4c3   : > { %1918 = vset.pattern.permute.xlu1 %v2466_v2  ;;  %1920 = vset.pattern.permute.xlu0 %v2467_v3  ;;  %v1239_v2 = vld [vmem:[#allocation3] sm:$0xff] }
 0x4c4   : > { %1078 = vperm.xlu1 %1918, %v1022_v54   ;;  %1090 = vperm.xlu0 %1920, %v1022_v54  }
 0x4c8   : > { %1919 = vset.pattern.permute.xlu1 %v2468_v4  ;;  %1923 = vset.pattern.permute.xlu0 %v2469_v5 }
 0x4c9   : > { %1084 = vperm.xlu1 %1919, %v1022_v54   ;;  %1108 = vperm.xlu0 %1923, %v1022_v54  }
 0x4cd   : > { %1921 = vset.pattern.permute.xlu1 %v2470_v6  ;;  %1926 = vset.pattern.permute.xlu0 %v2471_v7 }
 0x4ce   : > { %1096 = vperm.xlu1 %1921, %v1022_v54   ;;  %1126 = vperm.xlu0 %1926, %v1022_v54  }
 0x4d2   : > { %1922 = vset.pattern.permute.xlu1 %v2472_v8  ;;  %1928 = vset.pattern.permute.xlu0 %v2473_v9  ;;  %v1294_v8 = vld [vmem:[%s3063_s8] sm:$0xff] (!%p1636_p12) }
 0x4d3   : > { %1102 = vperm.xlu1 %1922, %v1022_v54  }
 0x4d7   : > { %1924 = vset.pattern.permute.xlu1 %v2474_v10  ;;  %v1637_v10 = vld [vmem:[#allocation21] ss:$0 sm:$0xff] (!%p1636_p12) }
 0x4d8   : > { %1114 = vperm.xlu1 %1924, %v1022_v54  }
 0x4dc   : > { %1925 = vset.pattern.permute.xlu1 %v2475_v11 }
 0x4dd   : > { %1120 = vperm.xlu1 %1925, %v1022_v54  }
 0x4e1   : > { %1927 = vset.pattern.permute.xlu1 %v2473_v9 }
 0x4e2   : > { %1132 = vperm.xlu1 %1927, %v1022_v54  }
 0x534   : > { %v1055_v12 = vpop.permute.xlu1 %1054  ;;  %v1043_v18 = vpop.permute.xlu0 %1042 }
 0x535   : > { %v1045_v22 = vsel %vm1033_vm6, %v1043_v18, 0.0  ;;  %vm1118_vm6 = vcmp.eq.s32.totalorder %v1032_v19, 5 }
 0x539   : > { %v1061_v14 = vpop.permute.xlu1 %1060  ;;  %v1049_v21 = vpop.permute.xlu0 %1048 }
 0x53a   : > { %v1051_v23 = vsel %vm1046_vm7, %v1049_v21, %v1045_v22  ;;  %vm1124_vm7 = vcmp.eq.s32.totalorder %v1032_v19, 6 }
 0x53b   : > { %v1057_v25 = vsel %vm1052_vm8, %v1055_v12, %v1051_v23  ;;  %vm1130_vm8 = vcmp.eq.s32.totalorder %v1032_v19, 7 }
 0x53c   : > { %v1063_v27 = vsel %vm1058_vm9, %v1061_v14, %v1057_v25 }
 0x53e   : > { %v1067_v17 = vpop.permute.xlu1 %1066  ;;  %v1073_v28 = vpop.permute.xlu0 %1072 }
 0x53f   : > { %v1069_v29 = vsel %vm1064_vm10, %v1067_v17, %v1063_v27 }
 0x540   : > { %v1075_v30 = vsel %vm1070_vm11, %v1073_v28, %v1069_v29 }
 0x543   : > { %v1079_v20 = vpop.permute.xlu1 %1078  ;;  %v1091_v33 = vpop.permute.xlu0 %1090 }
 0x544   : > { %v1081_v32 = vsel %vm1076_vm12, %v1079_v20, %v1075_v30 }
 0x548   : > { %v1085_v24 = vpop.permute.xlu1 %1084  ;;  %v1109_v39 = vpop.permute.xlu0 %1108 }
 0x549   : > { %v1087_v34 = vsel %vm1082_vm13, %v1085_v24, %v1081_v32 }
 0x54a   : > { %v1093_v35 = vsel %vm1088_vm14, %v1091_v33, %v1087_v34 }
 0x54d   : > { %v1097_v26 = vpop.permute.xlu1 %1096  ;;  %v1127_v44 = vpop.permute.xlu0 %1126 }
 0x54e   : > { %v1099_v37 = vsel %vm1094_vm15, %v1097_v26, %v1093_v35 }
 0x552   : > { %v1103_v31 = vpop.permute.xlu1 %1102 }
 0x553   : > { %v1105_v38 = vsel %vm1100_vm0, %v1103_v31, %v1099_v37 }
 0x554   : > { %v1111_v40 = vsel %vm1106_vm1, %v1109_v39, %v1105_v38 }
 0x557   : > { %v1115_v36 = vpop.permute.xlu1 %1114 }
 0x558   : > { %v1117_v42 = vsel %vm1112_vm2, %v1115_v36, %v1111_v40 }
 0x55c   : > { %v1121_v41 = vpop.permute.xlu1 %1120 }
 0x55d   : > { %v1123_v43 = vsel %vm1118_vm6, %v1121_v41, %v1117_v42 }
 0x55e   : > { %v1129_v46 = vsel %vm1124_vm7, %v1127_v44, %v1123_v43 }
 0x561   : > { %v1133_v45 = vpop.permute.xlu1 %1132 }
 0x562   : > { %v1135_v47 = vsel %vm1130_vm8, %v1133_v45, %v1129_v46 }
 0x563   : > { %v1174_v48 = vadd.f32 %v3152_v60, %v1135_v47 }
 0x565   : > { %v1179_v49 = vsel %vm980_vm5, %v1174_v48, -inf }
 0x566   : > { %1180 = vmax.xlane.f32.xlu1 %v1179_v49 }
 0x5f3   : > { %v1181_v50 = vpop.xlane.xlu1 %1180 }
 0x5f4   : > { %v1182_v51 = vsub.f32 %v1174_v48, %v1181_v50 }
 0x5f6   : > { %v1183_v52 = vmul.f32 1.442695, %v1182_v51 }
 0x5f8   : > { %1935 = vpow2.f32 %v1183_v52 }
 0x602   : > { %v1936_v53 = vpop.eup %1935 }
 0x603   : > { %v1185_v54 = vsel %vm980_vm5, %v1936_v53, 0.0 }
 0x604   : > { %1186 = vadd.xlane.f32.xlu0 %v1185_v54 }
 0x691   : > { %v1187_v57 = vpop.xlane.xlu0 %1186 }
 0x692   : > { %1937 = vrcp.f32 %v1187_v57 }
 0x69c   : > { %v1938_v58 = vpop.eup %1937 }
 0x69d   : > { %v1190_v59 = vmul.f32 %v1938_v58, %v1936_v53 }
 0x69f   : > { %v1191_v60 = vpack.c.bf16 %v1190_v59, %v1190_v59 }
 0x6a1   : > { %1701 = vmatmul.mubr.msk.bf16.vlgmr.msra.gmra.mrb[8].mxu1 %vm980_vm5, %v1191_v60 }
 0x774   : > { %v1233_v61 = vpop.f32.mrb[8].mxu1 }
 0x775   : > { %v1240_v62 = vpack.c.bf16 %v1233_v61, %v1233_v61  ;;  %v1702_v63 = vpop.f32.mrb[9].mxu1 }
 0x776   : > { %v1236_v0 = vpop.f32.mrb[10].mxu1 }
 0x777   : > { %v1703_v1 = vpop.f32.mrb[11].mxu1  ;;  %1707 = vmatmul.mubr.msk.bf16.vlgmr.msra.gmra.mrb[12].mxu0 %vm980_vm5, %v1240_v62 }
 0x847   : > { %1293 = sbr.rel (%p1636_p12) target bundleno = 2138 (0x85a), region = 124 }
 0x84a   : > { %v1282_v3 = vpop.f32.mrb[12].mxu0 }
 0x84b   : > { %v1288_v4 = vadd.f32 %v1282_v3, %v1239_v2  ;;  %v1708_v5 = vpop.f32.mrb[13].mxu0 }
 0x84c   : > { %v1285_v6 = vpop.f32.mrb[14].mxu0 }
 0x84d   : > { %1289 = vst.msk [vmem:[#allocation3] sm:$0xff] %vm806_vm4, %v1288_v4  ;;  %v1709_v7 = vpop.f32.mrb[15].mxu0 }
 0x854   : > { %v1295_v9 = vld [vmem:[#allocation3] sm:$0xff] }
 0x855   : > { %v1296_v11 = vadd.f32 %v1295_v9, %v1294_v8 }
 0x857   : > { %v1304_v12 = vadd.f32 %v1637_v10, %v1296_v11 }
 0x859   : > { %1305 = vst.msk [vmem:[%s3115_s11] sm:$0xff] %vm806_vm4, %v1304_v12 }
 0x85a PF: > { %s3351_s18 = sld [smem:[#allocation37_spill]]  ;;  %s3352_s12 = sld [smem:[#allocation53_spill]] }
 0x85b   : > { %s1320_s1 = sshll.u32 %s3115_s11, 4  ;;  %s1307_s8 = scalar_lea.sflag [#allocation6], %s3057_s9  ;;  %s1321_s1 = int_to_ptr.vmem [resolvable:$true] %s1320_s1 }
 0x85c   : > { %s2291_s17 = scalar_lea.vmem %s1321_s1, 128  ;;  %p3353_p4 = scmp.ne.s32.totalorder %s3318_s22, 0 }
 0x85d   : > { %p2292_p3 = scmp.ne.s32.totalorder %s1321_s1, %s2291_s17  ;;  %s2476_s3 = smov [#allocation24]  }
 0x85e   : > { %s2295_s23 = sshll.u32 %s2476_s3, 4  ;;  %s2296_s23 = int_to_ptr.vmem [resolvable:$false] %s2295_s23 }
 0x85f   : > { %p2293_p5 = pnand %p2292_p3, %p3353_p4  ;;  %s2297_s28 = scalar_lea.vmem %s2296_s23, 256 }
 0x860   : > { %s1639_s0 = sshll.u32 %s3351_s18, 7  ;;  %p2298_p11 = scmp.lt.s32.totalorder %s1321_s1, %s2296_s23 }
 0x861   : > { %s3170_s6 = scalar_lea.hbm %s3352_s12, %s1639_s0  ;;  %p2294_p0 = pneg %p2293_p5 }
 0x862   : > { %p2299_p2 = scmp.lt.s32.totalorder %s2297_s28, %s2291_s17 }
 0x864   : > { %p2300_p8 = por %p2299_p2, %p2298_p11 }
 0x866   : > { %p2301_p9 = pnand %p2300_p8, %p2294_p0 }
 0x868   : > { %2304 = shalt.err (!%p2301_p9)
}
 0x869   : > { %s2305_s9 = scalar_lea.hbm %s3170_s6, 128  ;;  %s2309_s27 = scalar_lea.hbm %s3352_s12, 256 }
 0x86a   : > { %p2306_p7 = scmp.ne.s32.totalorder %s3170_s6, %s2305_s9  ;;  %p2310_p6 = scmp.lt.u32.totalorder %s3170_s6, %s3352_s12 }
 0x86b   : > { %p2311_p1 = scmp.lt.u32.totalorder %s2309_s27, %s2305_s9  ;;  %p2313_p3 = scmp.lt.u32.totalorder %s2305_s9, %s3170_s6 }
 0x86c   : > { %p2307_p10 = pnand %p2306_p7, %p3353_p4 }
 0x86d   : > { %p2312_p12 = por %p2311_p1, %p2310_p6 }
 0x86e   : > { %p2308_p13 = pneg %p2307_p10 }
 0x86f   : > { %p2314_p5 = por %p2313_p3, %p2312_p12 }
 0x871   : > { %p2315_p0 = pnand %p2314_p5, %p2308_p13 }
 0x873   : > { %2318 = shalt.err (!%p2315_p0)
}
 0x874   : > { %1742 = dma.vmem_to_hbm [thread:$0]  (%p3353_p4), %s1321_s1, 128, %s3170_s6, %s1307_s8  }
 0x875 PF: > { %p1795_p11 = scmp.ge.s32.totalorder %s2441_s13, 2  ;;  %s1332_s18 = sand.u32 1, %s2413_s24  }
 0x876   : > { %p3354_p2 = scmp.ne.s32.totalorder %s3319_s15, 0  ;;  %s1333_s0 = scalar_lea.sflag [#allocation6], %s1332_s18 }
 0x878   : > { %p1783_p8 = pnand %p1795_p11, %p3354_p2 }
 0x87a   : > { %2396 = dma.done.wait (!%p1783_p8), %s1333_s0, 128  }
 0x87b   : > { %2398 = vsyncadd (!%p1783_p8), %s1333_s0, 4294967168  ;;  %s42_s13 = sadd.s32 1, %s2441_s13   ;;  %s3355_s16 = sld [smem:[#allocation34_spill]] }
 0x87c   : > { %p39_p9 = scmp.ge.s32.totalorder %s42_s13, 10   ;;  %s3356_s22 = sld [smem:[#allocation35_spill]] }
 0x87d   : > { %s3357_s5 = smov %s3374_s21  ;;  %s3360_s24 = smov %s2417_s25 }
 0x87e   : > { %s3359_s23 = smov %s3357_s5  ;;  %s3361_s25 = smov %s2421_s26 }
 0x87f   : > { %s3362_s26 = smov %s2898_s4  ;;  %s3363_s27 = smov %s2433_s29 }
 0x880   : > { %s3364_s28 = smov %s2437_s30  ;;  %s3365_s29 = smov %s3368_s10 }
 0x881   : > { %s3358_s21 = smov %s3355_s16  ;;  %s3366_s30 = smov %s3372_s20 }
 0x882   :  { %41 = sbr.rel (!%p39_p9) target bundleno = 33 (0x21), region = 222 }
 0x889   :  { %1338 = vsyncpa [#allocation5], 1 }
 0x88a   :  { %1340 = vsyncpa [#allocation5 + $0x1], 1 }
 0x88b   :  { %1341 = vsyncpa [#allocation8], 1 }
 0x88c   :  { %1342 = vsyncpa [#allocation11], 1 }
 0x88d   :  { %1344 = vsyncpa [#allocation11 + $0x1], 1 }
 0x88e   :  { %1345 = vsyncpa [#allocation14], 1 }
 0x88f   :  { %1347 = vsyncpa [#allocation14 + $0x1], 1 }
 0x890   :  { %1348 = vsyncpa [#allocation17], 1 }
 0x891   :  { %1350 = vsyncpa [#allocation17 + $0x1], 1 }
 0x892   :  { %1351 = vsyncpa [#allocation20], 1 }
 0x893   :  { %1353 = vsyncpa [#allocation20 + $0x1], 1 }
 0x894   :  { %1354 = vsyncpa [#allocation23], 1 }
 0x895   :  { %1355 = vsyncpa [#allocation6], 1 }
 0x896   :  { %1357 = vsyncpa [#allocation6 + $0x1], 1 }

// kernel: conformer_encoder_layer.6
= control target key start
LH: loop header
LB: loop body
LE: loop exit
PB: predicated region body
PF: predicated region fallthrough
CT: control target
= control target key end

     0   :  { %s2820_s0 = inlined_call_operand.hbm [shape: f32[2,8,32], index: 0, kind: input, shape index: {}]   ;;  %s2821_s1 = inlined_call_operand.hbm [shape: f32[1,32], index: 1, kind: input, shape index: {}]   ;;  %s2822_s2 = inlined_call_operand.hbm [shape: f32[1,32], index: 2, kind: input, shape index: {}]   ;;  %s2823_s3 = inlined_call_operand.hbm [shape: bf16[32,32], index: 3, kind: input, shape index: {}]   ;;  %s2824_s4 = inlined_call_operand.hbm [shape: f32[1,32], index: 4, kind: input, shape index: {}]   ;;  %s2825_s5 = inlined_call_operand.hbm [shape: bf16[32,32], index: 5, kind: input, shape index: {}]   ;;  %s2826_s6 = inlined_call_operand.hbm [shape: f32[1,32], index: 6, kind: input, shape index: {}]   ;;  %s2827_s7 = inlined_call_operand.hbm [shape: f32[31,32], index: 7, kind: input, shape index: {}]   ;;  %s2828_s8 = inlined_call_operand.hbm [shape: f32[1,32], index: 8, kind: input, shape index: {}]   ;;  %s2829_s9 = inlined_call_operand.hbm [shape: f32[1,32], index: 9, kind: input, shape index: {}]   ;;  %s2830_s10 = inlined_call_operand.hbm [shape: f32[1,32], index: 10, kind: input, shape index: {}]   ;;  %s2831_s11 = inlined_call_operand.hbm [shape: f32[1,32], index: 11, kind: input, shape index: {}]   ;;  %s2832_s12 = inlined_call_operand.hbm [shape: bf16[32,32], index: 12, kind: input, shape index: {}]   ;;  %s2833_s13 = inlined_call_operand.hbm [shape: f32[1,32], index: 13, kind: input, shape index: {}]   ;;  %s2834_s14 = inlined_call_operand.hbm [shape: f32[2,8,32], index: 14, kind: output, shape index: {}]  }
   0x1   :  { %2846 = sst [smem:[#allocation38_spill]] %s2820_s0 }
   0x2   :  { %2847 = sst [smem:[#allocation39_spill]] %s2821_s1 }
   0x3   :  { %2848 = sst [smem:[#allocation40_spill]] %s2822_s2 }
   0x4   :  { %2849 = sst [smem:[#allocation41_spill]] %s2823_s3 }
   0x5   :  { %2850 = sst [smem:[#allocation42_spill]] %s2824_s4 }
   0x6   :  { %2851 = sst [smem:[#allocation43_spill]] %s2834_s14 }
   0x7   :  { %19 = vsyncpa [#allocation4], 0 }
   0x8   :  { %21 = vsyncpa [#allocation4 + $0x1], 0 }
   0x9   :  { %22 = vsyncpa [#allocation7], 0 }
   0xa   :  { %23 = vsyncpa [#allocation10], 0 }
   0xb   :  { %24 = vsyncpa [#allocation13], 0 }
   0xc   :  { %25 = vsyncpa [#allocation16], 0 }
   0xd   :  { %26 = vsyncpa [#allocation19], 0 }
   0xe   :  { %27 = vsyncpa [#allocation22], 0 }
   0xf   :  { %28 = vsyncpa [#allocation25], 0 }
  0x10   :  { %29 = vsyncpa [#allocation5], 0 }
  0x11   :  { %31 = vsyncpa [#allocation5 + $0x1], 0  ;;  %s2246_s29 = smov 0   ;;  %s2248_s30 = smov 0  }
  0x12   :  { %s2250_s15 = smov 0   ;;  %s2252_s16 = smov 0  }
  0x13 LB: > { %s2150_s17 = smov [#allocation6]   ;;  %s2267_s19 = sadd.s32 4294967295, %s2148_s16   ;;  %s2148_s16 = sphi %s2252_s16, %s2894_s16   ;;  %s2144_s15 = sphi %s2250_s15, %s2893_s15   ;;  %s2140_s30 = sphi %s2248_s30, %s2892_s30   ;;  %s2136_s29 = sphi %s2246_s29, %s2891_s29  }
  0x14   : > { %s380_s18 = sshll.u32 %s2150_s17, 4  ;;  %2852 = sst [smem:[#allocation36_spill]] %s2267_s19  ;;  %s2272_s18 = int_to_ptr.vmem [resolvable:$true] %s380_s18 }
  0x15   : > { %p1370_p0 = scmp.ge.s32.totalorder %s2148_s16, 1  ;;  %p2841_p1 = scmp.eq.s32.totalorder %s2267_s19, 0 }
  0x16   : > { %p367_p2 = scmp.lt.s32.totalorder %s2148_s16, 3  ;;  %s2151_s21 = smov [#allocation9]  }
  0x17   : > { %s401_s22 = sshll.u32 %s2151_s21, 4  ;;  %s2152_s24 = smov [#allocation12]   ;;  %s2281_s22 = int_to_ptr.vmem [resolvable:$true] %s401_s22 }
  0x18   : > { %p2274_p3 = pnand %p1370_p0, %p367_p2  ;;  %s425_s25 = sshll.u32 %s2152_s24, 4  ;;  %s2289_s25 = int_to_ptr.vmem [resolvable:$true] %s425_s25 }
  0x19   : > { %s2856_s1 = sld [smem:[#allocation39_spill]] }
  0x1a   : > { %s2853_s20 = scalar_select %p2274_p3, 1, 0 }
  0x1b   : > { %p1515_p5 = pneg %p2274_p3 }
  0x1c   : > { %2854 = sst [smem:[#allocation37_spill]] %s2853_s20 }
  0x1d   : > { %p2285_p6 = pnand %p1515_p5, %p2841_p1 }
  0x1f   : > { %s1660_s28 = scalar_lea.hbm %s2856_s1, 16  ;;  %p2299_p8 = pneg %p2285_p6 }
  0x20   : > { %p1661_p7 = scmp.ne.s32.totalorder %s2856_s1, %s1660_s28  ;;  %p1667_p11 = scmp.lt.u32.totalorder %s1660_s28, %s2856_s1 }
  0x22   : > { %p1663_p9 = pnand %p2299_p8, %p1661_p7 }
  0x24   : > { %p1664_p10 = pneg %p1663_p9 }
  0x26   : > { %p1669_p12 = pnand %p1667_p11, %p1664_p10 }
  0x28   : > { %1672 = shalt.err (!%p1669_p12)
}
  0x29   : > { %s1673_s14 = scalar_lea.vmem %s2272_s18, 16  ;;  %s1680_s26 = scalar_lea.vmem %s2272_s18, 32 }
  0x2a   : > { %p1674_p13 = scmp.ne.s32.totalorder %s2272_s18, %s1673_s14  ;;  %p1681_p5 = scmp.lt.s32.totalorder %s2272_s18, %s2272_s18 }
  0x2b   : > { %p1682_p7 = scmp.lt.s32.totalorder %s1680_s26, %s1673_s14 }
  0x2c   : > { %p1676_p0 = pnand %p1674_p13, %p2299_p8 }
  0x2d   : > { %p1683_p9 = por %p1682_p7, %p1681_p5 }
  0x2e   : > { %p1677_p2 = pneg %p1676_p0 }
  0x30   : > { %p1684_p4 = pnand %p1683_p9, %p1677_p2 }
  0x32   : > { %1687 = shalt.err (!%p1684_p4)
}
  0x33   : > { %1518 = dma.hbm_to_vmem [thread:$0]  (!%p2285_p6), %s2856_s1, 16, %s2272_s18, [#allocation7]  }
  0x34   : > { %s2858_s3 = sld [smem:[#allocation41_spill]] }
  0x3a   : > { %s1688_s24 = scalar_lea.hbm %s2858_s3, 256 }
  0x3b   : > { %p1689_p10 = scmp.ne.s32.totalorder %s2858_s3, %s1688_s24  ;;  %p1695_p4 = scmp.lt.u32.totalorder %s1688_s24, %s2858_s3 }
  0x3d   : > { %p1691_p11 = pnand %p1689_p10, %p2299_p8 }
  0x3f   : > { %p1692_p12 = pneg %p1691_p11 }
  0x41   : > { %p1697_p13 = pnand %p1695_p4, %p1692_p12 }
  0x43   : > { %1700 = shalt.err (!%p1697_p13)
}
  0x44   : > { %s1701_s18 = scalar_lea.vmem %s2281_s22, 256  ;;  %p1709_p7 = scmp.lt.s32.totalorder %s2281_s22, %s2281_s22 }
  0x45   : > { %p1702_p0 = scmp.ne.s32.totalorder %s2281_s22, %s1701_s18  ;;  %p1710_p9 = scmp.lt.s32.totalorder %s1701_s18, %s1701_s18 }
  0x47   : > { %p1704_p2 = pnand %p1702_p0, %p2299_p8  ;;  %p1711_p10 = por %p1710_p9, %p1709_p7 }
  0x49   : > { %p1705_p5 = pneg %p1704_p2 }
  0x4b   : > { %p1712_p11 = pnand %p1711_p10, %p1705_p5 }
  0x4d   : > { %1715 = shalt.err (!%p1712_p11)
}
  0x4e   : > { %s2843_s0 = smov 64   ;;  %s2844_s19 = smov 4  }
  0x4f   : > { %1524 = dma.hbm_to_vmem [thread:$0]  (!%p2285_p6), %s2858_s3, 256, %s2281_s22, [#allocation10], %s2843_s0, %s2843_s0, %s2844_s19  }
  0x50   : > { %s1716_s24 = scalar_lea.hbm %s2825_s5, 256 }
  0x51   : > { %p1717_p12 = scmp.ne.s32.totalorder %s2825_s5, %s1716_s24  ;;  %p1723_p0 = scmp.lt.u32.totalorder %s1716_s24, %s2825_s5 }
  0x53   : > { %p1719_p4 = pnand %p1717_p12, %p2299_p8 }
  0x55   : > { %p1720_p13 = pneg %p1719_p4 }
  0x57   : > { %p1725_p2 = pnand %p1723_p0, %p1720_p13 }
  0x59   : > { %1728 = shalt.err (!%p1725_p2)
}
  0x5a   : > { %s1729_s22 = scalar_lea.vmem %s2289_s25, 256  ;;  %p1737_p10 = scmp.lt.s32.totalorder %s2289_s25, %s2289_s25 }
  0x5b   : > { %p1730_p5 = scmp.ne.s32.totalorder %s2289_s25, %s1729_s22  ;;  %p1738_p11 = scmp.lt.s32.totalorder %s1729_s22, %s1729_s22 }
  0x5d   : > { %p1732_p7 = pnand %p1730_p5, %p2299_p8  ;;  %p1739_p12 = por %p1738_p11, %p1737_p10 }
  0x5f   : > { %p1733_p9 = pneg %p1732_p7 }
  0x61   : > { %p1740_p4 = pnand %p1739_p12, %p1733_p9 }
  0x63   : > { %1743 = shalt.err (!%p1740_p4)
}
  0x64   : > { %1530 = dma.hbm_to_vmem [thread:$0]  (!%p2285_p6), %s2825_s5, 256, %s2289_s25, [#allocation13], %s2843_s0, %s2843_s0, %s2844_s19  }
  0x65   : > { %s2155_s27 = smov [#allocation15]   ;;  %s1744_s14 = scalar_lea.hbm %s2827_s7, 512 }
  0x66   : > { %s449_s28 = sshll.u32 %s2155_s27, 4  ;;  %p1745_p13 = scmp.ne.s32.totalorder %s2827_s7, %s1744_s14  ;;  %s450_s28 = int_to_ptr.vmem [resolvable:$true] %s449_s28 }
  0x67   : > { %p1751_p5 = scmp.lt.u32.totalorder %s1744_s14, %s2827_s7 }
  0x68   : > { %p1747_p0 = pnand %p1745_p13, %p2299_p8 }
  0x6a   : > { %p1748_p2 = pneg %p1747_p0 }
  0x6c   : > { %p1753_p7 = pnand %p1751_p5, %p1748_p2 }
  0x6e   : > { %1756 = shalt.err (!%p1753_p7)
}
  0x6f   : > { %s1757_s25 = scalar_lea.vmem %s450_s28, 512  ;;  %p1765_p12 = scmp.lt.s32.totalorder %s450_s28, %s450_s28 }
  0x70   : > { %p1758_p9 = scmp.ne.s32.totalorder %s450_s28, %s1757_s25  ;;  %p1766_p4 = scmp.lt.s32.totalorder %s1757_s25, %s1757_s25 }
  0x72   : > { %p1760_p10 = pnand %p1758_p9, %p2299_p8  ;;  %p1767_p1 = por %p1766_p4, %p1765_p12 }
  0x74   : > { %p1761_p11 = pneg %p1760_p10 }
  0x76   : > { %p1768_p3 = pnand %p1767_p1, %p1761_p11 }
  0x78   : > { %1771 = shalt.err (!%p1768_p3)
}
  0x79   : > { %s2156_s1 = smov 128   ;;  %s2157_s20 = smov 8  }
  0x7a   : > { %1536 = dma.hbm_to_vmem [thread:$0]  (!%p2285_p6), %s2827_s7, 512, %s450_s28, [#allocation16], %s2156_s1, %s2156_s1, %s2157_s20  }
  0x7b   : > { %s2158_s17 = smov [#allocation18]   ;;  %s2159_s14 = smov [#allocation21]  }
  0x7c   : > { %s474_s24 = sshll.u32 %s2158_s17, 4  ;;  %s496_s26 = sshll.u32 %s2159_s14, 4  ;;  %s475_s24 = int_to_ptr.vmem [resolvable:$true] %s474_s24  ;;  %s2391_s26 = int_to_ptr.vmem [resolvable:$true] %s496_s26 }
  0x7d   : > { %s1772_s25 = scalar_lea.hbm %s2829_s9, 16 }
  0x7e   : > { %p1773_p1 = scmp.ne.s32.totalorder %s2829_s9, %s1772_s25  ;;  %p1779_p0 = scmp.lt.u32.totalorder %s1772_s25, %s2829_s9 }
  0x80   : > { %p1775_p3 = pnand %p1773_p1, %p2299_p8 }
  0x82   : > { %p1776_p13 = pneg %p1775_p3 }
  0x84   : > { %p1781_p2 = pnand %p1779_p0, %p1776_p13 }
  0x86   : > { %1784 = shalt.err (!%p1781_p2)
}
  0x87   : > { %s1785_s1 = scalar_lea.vmem %s475_s24, 16  ;;  %s1792_s20 = scalar_lea.vmem %s475_s24, 32 }
  0x88   : > { %p1786_p5 = scmp.ne.s32.totalorder %s475_s24, %s1785_s1  ;;  %p1793_p10 = scmp.lt.s32.totalorder %s475_s24, %s475_s24 }
  0x89   : > { %p1794_p11 = scmp.lt.s32.totalorder %s1792_s20, %s1785_s1 }
  0x8a   : > { %p1788_p7 = pnand %p1786_p5, %p2299_p8 }
  0x8b   : > { %p1795_p12 = por %p1794_p11, %p1793_p10 }
  0x8c   : > { %p1789_p9 = pneg %p1788_p7 }
  0x8e   : > { %p1796_p4 = pnand %p1795_p12, %p1789_p9 }
  0x90   : > { %1799 = shalt.err (!%p1796_p4)
}
  0x91   : > { %1542 = dma.hbm_to_vmem [thread:$0]  (!%p2285_p6), %s2829_s9, 16, %s475_s24, [#allocation19]  }
  0x92   : > { %s1800_s14 = scalar_lea.hbm %s2831_s11, 16 }
  0x93   : > { %p1801_p1 = scmp.ne.s32.totalorder %s2831_s11, %s1800_s14  ;;  %p1807_p0 = scmp.lt.u32.totalorder %s1800_s14, %s2831_s11 }
  0x95   : > { %p1803_p3 = pnand %p1801_p1, %p2299_p8 }
  0x97   : > { %p1804_p13 = pneg %p1803_p3 }
  0x99   : > { %p1809_p2 = pnand %p1807_p0, %p1804_p13 }
  0x9b   : > { %1812 = shalt.err (!%p1809_p2)
}
  0x9c   : > { %s1813_s24 = scalar_lea.vmem %s2391_s26, 16  ;;  %s1820_s28 = scalar_lea.vmem %s2391_s26, 32 }
  0x9d   : > { %p1814_p5 = scmp.ne.s32.totalorder %s2391_s26, %s1813_s24  ;;  %p1821_p10 = scmp.lt.s32.totalorder %s2391_s26, %s2391_s26 }
  0x9e   : > { %p1822_p11 = scmp.lt.s32.totalorder %s1820_s28, %s1813_s24 }
  0x9f   : > { %p1816_p7 = pnand %p1814_p5, %p2299_p8 }
  0xa0   : > { %p1823_p12 = por %p1822_p11, %p1821_p10 }
  0xa1   : > { %p1817_p9 = pneg %p1816_p7 }
  0xa3   : > { %p1824_p4 = pnand %p1823_p12, %p1817_p9 }
  0xa5   : > { %1827 = shalt.err (!%p1824_p4)
}
  0xa6   : > { %1548 = dma.hbm_to_vmem [thread:$0]  (!%p2285_p6), %s2831_s11, 16, %s2391_s26, [#allocation22]  }
  0xa7   : > { %s2160_s0 = smov [#allocation8]   ;;  %s2161_s27 = smov [#allocation11]  }
  0xa8   : > { %s391_s19 = sshll.u32 %s2160_s0, 4  ;;  %s415_s17 = sshll.u32 %s2161_s27, 4  ;;  %s392_s19 = int_to_ptr.vmem [resolvable:$true] %s391_s19  ;;  %s2435_s17 = int_to_ptr.vmem [resolvable:$true] %s415_s17 }
  0xa9   : > { %s2859_s2 = sld [smem:[#allocation40_spill]] }
  0xaf   : > { %s1828_s22 = scalar_lea.hbm %s2859_s2, 16 }
  0xb0   : > { %p1829_p1 = scmp.ne.s32.totalorder %s2859_s2, %s1828_s22  ;;  %p1835_p0 = scmp.lt.u32.totalorder %s1828_s22, %s2859_s2 }
  0xb2   : > { %p1831_p3 = pnand %p1829_p1, %p2299_p8 }
  0xb4   : > { %p1832_p13 = pneg %p1831_p3 }
  0xb6   : > { %p1837_p2 = pnand %p1835_p0, %p1832_p13 }
  0xb8   : > { %1840 = shalt.err (!%p1837_p2)
}
  0xb9   : > { %s1841_s28 = scalar_lea.vmem %s392_s19, 16  ;;  %s1848_s1 = scalar_lea.vmem %s392_s19, 32 }
  0xba   : > { %p1842_p5 = scmp.ne.s32.totalorder %s392_s19, %s1841_s28  ;;  %p1849_p10 = scmp.lt.s32.totalorder %s392_s19, %s392_s19 }
  0xbb   : > { %p1850_p11 = scmp.lt.s32.totalorder %s1848_s1, %s1841_s28 }
  0xbc   : > { %p1844_p7 = pnand %p1842_p5, %p2299_p8 }
  0xbd   : > { %p1851_p12 = por %p1850_p11, %p1849_p10 }
  0xbe   : > { %p1845_p9 = pneg %p1844_p7 }
  0xc0   : > { %p1852_p4 = pnand %p1851_p12, %p1845_p9 }
  0xc2   : > { %1855 = shalt.err (!%p1852_p4)
}
  0xc3   : > { %1521 = dma.hbm_to_vmem [thread:$0]  (!%p2285_p6), %s2859_s2, 16, %s392_s19, [#allocation7]  }
  0xc4   : > { %s2860_s4 = sld [smem:[#allocation42_spill]] }
  0xca   : > { %s1856_s18 = scalar_lea.hbm %s2860_s4, 16 }
  0xcb   : > { %p1857_p1 = scmp.ne.s32.totalorder %s2860_s4, %s1856_s18  ;;  %p1863_p0 = scmp.lt.u32.totalorder %s1856_s18, %s2860_s4 }
  0xcd   : > { %p1859_p3 = pnand %p1857_p1, %p2299_p8 }
  0xcf   : > { %p1860_p13 = pneg %p1859_p3 }
  0xd1   : > { %p1865_p2 = pnand %p1863_p0, %p1860_p13 }
  0xd3   : > { %1868 = shalt.err (!%p1865_p2)
}
  0xd4   : > { %s1869_s19 = scalar_lea.vmem %s2435_s17, 16  ;;  %s1876_s26 = scalar_lea.vmem %s2435_s17, 32 }
  0xd5   : > { %p1870_p5 = scmp.ne.s32.totalorder %s2435_s17, %s1869_s19  ;;  %p1877_p10 = scmp.lt.s32.totalorder %s2435_s17, %s2435_s17 }
  0xd6   : > { %p1878_p11 = scmp.lt.s32.totalorder %s1876_s26, %s1869_s19 }
  0xd7   : > { %p1872_p7 = pnand %p1870_p5, %p2299_p8 }
  0xd8   : > { %p1879_p12 = por %p1878_p11, %p1877_p10 }
  0xd9   : > { %p1873_p9 = pneg %p1872_p7 }
  0xdb   : > { %p1880_p4 = pnand %p1879_p12, %p1873_p9 }
  0xdd   : > { %1883 = shalt.err (!%p1880_p4)
}
  0xde   : > { %1527 = dma.hbm_to_vmem [thread:$0]  (!%p2285_p6), %s2860_s4, 16, %s2435_s17, [#allocation10]  }
  0xdf   : > { %s2162_s20 = smov [#allocation14]   ;;  %s2163_s27 = smov [#allocation17]  }
  0xe0   : > { %s439_s0 = sshll.u32 %s2162_s20, 4  ;;  %s463_s14 = sshll.u32 %s2163_s27, 4  ;;  %s440_s0 = int_to_ptr.vmem [resolvable:$true] %s439_s0  ;;  %s2479_s14 = int_to_ptr.vmem [resolvable:$true] %s463_s14 }
  0xe1   : > { %s1884_s25 = scalar_lea.hbm %s2826_s6, 16 }
  0xe2   : > { %p1885_p1 = scmp.ne.s32.totalorder %s2826_s6, %s1884_s25  ;;  %p1891_p0 = scmp.lt.u32.totalorder %s1884_s25, %s2826_s6 }
  0xe4   : > { %p1887_p3 = pnand %p1885_p1, %p2299_p8 }
  0xe6   : > { %p1888_p13 = pneg %p1887_p3 }
  0xe8   : > { %p1893_p2 = pnand %p1891_p0, %p1888_p13 }
  0xea   : > { %1896 = shalt.err (!%p1893_p2)
}
  0xeb   : > { %s1897_s26 = scalar_lea.vmem %s440_s0, 16  ;;  %s1904_s28 = scalar_lea.vmem %s440_s0, 32 }
  0xec   : > { %p1898_p5 = scmp.ne.s32.totalorder %s440_s0, %s1897_s26  ;;  %p1905_p10 = scmp.lt.s32.totalorder %s440_s0, %s440_s0 }
  0xed   : > { %p1906_p11 = scmp.lt.s32.totalorder %s1904_s28, %s1897_s26 }
  0xee   : > { %p1900_p7 = pnand %p1898_p5, %p2299_p8 }
  0xef   : > { %p1907_p12 = por %p1906_p11, %p1905_p10 }
  0xf0   : > { %p1901_p9 = pneg %p1900_p7 }
  0xf2   : > { %p1908_p4 = pnand %p1907_p12, %p1901_p9 }
  0xf4   : > { %1911 = shalt.err (!%p1908_p4)
}
  0xf5   : > { %1533 = dma.hbm_to_vmem [thread:$0]  (!%p2285_p6), %s2826_s6, 16, %s440_s0, [#allocation13]  }
  0xf6   : > { %s1912_s22 = scalar_lea.hbm %s2828_s8, 16 }
  0xf7   : > { %p1913_p1 = scmp.ne.s32.totalorder %s2828_s8, %s1912_s22  ;;  %p1919_p0 = scmp.lt.u32.totalorder %s1912_s22, %s2828_s8 }
  0xf9   : > { %p1915_p3 = pnand %p1913_p1, %p2299_p8 }
  0xfb   : > { %p1916_p13 = pneg %p1915_p3 }
  0xfd   : > { %p1921_p2 = pnand %p1919_p0, %p1916_p13 }
  0xff   : > { %1924 = shalt.err (!%p1921_p2)
}
 0x100   : > { %s1925_s0 = scalar_lea.vmem %s2479_s14, 16  ;;  %s1932_s17 = scalar_lea.vmem %s2479_s14, 32 }
 0x101   : > { %p1926_p5 = scmp.ne.s32.totalorder %s2479_s14, %s1925_s0  ;;  %p1933_p10 = scmp.lt.s32.totalorder %s2479_s14, %s2479_s14 }
 0x102   : > { %p1934_p11 = scmp.lt.s32.totalorder %s1932_s17, %s1925_s0 }
 0x103   : > { %p1928_p7 = pnand %p1926_p5, %p2299_p8 }
 0x104   : > { %p1935_p12 = por %p1934_p11, %p1933_p10 }
 0x105   : > { %p1929_p9 = pneg %p1928_p7 }
 0x107   : > { %p1936_p4 = pnand %p1935_p12, %p1929_p9 }
 0x109   : > { %1939 = shalt.err (!%p1936_p4)
}
 0x10a   : > { %1539 = dma.hbm_to_vmem [thread:$0]  (!%p2285_p6), %s2828_s8, 16, %s2479_s14, [#allocation16]  }
 0x10b   : > { %s2164_s1 = smov [#allocation20]   ;;  %s2165_s27 = smov [#allocation23]  }
 0x10c   : > { %s485_s20 = sshll.u32 %s2164_s1, 4  ;;  %s506_s18 = sshll.u32 %s2165_s27, 4  ;;  %s486_s20 = int_to_ptr.vmem [resolvable:$true] %s485_s20  ;;  %s2523_s18 = int_to_ptr.vmem [resolvable:$true] %s506_s18 }
 0x10d   : > { %s1940_s3 = scalar_lea.hbm %s2830_s10, 16 }
 0x10e   : > { %p1941_p1 = scmp.ne.s32.totalorder %s2830_s10, %s1940_s3  ;;  %p1947_p0 = scmp.lt.u32.totalorder %s1940_s3, %s2830_s10 }
 0x110   : > { %p1943_p3 = pnand %p1941_p1, %p2299_p8 }
 0x112   : > { %p1944_p13 = pneg %p1943_p3 }
 0x114   : > { %p1949_p2 = pnand %p1947_p0, %p1944_p13 }
 0x116   : > { %1952 = shalt.err (!%p1949_p2)
}
 0x117   : > { %s1953_s17 = scalar_lea.vmem %s486_s20, 16  ;;  %s1960_s26 = scalar_lea.vmem %s486_s20, 32 }
 0x118   : > { %p1954_p5 = scmp.ne.s32.totalorder %s486_s20, %s1953_s17  ;;  %p1961_p10 = scmp.lt.s32.totalorder %s486_s20, %s486_s20 }
 0x119   : > { %p1962_p11 = scmp.lt.s32.totalorder %s1960_s26, %s1953_s17 }
 0x11a   : > { %p1956_p7 = pnand %p1954_p5, %p2299_p8 }
 0x11b   : > { %p1963_p12 = por %p1962_p11, %p1961_p10 }
 0x11c   : > { %p1957_p9 = pneg %p1956_p7 }
 0x11e   : > { %p1964_p4 = pnand %p1963_p12, %p1957_p9 }
 0x120   : > { %1967 = shalt.err (!%p1964_p4)
}
 0x121   : > { %1545 = dma.hbm_to_vmem [thread:$0]  (!%p2285_p6), %s2830_s10, 16, %s486_s20, [#allocation19]  }
 0x122   : > { %s1968_s25 = scalar_lea.hbm %s2832_s12, 256 }
 0x123   : > { %p1969_p1 = scmp.ne.s32.totalorder %s2832_s12, %s1968_s25  ;;  %p1975_p0 = scmp.lt.u32.totalorder %s1968_s25, %s2832_s12 }
 0x125   : > { %p1971_p3 = pnand %p1969_p1, %p2299_p8 }
 0x127   : > { %p1972_p13 = pneg %p1971_p3 }
 0x129   : > { %p1977_p2 = pnand %p1975_p0, %p1972_p13 }
 0x12b   : > { %1980 = shalt.err (!%p1977_p2)
}
 0x12c   : > { %s1981_s20 = scalar_lea.vmem %s2523_s18, 256  ;;  %p1989_p10 = scmp.lt.s32.totalorder %s2523_s18, %s2523_s18 }
 0x12d   : > { %p1982_p5 = scmp.ne.s32.totalorder %s2523_s18, %s1981_s20  ;;  %p1990_p11 = scmp.lt.s32.totalorder %s1981_s20, %s1981_s20 }
 0x12f   : > { %p1984_p7 = pnand %p1982_p5, %p2299_p8  ;;  %p1991_p12 = por %p1990_p11, %p1989_p10 }
 0x131   : > { %p1985_p9 = pneg %p1984_p7 }
 0x133   : > { %p1992_p4 = pnand %p1991_p12, %p1985_p9 }
 0x135   : > { %1995 = shalt.err (!%p1992_p4)
}
 0x136   : > { %s2861_s14 = smov 4   ;;  %s2862_s17 = smov 64  }
 0x137   : > { %1551 = dma.hbm_to_vmem [thread:$0]  (!%p2285_p6), %s2832_s12, 256, %s2523_s18, [#allocation22], %s2862_s17, %s2862_s17, %s2861_s14  }
 0x138   : > { %s2166_s1 = smov [#allocation24]   ;;  %s1996_s3 = scalar_lea.hbm %s2833_s13, 16 }
 0x139   : > { %s520_s27 = sshll.u32 %s2166_s1, 4  ;;  %p1997_p1 = scmp.ne.s32.totalorder %s2833_s13, %s1996_s3  ;;  %s521_s27 = int_to_ptr.vmem [resolvable:$true] %s520_s27 }
 0x13a   : > { %p2003_p0 = scmp.lt.u32.totalorder %s1996_s3, %s2833_s13 }
 0x13b   : > { %p1999_p3 = pnand %p1997_p1, %p2299_p8 }
 0x13d   : > { %p2000_p13 = pneg %p1999_p3 }
 0x13f   : > { %p2005_p2 = pnand %p2003_p0, %p2000_p13 }
 0x141   : > { %2008 = shalt.err (!%p2005_p2)
}
 0x142   : > { %s2009_s18 = scalar_lea.vmem %s521_s27, 16  ;;  %s2016_s14 = scalar_lea.vmem %s521_s27, 32 }
 0x143   : > { %p2010_p5 = scmp.ne.s32.totalorder %s521_s27, %s2009_s18  ;;  %p2017_p10 = scmp.lt.s32.totalorder %s521_s27, %s521_s27 }
 0x144   : > { %p2018_p11 = scmp.lt.s32.totalorder %s2016_s14, %s2009_s18 }
 0x145   : > { %p2012_p7 = pnand %p2010_p5, %p2299_p8 }
 0x146   : > { %p2019_p12 = por %p2018_p11, %p2017_p10 }
 0x147   : > { %p2013_p9 = pneg %p2012_p7 }
 0x149   : > { %p2020_p4 = pnand %p2019_p12, %p2013_p9 }
 0x14b   : > { %2023 = shalt.err (!%p2020_p4)
}
 0x14c   : > { %s2863_s21 = sld [smem:[#allocation36_spill]]  ;;  %s1369_s28 = sadd.s32 4294967294, %s2148_s16  }
 0x14d   : > { %1554 = dma.hbm_to_vmem [thread:$0]  (!%p2285_p6), %s2833_s13, 16, %s521_s27, [#allocation25]  }
 0x14e   : > { %s2589_s23 = sadd.s32 1, %s2148_s16   ;;  %s44_s1 = sadd.s32 1, %s2144_s15 }
 0x14f   : > { %s41_s22 = ssub.s32 %s2148_s16, %s2589_s23  ;;  %p51_p8 = scmp.ne.s32.totalorder %s2144_s15, %s2140_s30 }
 0x150   : > { %p42_p1 = scmp.eq.s32.totalorder %s41_s22, 0  ;;  %p52_p3 = scmp.eq.s32.totalorder %s2148_s16, 0 }
 0x151   : > { %p57_p13 = scmp.ne.s32.totalorder %s2140_s30, %s2136_s29  ;;  %p360_p9 = scmp.eq.s32.totalorder %s1369_s28, 1 }
 0x152   : > { %p354_p0 = scmp.eq.s32.totalorder %s2863_s21, 1  ;;  %p53_p2 = por %p52_p3, %p51_p8 }
 0x153   : > { %s2601_s25 = scalar_select %p42_p1, %s2144_s15, %s44_s1  }
 0x154   : > { %p2864_p5 = scmp.eq.s32.totalorder %s2863_s21, 0  ;;  %p2609_p6 = por %p354_p0, %p51_p8 }
 0x155   : > { %p1576_p10 = scmp.lt.s32.totalorder %s2148_s16, 2  ;;  %s531_s24 = sand.u32 1, %s2144_s15  }
 0x156   : > { %p2605_p7 = por %p2864_p5, %p57_p13  ;;  %p2615_p11 = por %p360_p9, %p57_p13 }
 0x157   : > { %s2866_s27 = scalar_select %p2609_p6, 1, 0 }
 0x158   : > { %s2867_s19 = scalar_select %p2615_p11, 1, 0 }
 0x159   : > { %s1385_s0 = sshll.u32 %s531_s24, 3  ;;  %s1386_s20 = sshll.u32 %s2148_s16, 7 }
 0x15a   : > { %s2868_s17 = sld [smem:[#allocation38_spill]]  ;;  %s535_s21 = scalar_lea.vmem [#allocation3], %s1385_s0 }
 0x15b   : > { %s542_s1 = sshll.u32 %s535_s21, 4  ;;  %p2625_p12 = pnand %p1576_p10, %p53_p2  ;;  %s2629_s1 = int_to_ptr.vmem [resolvable:$true] %s542_s1 }
 0x15c   : > { %s532_s22 = scalar_lea.sflag [#allocation4], %s531_s24 }
 0x15d   : > { %p2026_p8 = pneg %p2625_p12 }
 0x160   : > { %s2623_s26 = scalar_lea.hbm %s2868_s17, %s1386_s20  ;;  %s2029_s18 = scalar_lea.hbm %s2868_s17, 256 }
 0x161   : > { %s2024_s2 = scalar_lea.hbm %s2623_s26, 128  ;;  %p2030_p13 = scmp.lt.u32.totalorder %s2623_s26, %s2868_s17 }
 0x162   : > { %p2025_p4 = scmp.ne.s32.totalorder %s2623_s26, %s2024_s2  ;;  %p2031_p0 = scmp.lt.u32.totalorder %s2029_s18, %s2024_s2 }
 0x163   : > { %p2033_p5 = scmp.lt.u32.totalorder %s2024_s2, %s2623_s26 }
 0x164   : > { %p2027_p1 = pnand %p2026_p8, %p2025_p4  ;;  %p2032_p2 = por %p2031_p0, %p2030_p13 }
 0x166   : > { %p2028_p3 = pneg %p2027_p1  ;;  %p2034_p9 = por %p2033_p5, %p2032_p2 }
 0x168   : > { %p2035_p10 = pnand %p2034_p9, %p2028_p3 }
 0x16a   : > { %2038 = shalt.err (!%p2035_p10)
}
 0x16b   : > { %s2039_s24 = scalar_lea.vmem %s2629_s1, 128  ;;  %s2167_s20 = smov [#allocation3]  }
 0x16c   : > { %p2040_p4 = scmp.ne.s32.totalorder %s2629_s1, %s2039_s24  ;;  %s2044_s0 = sshll.u32 %s2167_s20, 4  ;;  %s2045_s0 = int_to_ptr.vmem [resolvable:$false] %s2044_s0 }
 0x16d   : > { %s2046_s14 = scalar_lea.vmem %s2045_s0, 256  ;;  %p2047_p6 = scmp.lt.s32.totalorder %s2629_s1, %s2045_s0 }
 0x16e   : > { %p2042_p1 = pnand %p2040_p4, %p2026_p8  ;;  %p2048_p13 = scmp.lt.s32.totalorder %s2046_s14, %s2039_s24 }
 0x170   : > { %p2043_p11 = pneg %p2042_p1  ;;  %p2049_p0 = por %p2048_p13, %p2047_p6 }
 0x172   : > { %p2050_p2 = pnand %p2049_p0, %p2043_p11 }
 0x174   : > { %2053 = shalt.err (!%p2050_p2)
}
 0x175   : > { %1558 = dma.hbm_to_vmem [thread:$0]  (!%p2625_p12), %s2623_s26, 128, %s2629_s1, %s532_s22  }
 0x176   : > { %s2870_s2 = sld [smem:[#allocation37_spill]] }
 0x17c   : > { %p2871_p3 = scmp.ne.s32.totalorder %s2870_s2, 0 }
 0x17d   : > { %s2659_s18 = sand.u32 (!%p2871_p3), 1, %s2140_s30  }
 0x17e   : > { %551 = sbr.rel (%p2871_p3) target bundleno = 1314 (0x522), region = 76  ;;  %s1388_s21 = sshll.u32 (!%p2871_p3), %s2659_s18, 3 }
 0x17f   : > { %s554_s24 = scalar_lea.sflag (!%p2871_p3), [#allocation4], %s2659_s18  ;;  %s557_s20 = scalar_lea.vmem (!%p2871_p3), [#allocation3], %s1388_s21 }
 0x185   : > { %2099 = dma.done.wait (%p2605_p7), %s554_s24, 128  }
 0x186   : > { %2101 = vsyncadd (%p2605_p7), %s554_s24, 4294967168  ;;  %s2872_s26 = sld [smem:[#allocation36_spill]] }
 0x18c   : > { %p2873_p6 = scmp.eq.s32.totalorder %s2872_s26, 0 }
 0x18e   : > { %2103 = dma.done.wait (%p2873_p6), [#allocation7], 32   ;;  %p2874_p11 = pmov %p2873_p6 }
 0x18f   : > { %p2875_p12 = pmov %p2873_p6 }
 0x190   : > { %2105 = vsyncadd (%p2874_p11), [#allocation7], 4294967264 }
 0x191   : > { %2107 = dma.done.wait (%p2875_p12), [#allocation10], 272   ;;  %p2876_p8 = pmov %p2873_p6 }
 0x192   : > { %p2877_p5 = pmov %p2873_p6 }
 0x193   : > { %2109 = vsyncadd (%p2876_p8), [#allocation10], 4294967024 }
 0x194   : > { %2111 = dma.done.wait (%p2877_p5), [#allocation13], 272   ;;  %p2878_p9 = pmov %p2877_p5 }
 0x195   : > { %p2879_p7 = pmov %p2877_p5 }
 0x196   : > { %2113 = vsyncadd (%p2878_p9), [#allocation13], 4294967024 }
 0x197   : > { %2115 = dma.done.wait (%p2879_p7), [#allocation16], 528   ;;  %p2880_p10 = pmov %p2877_p5 }
 0x198   : > { %p2881_p4 = pmov %p2877_p5 }
 0x199   : > { %2117 = vsyncadd (%p2880_p10), [#allocation16], 4294966768 }
 0x19a   : > { %2119 = dma.done.wait (%p2881_p4), [#allocation19], 32   ;;  %p2882_p1 = pmov %p2881_p4 }
 0x19c   : > { %2121 = vsyncadd (%p2882_p1), [#allocation19], 4294967264  ;;  %p2883_p13 = pmov %p2882_p1 }
 0x19d   : > { %p2884_p0 = pmov %p2882_p1 }
 0x19e   : > { %2123 = dma.done.wait (%p2883_p13), [#allocation22], 272  }
 0x19f   : > { %2125 = vsyncadd (%p2884_p0), [#allocation22], 4294967024  ;;  %p2885_p2 = pmov %p2884_p0 }
 0x1a0   : > { %p2886_p3 = pmov %p2884_p0 }
 0x1a1   : > { %2127 = dma.done.wait (%p2885_p2), [#allocation25], 16  }
 0x1a2   : > { %2129 = vsyncadd (%p2886_p3), [#allocation25], 4294967280  ;;  %vm658_vm0 = vcmask 261120   ;;  %v2168_v0 = vmov 0.0   ;;  %v2699_v1 = vld [vmem:[%s557_s20] sm:$0xff]  ;;  %v1642_v8 = vld [vmem:[#allocation9] sm:$0xff]   ;;  %v838_v37 = vlaneseq }
 0x1a3   : > { %824 = vst.msk [vmem:[#allocation2] sm:$0xff] %vm658_vm0, %v2168_v0  ;;  %827 = vst.msk [vmem:[#allocation2 + $0x17] sm:$0xff] %vm658_vm0, %v2168_v0  ;;  %1435 = vmatprep.subr.bf16.mxu0 %v2168_v0  ;;  %1443 = vmatprep.subr.bf16.mxu1 %v2168_v0  ;;  %v659_v2 = vsel %vm658_vm0, %v2699_v1, 0.0  ;;  %v1643_v9 = vld [vmem:[#allocation12] sm:$0xff]   ;;  %v1644_v10 = vld [vmem:[#allocation9 + $0x8] sm:$0xff]   ;;  %vm2169_vm1 = vmmov 0  }
 0x1a4   : > { %660 = vadd.xlane.f32.xlu0 %v659_v2  ;;  %1436 = vmatpush3.bf16.msra.mxu0 %v1642_v8  ;;  %v1645_v11 = vld [vmem:[#allocation12 + $0x8] sm:$0xff]   ;;  %vm825_vm2 = vcmask 260096   ;;  %v1646_v22 = vld [vmem:[#allocation23] sm:$0xff]   ;;  %v1409_v24 = vld [vmem:[#allocation14] ss:$0 sm:$0xff]  ;;  %v2710_v40 = vshrl.u32 %v838_v37, 7 }
 0x1a5   : > { %1444 = vmatpush3.bf16.msra.mxu1 %v1643_v9  ;;  %1437 = vmatprep.subr.bf16.mxu0 %v2168_v0  ;;  %v1403_v16 = vld [vmem:[#allocation6] ss:$0 sm:$0xff]  ;;  %v1404_v18 = vld [vmem:[#allocation8] ss:$0 sm:$0xff]  ;;  %826 = vst.msk [vmem:[#allocation2 + $0x8] sm:$0x7f] %vm825_vm2, %v2168_v0 }
 0x1a6   : > { %1445 = vmatprep.subr.bf16.mxu1 %v2168_v0  ;;  %1439 = vmatprep.mubr.msk.bf16.mxu0 %vm2169_vm1, %v2168_v0  ;;  %828 = vst.msk [vmem:[#allocation2 + $0x1f] sm:$0x7f] %vm825_vm2, %v2168_v0  ;;  %v1647_v23 = vld [vmem:[#allocation23 + $0x8] sm:$0xff]   ;;  %v1405_v38 = vld [vmem:[#allocation11] ss:$0 sm:$0xff]  ;;  %v2714_v43 = vsub.s32 0, %v2710_v40 }
 0x1a7   : > { %1447 = vmatprep.mubr.msk.bf16.mxu1 %vm2169_vm1, %v2168_v0  ;;  %v2716_v44 = vld [vmem:[#allocation15] sm:$0xff]  ;;  %v2718_v45 = vld [vmem:[#allocation15 + $0x8] sm:$0xff]  ;;  %v2722_v47 = vld [vmem:[#allocation15 + $0x10] sm:$0xff]  ;;  %v868_v54 = vsub.s32 1, %v2710_v40  ;;  %v896_v8 = vsub.s32 2, %v2710_v40  ;;  %s1423_s3 = sshll.u32 %s2872_s26, 7 }
 0x1a8   : > { %1438 = vmatpush3.bf16.msra.mxu0 %v1644_v10  ;;  %v841_v46 = vrot.slane %v2716_v44, %v2714_v43  ;;  %v2724_v48 = vld [vmem:[#allocation15 + $0x18] sm:$0x7f]  ;;  %v847_v50 = vrot.slane %v2718_v45, %v2714_v43  ;;  %v853_v52 = vrot.slane %v2722_v47, %v2714_v43  ;;  %s653_s1 = scalar_lea.vmem [#allocation26], %s1388_s21  ;;  %s2887_s14 = sld [smem:[#allocation43_spill]] }
 0x1a9   : > { %1446 = vmatpush3.bf16.msra.mxu1 %v1645_v11  ;;  %1451 = vmatprep.subr.bf16.mxu0 %v2168_v0  ;;  %v859_v53 = vrot.slane %v2724_v48, %v2714_v43  ;;  %v869_v59 = vrot.slane %v2716_v44, %v868_v54  ;;  %s1175_s28 = sshll.u32 %s653_s1, 4  ;;  %s1162_s21 = scalar_lea.sflag [#allocation5], %s2659_s18  ;;  %s2777_s28 = int_to_ptr.vmem [resolvable:$true] %s1175_s28 }
 0x1aa   : > { %v834_v49 = vld [vmem:[#allocation2] sm:$0xff]  ;;  %s2054_s24 = scalar_lea.vmem %s2777_s28, 128  ;;  %p2888_p11 = scmp.ne.s32.totalorder %s2866_s27, 0 }
 0x1ab   : > { %v842_v51 = vmul.f32 %v841_v46, %v834_v49  ;;  %v952_v46 = vsub.s32 4, %v2710_v40  ;;  %p2055_p6 = scmp.ne.s32.totalorder %s2777_s28, %s2054_s24  ;;  %s2170_s20 = smov [#allocation26]  }
 0x1ac   : > { %v862_v60 = vld [vmem:[#allocation2 + $0x1] sm:$0xff]  ;;  %s2058_s26 = sshll.u32 %s2170_s20, 4  ;;  %s2059_s26 = int_to_ptr.vmem [resolvable:$false] %s2058_s26 }
 0x1ad   : > { %v837_v57 = vld [vmem:[#allocation2 + $0x18] sm:$0xff]  ;;  %v870_v2 = vmul.f32 %v869_v59, %v862_v60  ;;  %v959_v60 = vrot.slane %v2718_v45, %v952_v46  ;;  %p2056_p12 = pnand %p2055_p6, %p2888_p11  ;;  %s2060_s4 = scalar_lea.vmem %s2059_s26, 256 }
 0x1ae   : > { %v860_v63 = vmul.f32 %v859_v53, %v837_v57  ;;  %v865_v10 = vld [vmem:[#allocation2 + $0x19] sm:$0xff]  ;;  %v953_v53 = vrot.slane %v2716_v44, %v952_v46  ;;  %s2775_s2 = scalar_lea.hbm %s2887_s14, %s1423_s3  ;;  %p2061_p5 = scmp.lt.s32.totalorder %s2777_s28, %s2059_s26 }
 0x1af   : > { %p2057_p8 = pneg %p2056_p12  ;;  %p2062_p9 = scmp.lt.s32.totalorder %s2060_s4, %s2054_s24 }
 0x1b1   : > { %p2063_p7 = por %p2062_p9, %p2061_p5 }
 0x1b3   : > { %p2064_p10 = pnand %p2063_p7, %p2057_p8 }
 0x231   : > { %v661_v3 = vpop.xlane.xlu0 %660 }
 0x232   : > { %v663_v4 = vmul.f32 0.03125, %v661_v3  ;;  %v875_v3 = vrot.slane %v2718_v45, %v868_v54 }
 0x234   : > { %v664_v5 = vsub.f32 %v2699_v1, %v663_v4 }
 0x236   : > { %v665_v6 = vmul.f32 %v664_v5, %v664_v5 }
 0x238   : > { %v666_v7 = vsel %vm658_vm0, %v665_v6, 0.0  ;;  %v881_v6 = vrot.slane %v2722_v47, %v868_v54 }
 0x239   : > { %667 = vadd.xlane.f32.xlu0 %v666_v7  ;;  %v887_v7 = vrot.slane %v2724_v48, %v868_v54  ;;  %v946_v54 = vld [vmem:[#allocation2 + $0x4] sm:$0xff] }
 0x23a   : > { %v954_v59 = vmul.f32 %v953_v53, %v946_v54 }
 0x2c6   : > { %v668_v12 = vpop.xlane.xlu0 %667 }
 0x2c7   : > { %v669_v13 = vmul.f32 0.03125, %v668_v12 }
 0x2c9   : > { %v670_v14 = vadd.f32 1e-05, %v669_v13  ;;  %v897_v13 = vrot.slane %v2716_v44, %v896_v8 }
 0x2cb   : > { %1648 = vrsqrt.f32 %v670_v14  ;;  %v890_v14 = vld [vmem:[#allocation2 + $0x2] sm:$0xff] }
 0x2d5   : > { %v1649_v15 = vpop.eup %1648 }
 0x2d6   : > { %v672_v17 = vmul.f32 %v1649_v15, %v664_v5 }
 0x2d8   : > { %v679_v19 = vmul.f32 %v1403_v16, %v672_v17  ;;  %v888_v17 = vmul.f32 %v887_v7, %v865_v10 }
 0x2da   : > { %v686_v20 = vadd.f32 %v1404_v18, %v679_v19  ;;  %v898_v19 = vmul.f32 %v897_v13, %v890_v14 }
 0x2dc   : > { %v687_v21 = vpack.c.bf16 %v686_v20, %v686_v20  ;;  %v903_v20 = vrot.slane %v2718_v45, %v896_v8 }
 0x2de   : > { %1440 = vmatmul.mubr.msk.bf16.vlgmr.msra.gmra.mrb[0].mxu0 %vm658_vm0, %v687_v21  ;;  %1448 = vmatmul.mubr.msk.bf16.vlgmr.msra.gmra.mrb[0].mxu1 %vm658_vm0, %v687_v21 }
 0x2df   : > { %1455 = vmatprep.mubr.msk.bf16.mxu0 %vm2169_vm1, %v2168_v0  ;;  %1452 = vmatpush3.bf16.msra.mxu0 %v1646_v22 }
 0x2e0   : > { %1453 = vmatprep.subr.bf16.mxu0 %v2168_v0 }
 0x2e3   : > { %1454 = vmatpush3.bf16.msra.mxu0 %v1647_v23  ;;  %v909_v23 = vrot.slane %v2722_v47, %v896_v8 }
 0x3b1   : > { %v748_v25 = vpop.f32.mrb[0].mxu0  ;;  %v811_v26 = vpop.f32.mrb[0].mxu1 }
 0x3b2   : > { %v812_v27 = vadd.f32 %v1409_v24, %v811_v26  ;;  %v1441_v28 = vpop.f32.mrb[1].mxu0  ;;  %v1449_v29 = vpop.f32.mrb[1].mxu1  ;;  %v749_v39 = vadd.f32 %v1405_v38, %v748_v25  ;;  %v915_v24 = vrot.slane %v2724_v48, %v896_v8  ;;  %v924_v25 = vsub.s32 3, %v2710_v40  ;;  %v974_v8 = vld [vmem:[#allocation2 + $0x5] sm:$0xff] }
 0x3b3   : > { %v751_v30 = vpop.f32.mrb[2].mxu0  ;;  %v814_v31 = vpop.f32.mrb[2].mxu1 }
 0x3b4   : > { %v1413_v32 = vmul.f32 -1.442695, %v812_v27  ;;  %v1442_v33 = vpop.f32.mrb[3].mxu0  ;;  %v1450_v34 = vpop.f32.mrb[3].mxu1  ;;  %v893_v27 = vld [vmem:[#allocation2 + $0x1a] sm:$0xff]  ;;  %v925_v30 = vrot.slane %v2716_v44, %v924_v25  ;;  %v918_v31 = vld [vmem:[#allocation2 + $0x3] sm:$0xff]  ;;  %v931_v37 = vrot.slane %v2718_v45, %v924_v25 }
 0x3b5   : > { %v916_v34 = vmul.f32 %v915_v24, %v893_v27 }
 0x3b6   : > { %1650 = vpow2.f32 %v1413_v32 }
 0x3c0   : > { %v1651_v35 = vpop.eup %1650 }
 0x3c1   : > { %v820_v36 = vadd.f32 1.0, %v1651_v35 }
 0x3c3   : > { %1652 = vrcp.f32 %v820_v36  ;;  %v926_v36 = vmul.f32 %v925_v30, %v918_v31 }
 0x3cd   : > { %v1653_v41 = vpop.eup %1652 }
 0x3ce   : > { %v823_v42 = vmul.f32 %v1653_v41, %v749_v39  ;;  %v937_v41 = vrot.slane %v2722_v47, %v924_v25 }
 0x3d0   : > { %829 = vst.msk [vmem:[#allocation2 + $0xf] sm:$0xff] %vm658_vm0, %v823_v42  ;;  %v943_v42 = vrot.slane %v2724_v48, %v924_v25  ;;  %v1059_v25 = vld [vmem:[#allocation21] sm:$0x1] }
 0x3d1   : > { %v1060_v30 = vadd.f32 1e-05, %v1059_v25 }
 0x3d3   : > { %1654 = vrsqrt.f32 %v1060_v30 }
 0x3d7   : > { %v835_v55 = vld [vmem:[#allocation2 + $0x8] sm:$0xff]  ;;  %v836_v56 = vld [vmem:[#allocation2 + $0x10] sm:$0xff] }
 0x3d8   : > { %v848_v58 = vmul.f32 %v847_v50, %v835_v55  ;;  %v854_v62 = vmul.f32 %v853_v52, %v836_v56  ;;  %v863_v4 = vld [vmem:[#allocation2 + $0x9] sm:$0xff]  ;;  %v864_v9 = vld [vmem:[#allocation2 + $0x11] sm:$0xff]  ;;  %v921_v50 = vld [vmem:[#allocation2 + $0x1b] sm:$0xff] }
 0x3d9   : > { %v876_v12 = vmul.f32 %v875_v3, %v863_v4  ;;  %v882_v16 = vmul.f32 %v881_v6, %v864_v9  ;;  %v891_v21 = vld [vmem:[#allocation2 + $0xa] sm:$0xff]  ;;  %v892_v26 = vld [vmem:[#allocation2 + $0x12] sm:$0xff]  ;;  %v944_v57 = vmul.f32 %v943_v42, %v921_v50  ;;  %v949_v4 = vld [vmem:[#allocation2 + $0x1c] sm:$0xff] }
 0x3da   : > { %v849_v61 = vadd.f32 %v848_v58, %v842_v51  ;;  %v904_v29 = vmul.f32 %v903_v20, %v891_v21  ;;  %v910_v33 = vmul.f32 %v909_v23, %v892_v26  ;;  %v919_v38 = vld [vmem:[#allocation2 + $0xb] sm:$0xff]  ;;  %v920_v49 = vld [vmem:[#allocation2 + $0x13] sm:$0xff]  ;;  %v977_v21 = vld [vmem:[#allocation2 + $0x1d] sm:$0xff] }
 0x3db   : > { %v932_v52 = vmul.f32 %v931_v37, %v919_v38  ;;  %v938_v56 = vmul.f32 %v937_v41, %v920_v49  ;;  %v948_v3 = vld [vmem:[#allocation2 + $0x14] sm:$0xff]  ;;  %v1002_v26 = vld [vmem:[#allocation2 + $0x6] sm:$0xff]  ;;  %v1035_v38 = vsub.s32 7, %v2710_v40  ;;  %v1005_v41 = vld [vmem:[#allocation2 + $0x1e] sm:$0xff] }
 0x3dc   : > { %v855_v0 = vadd.f32 %v854_v62, %v849_v61  ;;  %v947_v61 = vld [vmem:[#allocation2 + $0xc] sm:$0xff]  ;;  %v976_v20 = vld [vmem:[#allocation2 + $0x15] sm:$0xff] }
 0x3dd   : > { %v960_v6 = vmul.f32 %v959_v60, %v947_v61  ;;  %v1036_v49 = vrot.slane %v2716_v44, %v1035_v38  ;;  %v1030_v50 = vld [vmem:[#allocation2 + $0x7] sm:$0xff] }
 0x3de   : > { %v861_v5 = vadd.f32 %v860_v63, %v855_v0  ;;  %v965_v63 = vrot.slane %v2722_v47, %v952_v46  ;;  %v971_v0 = vrot.slane %v2724_v48, %v952_v46 }
 0x3e0   : > { %v871_v11 = vadd.f32 %v870_v2, %v861_v5  ;;  %v980_v2 = vsub.s32 5, %v2710_v40  ;;  %v966_v10 = vmul.f32 %v965_v63, %v948_v3 }
 0x3e2   : > { %v877_v15 = vadd.f32 %v876_v12, %v871_v11  ;;  %v981_v7 = vrot.slane %v2716_v44, %v980_v2  ;;  %v972_v11 = vmul.f32 %v971_v0, %v949_v4  ;;  %v987_v14 = vrot.slane %v2718_v45, %v980_v2  ;;  %v1414_v0 = vld [vmem:[#allocation20] ss:$0 sm:$0xff]  ;;  %v1415_v4 = vld [vmem:[#allocation17] ss:$0 sm:$0xff] }
 0x3e4   : > { %v883_v18 = vadd.f32 %v882_v16, %v877_v15  ;;  %v982_v13 = vmul.f32 %v981_v7, %v974_v8  ;;  %v975_v15 = vld [vmem:[#allocation2 + $0xd] sm:$0xff] }
 0x3e5   : > { %v988_v23 = vmul.f32 %v987_v14, %v975_v15 }
 0x3e6   : > { %v889_v22 = vadd.f32 %v888_v17, %v883_v18  ;;  %v993_v17 = vrot.slane %v2722_v47, %v980_v2  ;;  %v999_v18 = vrot.slane %v2724_v48, %v980_v2 }
 0x3e8   : > { %v899_v28 = vadd.f32 %v898_v19, %v889_v22  ;;  %v1008_v19 = vsub.s32 6, %v2710_v40 }
 0x3ea   : > { %v905_v32 = vadd.f32 %v904_v29, %v899_v28  ;;  %v1009_v24 = vrot.slane %v2716_v44, %v1008_v19  ;;  %v994_v28 = vmul.f32 %v993_v17, %v976_v20  ;;  %v1000_v29 = vmul.f32 %v999_v18, %v977_v21 }
 0x3eb   : > { %v1027_v37 = vrot.slane %v2724_v48, %v1008_v19  ;;  %v1031_v48 = vld [vmem:[#allocation2 + $0xf] sm:$0xff] }
 0x3ec   : > { %v911_v35 = vadd.f32 %v910_v33, %v905_v32  ;;  %v1010_v32 = vmul.f32 %v1009_v24, %v1002_v26  ;;  %v1015_v33 = vrot.slane %v2718_v45, %v1008_v19 }
 0x3ed   : > { %v1028_v53 = vmul.f32 %v1027_v37, %v1005_v41 }
 0x3ee   : > { %v917_v39 = vadd.f32 %v916_v34, %v911_v35  ;;  %v1003_v34 = vld [vmem:[#allocation2 + $0xe] sm:$0xff] }
 0x3ef   : > { %v1016_v46 = vmul.f32 %v1015_v33, %v1003_v34 }
 0x3f0   : > { %v927_v51 = vadd.f32 %v926_v36, %v917_v39  ;;  %v1021_v36 = vrot.slane %v2722_v47, %v1008_v19  ;;  %v1004_v39 = vld [vmem:[#allocation2 + $0x16] sm:$0xff] }
 0x3f2   : > { %v933_v55 = vadd.f32 %v932_v52, %v927_v51  ;;  %v1022_v52 = vmul.f32 %v1021_v36, %v1004_v39 }
 0x3f4   : > { %v939_v58 = vadd.f32 %v938_v56, %v933_v55  ;;  %v1037_v55 = vmul.f32 %v1036_v49, %v1030_v50  ;;  %v1042_v56 = vrot.slane %v2718_v45, %v1035_v38  ;;  %v1416_v45 = vld [vmem:[#allocation18] ss:$0 sm:$0xff] }
 0x3f6   : > { %v945_v62 = vadd.f32 %v944_v57, %v939_v58  ;;  %v1048_v57 = vrot.slane %v2722_v47, %v1035_v38  ;;  %v1032_v58 = vld [vmem:[#allocation2 + $0x17] sm:$0xff]  ;;  %v1043_v60 = vmul.f32 %v1042_v56, %v1031_v48 }
 0x3f8   : > { %v955_v5 = vadd.f32 %v954_v59, %v945_v62  ;;  %v1049_v61 = vmul.f32 %v1048_v57, %v1032_v58  ;;  %v1655_v62 = vpop.eup %1654 }
 0x3f9   : > { %v1066_v2 = vrot.slane %v1655_v62, %v2714_v43  ;;  %v1418_v43 = vld [vmem:[#allocation24] ss:$0 sm:$0xff] }
 0x3fa   : > { %v961_v9 = vadd.f32 %v960_v6, %v955_v5 }
 0x3fc   : > { %v967_v12 = vadd.f32 %v966_v10, %v961_v9 }
 0x3fe   : > { %v973_v16 = vadd.f32 %v972_v11, %v967_v12 }
 0x400   : > { %v983_v22 = vadd.f32 %v982_v13, %v973_v16 }
 0x402   : > { %v989_v27 = vadd.f32 %v988_v23, %v983_v22 }
 0x404   : > { %v995_v31 = vadd.f32 %v994_v28, %v989_v27 }
 0x406   : > { %v1001_v35 = vadd.f32 %v1000_v29, %v995_v31 }
 0x408   : > { %v1011_v42 = vadd.f32 %v1010_v32, %v1001_v35 }
 0x40a   : > { %v1017_v51 = vadd.f32 %v1016_v46, %v1011_v42 }
 0x40c   : > { %v1023_v54 = vadd.f32 %v1022_v52, %v1017_v51 }
 0x40e   : > { %v1029_v40 = vadd.f32 %v1028_v53, %v1023_v54 }
 0x410   : > { %v1038_v59 = vadd.f32 %v1037_v55, %v1029_v40 }
 0x412   : > { %v1044_v63 = vadd.f32 %v1043_v60, %v1038_v59 }
 0x414   : > { %v1050_v44 = vadd.f32 %v1049_v61, %v1044_v63 }
 0x416   : > { %v1058_v3 = vsub.f32 %v1050_v44, %v1414_v0 }
 0x418   : > { %v1068_v5 = vmul.f32 %v1066_v2, %v1058_v3 }
 0x41a   : > { %v1076_v6 = vmul.f32 %v1415_v4, %v1068_v5 }
 0x41c   : > { %v1084_v47 = vadd.f32 %v1416_v45, %v1076_v6 }
 0x41e   : > { %v1417_v7 = vmul.f32 -1.442695, %v1084_v47 }
 0x420   : > { %1656 = vpow2.f32 %v1417_v7 }
 0x42a   : > { %v1657_v8 = vpop.eup %1656 }
 0x42b   : > { %v1088_v9 = vadd.f32 1.0, %v1657_v8 }
 0x42d   : > { %1658 = vrcp.f32 %v1088_v9 }
 0x437   : > { %v1659_v10 = vpop.eup %1658 }
 0x438   : > { %v1091_v11 = vmul.f32 %v1659_v10, %v1084_v47 }
 0x43a   : > { %v1092_v12 = vpack.c.bf16 %v1091_v11, %v1091_v11 }
 0x43c   : > { %1456 = vmatmul.mubr.msk.bf16.vlgmr.msra.gmra.mrb[4].mxu0 %vm658_vm0, %v1092_v12 }
 0x50f   : > { %v1153_v13 = vpop.f32.mrb[4].mxu0 }
 0x510   : > { %v1154_v14 = vadd.f32 %v1418_v43, %v1153_v13  ;;  %v1457_v15 = vpop.f32.mrb[5].mxu0 }
 0x511   : > { %v1156_v16 = vpop.f32.mrb[6].mxu0 }
 0x512   : > { %v1159_v17 = vadd.f32 %v1154_v14, %v2699_v1  ;;  %v1458_v18 = vpop.f32.mrb[7].mxu0 }
 0x514   : > { %1160 = vst.msk [vmem:[%s653_s1] sm:$0xff] %vm658_vm0, %v1159_v17 }
 0x515   : > { %2067 = shalt.err (!%p2064_p10)
}
 0x516   : > { %s2068_s18 = scalar_lea.hbm %s2775_s2, 128  ;;  %s2072_s22 = scalar_lea.hbm %s2887_s14, 256 }
 0x517   : > { %p2069_p4 = scmp.ne.s32.totalorder %s2775_s2, %s2068_s18  ;;  %p2073_p0 = scmp.lt.u32.totalorder %s2775_s2, %s2887_s14 }
 0x518   : > { %p2074_p2 = scmp.lt.u32.totalorder %s2072_s22, %s2068_s18  ;;  %p2076_p6 = scmp.lt.u32.totalorder %s2068_s18, %s2775_s2 }
 0x519   : > { %p2070_p1 = pnand %p2069_p4, %p2888_p11 }
 0x51a   : > { %p2075_p3 = por %p2074_p2, %p2073_p0 }
 0x51b   : > { %p2071_p13 = pneg %p2070_p1 }
 0x51c   : > { %p2077_p12 = por %p2076_p6, %p2075_p3 }
 0x51e   : > { %p2078_p8 = pnand %p2077_p12, %p2071_p13 }
 0x520   : > { %2081 = shalt.err (!%p2078_p8)
}
 0x521   : > { %1513 = dma.vmem_to_hbm [thread:$0]  (%p2888_p11), %s2777_s28, 128, %s2775_s2, %s1162_s21  }
 0x522 PF: > { %s1187_s4 = sand.u32 1, %s2136_s29   ;;  %p2889_p5 = scmp.ne.s32.totalorder %s2867_s19, 0 }
 0x523   : > { %p2890_p9 = scmp.ge.s32.totalorder %s2148_s16, 2  ;;  %s1188_s24 = scalar_lea.sflag [#allocation5], %s1187_s4 }
 0x525   : > { %p1560_p7 = pnand %p2890_p9, %p2889_p5 }
 0x527   : > { %2131 = dma.done.wait (!%p1560_p7), %s1188_s24, 128  }
 0x528   : > { %2133 = vsyncadd (!%p1560_p7), %s1188_s24, 4294967168  ;;  %p34_p10 = scmp.ge.s32.totalorder %s2589_s23, 4   ;;  %s2891_s29 = smov %s2140_s30 }
 0x529   : > { %s2892_s30 = smov %s2144_s15  ;;  %s2893_s15 = smov %s2601_s25 }
 0x52a   : > { %s2894_s16 = smov %s2589_s23  ;;  %36 = sbr.rel (!%p34_p10) target bundleno = 19 (0x13), region = 173 }
 0x531   :  { %1193 = vsyncpa [#allocation4], 1 }
 0x532   :  { %1195 = vsyncpa [#allocation4 + $0x1], 1 }
 0x533   :  { %1196 = vsyncpa [#allocation7], 1 }
 0x534   :  { %1197 = vsyncpa [#allocation10], 1 }
 0x535   :  { %1198 = vsyncpa [#allocation13], 1 }
 0x536   :  { %1199 = vsyncpa [#allocation16], 1 }
 0x537   :  { %1200 = vsyncpa [#allocation19], 1 }
 0x538   :  { %1201 = vsyncpa [#allocation22], 1 }
 0x539   :  { %1202 = vsyncpa [#allocation25], 1 }
 0x53a   :  { %1203 = vsyncpa [#allocation5], 1 }
 0x53b   :  { %1205 = vsyncpa [#allocation5 + $0x1], 1 }

</bundles_post_ra>
